<compile_context>
chip_gen: v6e
topology: v6e:2x2x1
jax: 0.10.0
libtpu: 0.0.40
codegen_flags: <defaults>
</compile_context>

<pallas_src>
import jax
import jax.numpy as jnp
import numpy as np
from jax import lax
from jax.experimental import pallas as pl
from jax.experimental.pallas import tpu as pltpu


def residual_block_kernel(x_ref, w1_ref, w2_ref, b_ref, o_ref, pad_ref):
    """One batch element per grid step.  Channel dims are lane-padded to Cp (multiple of 128).

    x_ref   : (H, W, Cp)        un-padded input tile (NHWC, batch dim squeezed), f32
    w1_ref  : (3, 3*Cp, Cp)     conv1 weights (BN1 scale folded), bf16; rows per ky are the
                                three kx taps stacked on the contraction dim
    w2_ref  : (3, 3*Cp, Cp)     conv2 weights (BN2 scale folded), bf16
    b_ref   : (2, Cp)           [bias1, bias2] (conv bias + BN shift folded), f32
    o_ref   : (H, W, Cp)        output tile, f32
    pad_ref : (H+2, W+2, Cp)    bf16 VMEM scratch, reused as padded-x then padded-h
    """
    H, W, C = o_ref.shape
    K = 3 * C

    b = b_ref[...]                                    # (2, C) f32
    bias1, bias2 = b[0:1], b[1:2]                     # (1, C), broadcast over (H*W, C)

    x = x_ref[...]                                    # (H, W, C) f32 (residual path stays f32)

    # Zero only the 1-wide halo border; the interior is fully overwritten below.  Re-done every
    # step so the kernel stays correct when the "parallel" batch axis is sharded across
    # TensorCores (each core has its own scratch instance).
    zrow = jnp.zeros((1, W + 2, C), pad_ref.dtype)
    zcol = jnp.zeros((H, 1, C), pad_ref.dtype)
    pad_ref[pl.ds(0, 1), :, :] = zrow
    pad_ref[pl.ds(H + 1, 1), :, :] = zrow
    pad_ref[pl.ds(1, H), pl.ds(0, 1), :] = zcol
    pad_ref[pl.ds(1, H), pl.ds(W + 1, 1), :] = zcol

    # Stage the bf16 input in the interior.
    pad_ref[pl.ds(1, H), pl.ds(1, W), :] = x.astype(pad_ref.dtype)

    def conv3x3(w_ref):
        # 3x3 "SAME" conv as 3 matmuls (one per ky) with the 3 kx taps folded into the
        # contraction: (H*W, 3*Cp) x (3*Cp, Cp), bf16 operands, f32 accumulation.
        # Only 3 sublane-offset slices per conv (one per kx); ky windows are free major-axis
        # slices of the already-loaded value.
        cols = [pad_ref[:, pl.ds(kx, W), :] for kx in range(3)]     # 3 x (H+2, W, C) bf16
        big = jnp.concatenate(cols, axis=-1)                        # (H+2, W, 3*C) bf16
        acc = None
        for ky in range(3):
            patch = big[ky:ky + H].reshape(H * W, K)                # (H*W, 3*C) bf16
            part = jnp.dot(patch, w_ref[ky],
                           preferred_element_type=jnp.float32)      # (H*W, C) f32
            acc = part if acc is None else acc + part
        return acc

    # conv1 (BN1 scale pre-folded into weights) -> + bias1 -> ReLU
    h = jnp.maximum(conv3x3(w1_ref) + bias1, 0.0)                   # (H*W, C) f32

    # Re-stage h in the same scratch: only the interior is overwritten, the zero halo stays.
    pad_ref[pl.ds(1, H), pl.ds(1, W), :] = h.reshape(H, W, C).astype(pad_ref.dtype)

    # conv2 -> + bias2 -> +residual -> ReLU
    y = conv3x3(w2_ref) + bias2                                     # (H*W, C) f32
    out = jnp.maximum(x.reshape(H * W, C) + y, 0.0)
    o_ref[...] = out.reshape(H, W, C).astype(o_ref.dtype)


@jax.jit
def residual_block(x_nchw, w1, w2, params):
    """x_nchw: (N, C, H, W) f32; w1/w2: (3,3,C,C) HWIO f32; params: (4, C) f32 folded BN
    [scale1, bias1, scale2, bias2]."""
    x = jnp.transpose(x_nchw, (0, 2, 3, 1))                   # NCHW -> NHWC
    N, H, W, C = x.shape

    Cp = ((C + 127) // 128) * 128                             # lane-dense channel padding
    dC = Cp - C

    scale1, bias1, scale2, bias2 = params[0], params[1], params[2], params[3]

    # Fold BN scales into the conv output channels (HWIO: last dim = Cout) before the bf16 cast.
    w1f = w1 * scale1[None, None, None, :]
    w2f = w2 * scale2[None, None, None, :]

    xp = jnp.pad(x, ((0, 0), (0, 0), (0, 0), (0, dC)))
    w1p = jnp.pad(w1f, ((0, 0), (0, 0), (0, dC), (0, dC))).astype(jnp.bfloat16)
    w2p = jnp.pad(w2f, ((0, 0), (0, 0), (0, dC), (0, dC))).astype(jnp.bfloat16)
    # Stack the three kx taps on the contraction dim: (3, 3, Cp, Cp) -> (3, 3*Cp, Cp).
    w1p = w1p.reshape(3, 3 * Cp, Cp)
    w2p = w2p.reshape(3, 3 * Cp, Cp)
    bp = jnp.pad(jnp.stack([bias1, bias2], axis=0), ((0, 0), (0, dC)))   # (2, Cp)

    # VMEM budget from the actual (double-buffered) block sizes + headroom for in-kernel
    # temporaries (concatenated patches, f32 accumulators).
    buf_bytes = (
        2 * H * W * Cp * 4                 # x blocks
        + 2 * H * W * Cp * 4               # out blocks
        + 2 * 2 * 3 * 3 * Cp * Cp * 2      # w1 + w2 blocks (bf16)
        + 2 * 2 * Cp * 4                   # bias block
        + (H + 2) * (W + 2) * Cp * 2       # padded scratch
    )
    vmem_limit = int(min(100 * 1024 * 1024, buf_bytes + 16 * 1024 * 1024))

    out = pl.pallas_call(
        residual_block_kernel,
        out_shape=jax.ShapeDtypeStruct((N, H, W, Cp), x.dtype),
        grid_spec=pltpu.PrefetchScalarGridSpec(
            num_scalar_prefetch=0,
            grid=(N,),
            in_specs=[
                pl.BlockSpec((pl.Squeezed(), H, W, Cp), lambda b: (b, 0, 0, 0)),
                pl.BlockSpec((3, 3 * Cp, Cp), lambda b: (0, 0, 0)),
                pl.BlockSpec((3, 3 * Cp, Cp), lambda b: (0, 0, 0)),
                pl.BlockSpec((2, Cp), lambda b: (0, 0)),
            ],
            out_specs=pl.BlockSpec((pl.Squeezed(), H, W, Cp), lambda b: (b, 0, 0, 0)),
            scratch_shapes=[pltpu.VMEM((H + 2, W + 2, Cp), jnp.bfloat16)],
        ),
        compiler_params=pltpu.CompilerParams(
            dimension_semantics=("parallel",),
            vmem_limit_bytes=vmem_limit,
        ),
    )(xp, w1p, w2p, bp)

    out = out[..., :C]                                        # strip channel padding
    return jnp.transpose(out, (0, 3, 1, 2))                   # NHWC -> NCHW


def reference_nhwc(x, w1f, w2f, bias1, bias2, mxu_dtype):
    """Plain-JAX reference in NHWC with BN scales already folded into the weights.
    mxu_dtype controls the conv-operand dtype so we can verify (a) tightly against a
    bf16-operand reference and (b) loosely against full f32."""
    dn = lax.conv_dimension_numbers(x.shape, w1f.shape, ("NHWC", "HWIO", "NHWC"))

    def conv(a, w):
        return lax.conv_general_dilated(
            a.astype(mxu_dtype), w.astype(mxu_dtype), (1, 1), "SAME",
            dimension_numbers=dn, preferred_element_type=jnp.float32,
            precision=lax.Precision.HIGHEST)

    h = jnp.maximum(conv(x, w1f) + bias1, 0.0)
    y = conv(h, w2f) + bias2
    return jnp.maximum(x + y, 0.0)


if __name__ == "__main__":
    N, C, H, W = 2, 4, 16, 16
    key = jax.random.PRNGKey(0)
    kx, kw1, kw2, kg1, kb1, km1, kv1, kg2, kb2, km2, kv2 = jax.random.split(key, 11)

    x = jax.random.normal(kx, (N, C, H, W), jnp.float32)

    # Conv weights in HWIO layout (kh, kw, Cin, Cout); deterministic init.
    w1 = jax.random.normal(kw1, (3, 3, C, C), jnp.float32) * 0.1
    w2 = jax.random.normal(kw2, (3, 3, C, C), jnp.float32) * 0.1
    conv_bias1 = jnp.zeros((C,), jnp.float32)
    conv_bias2 = jnp.zeros((C,), jnp.float32)

    # BatchNorm2d parameters / running stats (eval-mode fold).
    eps = 1e-5
    gamma1 = 0.5 + jax.random.uniform(kg1, (C,), jnp.float32)
    beta1 = jax.random.normal(kb1, (C,), jnp.float32) * 0.1
    rmean1 = jax.random.normal(km1, (C,), jnp.float32) * 0.1
    rvar1 = 0.5 + jax.random.uniform(kv1, (C,), jnp.float32)
    gamma2 = 0.5 + jax.random.uniform(kg2, (C,), jnp.float32)
    beta2 = jax.random.normal(kb2, (C,), jnp.float32) * 0.1
    rmean2 = jax.random.normal(km2, (C,), jnp.float32) * 0.1
    rvar2 = 0.5 + jax.random.uniform(kv2, (C,), jnp.float32)

    scale1 = gamma1 / jnp.sqrt(rvar1 + eps)
    bias1 = beta1 + (conv_bias1 - rmean1) * scale1
    scale2 = gamma2 / jnp.sqrt(rvar2 + eps)
    bias2 = beta2 + (conv_bias2 - rmean2) * scale2
    params = jnp.stack([scale1, bias1, scale2, bias2], axis=0)   # (4, C)

    out = jax.block_until_ready(residual_block(x, w1, w2, params))

    # Fold the reference identically (scale into weights before any bf16 cast).
    w1f = w1 * scale1[None, None, None, :]
    w2f = w2 * scale2[None, None, None, :]
    x_nhwc = jnp.transpose(x, (0, 2, 3, 1))

    # (a) apples-to-apples: reference with the same bf16 MXU operands / f32 accumulation.
    ref_bf16 = jnp.transpose(
        reference_nhwc(x_nhwc, w1f, w2f, bias1, bias2, jnp.bfloat16), (0, 3, 1, 2))
    np.testing.assert_allclose(np.asarray(out), np.asarray(ref_bf16), atol=2e-3, rtol=2e-3)

    # (b) fidelity to the f32 PyTorch module: looser tolerance covers bf16 operand rounding.
    ref_f32 = jnp.transpose(
        reference_nhwc(x_nhwc, w1f, w2f, bias1, bias2, jnp.float32), (0, 3, 1, 2))
    np.testing.assert_allclose(np.asarray(out), np.asarray(ref_f32), atol=5e-2, rtol=5e-2)

    print("KERNEL_OK")
</pallas_src>

<mosaic_0001>
module attributes {stable_mosaic.version = 11 : i64} {
  func.func @residual_block_kernel(%arg0: i32, %arg1: memref<1x16x16x128xf32, #tpu.memory_space<vmem>>, %arg2: memref<3x384x128xbf16, #tpu.memory_space<vmem>>, %arg3: memref<3x384x128xbf16, #tpu.memory_space<vmem>>, %arg4: memref<2x128xf32, #tpu.memory_space<vmem>>, %arg5: memref<1x16x16x128xf32, #tpu.memory_space<vmem>>, %arg6: memref<18x18x128xbf16, #tpu.memory_space<vmem>>) attributes {dimension_semantics = [#tpu.dimension_semantics<parallel>], iteration_bounds = array<i64: 2>, scalar_prefetch = 0 : i64, scratch_operands = 1 : i64, tpu.core_type = #tpu.core_type<tc>, window_params = [{transform_indices = @transform_0, window_bounds = array<i64: 1, 16, 16, 128>}, {pipeline_mode = #tpu.pipeline_mode<synchronous>, transform_indices = @transform_1, window_bounds = array<i64: 3, 384, 128>}, {pipeline_mode = #tpu.pipeline_mode<synchronous>, transform_indices = @transform_2, window_bounds = array<i64: 3, 384, 128>}, {pipeline_mode = #tpu.pipeline_mode<synchronous>, transform_indices = @transform_3, window_bounds = array<i64: 2, 128>}, {transform_indices = @transform_4, window_bounds = array<i64: 1, 16, 16, 128>}]} {
    %c0 = arith.constant 0 : index
    %c0_0 = arith.constant 0 : index
    %0 = vector.load %arg4[%c0, %c0_0] : memref<2x128xf32, #tpu.memory_space<vmem>>, vector<2x128xf32>
    %1 = vector.extract_strided_slice %0 {offsets = [0, 0], sizes = [1, 128], strides = [1, 1]} : vector<2x128xf32> to vector<1x128xf32>
    %2 = vector.extract_strided_slice %0 {offsets = [1, 0], sizes = [1, 128], strides = [1, 1]} : vector<2x128xf32> to vector<1x128xf32>
    %c0_1 = arith.constant 0 : index
    %c0_2 = arith.constant 0 : index
    %c0_3 = arith.constant 0 : index
    %c0_4 = arith.constant 0 : index
    %3 = vector.load %arg1[%c0_1, %c0_2, %c0_3, %c0_4] : memref<1x16x16x128xf32, #tpu.memory_space<vmem>>, vector<1x16x16x128xf32>
    %4 = vector.shape_cast %3 : vector<1x16x16x128xf32> to vector<16x16x128xf32>
    %cst = arith.constant 0.000000e+00 : bf16
    %5 = vector.broadcast %cst : bf16 to vector<1x18x128xbf16>
    %cst_5 = arith.constant 0.000000e+00 : bf16
    %6 = vector.broadcast %cst_5 : bf16 to vector<16x1x128xbf16>
    %c0_6 = arith.constant 0 : index
    %c0_7 = arith.constant 0 : index
    %c0_8 = arith.constant 0 : index
    %7 = vector.load %arg6[%c0_6, %c0_7, %c0_8] : memref<18x18x128xbf16, #tpu.memory_space<vmem>>, vector<1x18x128xbf16>
    tpu.vector_store %arg6[%c0_6, %c0_7, %c0_8], %5 {strides = array<i32>} : memref<18x18x128xbf16, #tpu.memory_space<vmem>>, vector<1x18x128xbf16>,
    %c17 = arith.constant 17 : index
    %c0_9 = arith.constant 0 : index
    %c0_10 = arith.constant 0 : index
    %8 = vector.load %arg6[%c17, %c0_9, %c0_10] : memref<18x18x128xbf16, #tpu.memory_space<vmem>>, vector<1x18x128xbf16>
    tpu.vector_store %arg6[%c17, %c0_9, %c0_10], %5 {strides = array<i32>} : memref<18x18x128xbf16, #tpu.memory_space<vmem>>, vector<1x18x128xbf16>,
    %c1 = arith.constant 1 : index
    %c0_11 = arith.constant 0 : index
    %c0_12 = arith.constant 0 : index
    %9 = vector.load %arg6[%c1, %c0_11, %c0_12] : memref<18x18x128xbf16, #tpu.memory_space<vmem>>, vector<16x1x128xbf16>
    tpu.vector_store %arg6[%c1, %c0_11, %c0_12], %6 {strides = array<i32>} : memref<18x18x128xbf16, #tpu.memory_space<vmem>>, vector<16x1x128xbf16>,
    %c1_13 = arith.constant 1 : index
    %c17_14 = arith.constant 17 : index
    %c0_15 = arith.constant 0 : index
    %10 = vector.load %arg6[%c1_13, %c17_14, %c0_15] : memref<18x18x128xbf16, #tpu.memory_space<vmem>>, vector<16x1x128xbf16>
    tpu.vector_store %arg6[%c1_13, %c17_14, %c0_15], %6 {strides = array<i32>} : memref<18x18x128xbf16, #tpu.memory_space<vmem>>, vector<16x1x128xbf16>,
    %11 = arith.truncf %4 : vector<16x16x128xf32> to vector<16x16x128xbf16>
    %c1_16 = arith.constant 1 : index
    %c1_17 = arith.constant 1 : index
    %c0_18 = arith.constant 0 : index
    %12 = vector.load %arg6[%c1_16, %c1_17, %c0_18] : memref<18x18x128xbf16, #tpu.memory_space<vmem>>, vector<16x16x128xbf16>
    tpu.vector_store %arg6[%c1_16, %c1_17, %c0_18], %11 {strides = array<i32>} : memref<18x18x128xbf16, #tpu.memory_space<vmem>>, vector<16x16x128xbf16>,
    %c0_19 = arith.constant 0 : index
    %c0_20 = arith.constant 0 : index
    %c0_21 = arith.constant 0 : index
    %13 = vector.load %arg6[%c0_19, %c0_20, %c0_21] : memref<18x18x128xbf16, #tpu.memory_space<vmem>>, vector<18x16x128xbf16>
    %c0_22 = arith.constant 0 : index
    %c1_23 = arith.constant 1 : index
    %c0_24 = arith.constant 0 : index
    %14 = vector.load %arg6[%c0_22, %c1_23, %c0_24] : memref<18x18x128xbf16, #tpu.memory_space<vmem>>, vector<18x16x128xbf16>
    %c0_25 = arith.constant 0 : index
    %c2 = arith.constant 2 : index
    %c0_26 = arith.constant 0 : index
    %15 = vector.load %arg6[%c0_25, %c2, %c0_26] : memref<18x18x128xbf16, #tpu.memory_space<vmem>>, vector<18x16x128xbf16>
    %16 = tpu.concatenate %13, %14, %15 in 2 : vector<18x16x128xbf16>, vector<18x16x128xbf16>, vector<18x16x128xbf16> -> vector<18x16x384xbf16>
    %17 = vector.extract_strided_slice %16 {offsets = [0, 0, 0], sizes = [16, 16, 384], strides = [1, 1, 1]} : vector<18x16x384xbf16> to vector<16x16x384xbf16>
    %18 = vector.shape_cast %17 : vector<16x16x384xbf16> to vector<256x384xbf16>
    %c0_27 = arith.constant 0 : index
    %c0_28 = arith.constant 0 : index
    %c0_29 = arith.constant 0 : index
    %19 = vector.load %arg2[%c0_27, %c0_28, %c0_29] : memref<3x384x128xbf16, #tpu.memory_space<vmem>>, vector<1x384x128xbf16>
    %20 = vector.shape_cast %19 : vector<1x384x128xbf16> to vector<384x128xbf16>
    %cst_30 = arith.constant dense<0.000000e+00> : vector<256x128xf32>
    %21 = tpu.matmul %18, %20, %cst_30 {dimension_numbers = #tpu.dot_dimension_numbers<[1], [0], [0], [1], [0, 0, 1, 1], [], []>} : vector<256x384xbf16>, vector<384x128xbf16>, vector<256x128xf32> -> vector<256x128xf32>
    %22 = vector.extract_strided_slice %16 {offsets = [1, 0, 0], sizes = [16, 16, 384], strides = [1, 1, 1]} : vector<18x16x384xbf16> to vector<16x16x384xbf16>
    %23 = vector.shape_cast %22 : vector<16x16x384xbf16> to vector<256x384xbf16>
    %c1_31 = arith.constant 1 : index
    %c0_32 = arith.constant 0 : index
    %c0_33 = arith.constant 0 : index
    %24 = vector.load %arg2[%c1_31, %c0_32, %c0_33] : memref<3x384x128xbf16, #tpu.memory_space<vmem>>, vector<1x384x128xbf16>
    %25 = vector.shape_cast %24 : vector<1x384x128xbf16> to vector<384x128xbf16>
    %cst_34 = arith.constant dense<0.000000e+00> : vector<256x128xf32>
    %26 = tpu.matmul %23, %25, %cst_34 {dimension_numbers = #tpu.dot_dimension_numbers<[1], [0], [0], [1], [0, 0, 1, 1], [], []>} : vector<256x384xbf16>, vector<384x128xbf16>, vector<256x128xf32> -> vector<256x128xf32>
    %27 = arith.addf %21, %26 : vector<256x128xf32>
    %28 = vector.extract_strided_slice %16 {offsets = [2, 0, 0], sizes = [16, 16, 384], strides = [1, 1, 1]} : vector<18x16x384xbf16> to vector<16x16x384xbf16>
    %29 = vector.shape_cast %28 : vector<16x16x384xbf16> to vector<256x384xbf16>
    %c2_35 = arith.constant 2 : index
    %c0_36 = arith.constant 0 : index
    %c0_37 = arith.constant 0 : index
    %30 = vector.load %arg2[%c2_35, %c0_36, %c0_37] : memref<3x384x128xbf16, #tpu.memory_space<vmem>>, vector<1x384x128xbf16>
    %31 = vector.shape_cast %30 : vector<1x384x128xbf16> to vector<384x128xbf16>
    %cst_38 = arith.constant dense<0.000000e+00> : vector<256x128xf32>
    %32 = tpu.matmul %29, %31, %cst_38 {dimension_numbers = #tpu.dot_dimension_numbers<[1], [0], [0], [1], [0, 0, 1, 1], [], []>} : vector<256x384xbf16>, vector<384x128xbf16>, vector<256x128xf32> -> vector<256x128xf32>
    %33 = arith.addf %27, %32 : vector<256x128xf32>
    %34 = vector.broadcast %1 : vector<1x128xf32> to vector<256x128xf32>
    %35 = arith.addf %33, %34 : vector<256x128xf32>
    %cst_39 = arith.constant 0.000000e+00 : f32
    %36 = vector.broadcast %cst_39 : f32 to vector<256x128xf32>
    %37 = arith.maximumf %35, %36 : vector<256x128xf32>
    %38 = vector.shape_cast %37 : vector<256x128xf32> to vector<16x16x128xf32>
    %39 = arith.truncf %38 : vector<16x16x128xf32> to vector<16x16x128xbf16>
    %c1_40 = arith.constant 1 : index
    %c1_41 = arith.constant 1 : index
    %c0_42 = arith.constant 0 : index
    %40 = vector.load %arg6[%c1_40, %c1_41, %c0_42] : memref<18x18x128xbf16, #tpu.memory_space<vmem>>, vector<16x16x128xbf16>
    tpu.vector_store %arg6[%c1_40, %c1_41, %c0_42], %39 {strides = array<i32>} : memref<18x18x128xbf16, #tpu.memory_space<vmem>>, vector<16x16x128xbf16>,
    %c0_43 = arith.constant 0 : index
    %c0_44 = arith.constant 0 : index
    %c0_45 = arith.constant 0 : index
    %41 = vector.load %arg6[%c0_43, %c0_44, %c0_45] : memref<18x18x128xbf16, #tpu.memory_space<vmem>>, vector<18x16x128xbf16>
    %c0_46 = arith.constant 0 : index
    %c1_47 = arith.constant 1 : index
    %c0_48 = arith.constant 0 : index
    %42 = vector.load %arg6[%c0_46, %c1_47, %c0_48] : memref<18x18x128xbf16, #tpu.memory_space<vmem>>, vector<18x16x128xbf16>
    %c0_49 = arith.constant 0 : index
    %c2_50 = arith.constant 2 : index
    %c0_51 = arith.constant 0 : index
    %43 = vector.load %arg6[%c0_49, %c2_50, %c0_51] : memref<18x18x128xbf16, #tpu.memory_space<vmem>>, vector<18x16x128xbf16>
    %44 = tpu.concatenate %41, %42, %43 in 2 : vector<18x16x128xbf16>, vector<18x16x128xbf16>, vector<18x16x128xbf16> -> vector<18x16x384xbf16>
    %45 = vector.extract_strided_slice %44 {offsets = [0, 0, 0], sizes = [16, 16, 384], strides = [1, 1, 1]} : vector<18x16x384xbf16> to vector<16x16x384xbf16>
    %46 = vector.shape_cast %45 : vector<16x16x384xbf16> to vector<256x384xbf16>
    %c0_52 = arith.constant 0 : index
    %c0_53 = arith.constant 0 : index
    %c0_54 = arith.constant 0 : index
    %47 = vector.load %arg3[%c0_52, %c0_53, %c0_54] : memref<3x384x128xbf16, #tpu.memory_space<vmem>>, vector<1x384x128xbf16>
    %48 = vector.shape_cast %47 : vector<1x384x128xbf16> to vector<384x128xbf16>
    %cst_55 = arith.constant dense<0.000000e+00> : vector<256x128xf32>
    %49 = tpu.matmul %46, %48, %cst_55 {dimension_numbers = #tpu.dot_dimension_numbers<[1], [0], [0], [1], [0, 0, 1, 1], [], []>} : vector<256x384xbf16>, vector<384x128xbf16>, vector<256x128xf32> -> vector<256x128xf32>
    %50 = vector.extract_strided_slice %44 {offsets = [1, 0, 0], sizes = [16, 16, 384], strides = [1, 1, 1]} : vector<18x16x384xbf16> to vector<16x16x384xbf16>
    %51 = vector.shape_cast %50 : vector<16x16x384xbf16> to vector<256x384xbf16>
    %c1_56 = arith.constant 1 : index
    %c0_57 = arith.constant 0 : index
    %c0_58 = arith.constant 0 : index
    %52 = vector.load %arg3[%c1_56, %c0_57, %c0_58] : memref<3x384x128xbf16, #tpu.memory_space<vmem>>, vector<1x384x128xbf16>
    %53 = vector.shape_cast %52 : vector<1x384x128xbf16> to vector<384x128xbf16>
    %cst_59 = arith.constant dense<0.000000e+00> : vector<256x128xf32>
    %54 = tpu.matmul %51, %53, %cst_59 {dimension_numbers = #tpu.dot_dimension_numbers<[1], [0], [0], [1], [0, 0, 1, 1], [], []>} : vector<256x384xbf16>, vector<384x128xbf16>, vector<256x128xf32> -> vector<256x128xf32>
    %55 = arith.addf %49, %54 : vector<256x128xf32>
    %56 = vector.extract_strided_slice %44 {offsets = [2, 0, 0], sizes = [16, 16, 384], strides = [1, 1, 1]} : vector<18x16x384xbf16> to vector<16x16x384xbf16>
    %57 = vector.shape_cast %56 : vector<16x16x384xbf16> to vector<256x384xbf16>
    %c2_60 = arith.constant 2 : index
    %c0_61 = arith.constant 0 : index
    %c0_62 = arith.constant 0 : index
    %58 = vector.load %arg3[%c2_60, %c0_61, %c0_62] : memref<3x384x128xbf16, #tpu.memory_space<vmem>>, vector<1x384x128xbf16>
    %59 = vector.shape_cast %58 : vector<1x384x128xbf16> to vector<384x128xbf16>
    %cst_63 = arith.constant dense<0.000000e+00> : vector<256x128xf32>
    %60 = tpu.matmul %57, %59, %cst_63 {dimension_numbers = #tpu.dot_dimension_numbers<[1], [0], [0], [1], [0, 0, 1, 1], [], []>} : vector<256x384xbf16>, vector<384x128xbf16>, vector<256x128xf32> -> vector<256x128xf32>
    %61 = arith.addf %55, %60 : vector<256x128xf32>
    %62 = vector.broadcast %2 : vector<1x128xf32> to vector<256x128xf32>
    %63 = arith.addf %61, %62 : vector<256x128xf32>
    %64 = vector.shape_cast %4 : vector<16x16x128xf32> to vector<256x128xf32>
    %65 = arith.addf %64, %63 : vector<256x128xf32>
    %cst_64 = arith.constant 0.000000e+00 : f32
    %66 = vector.broadcast %cst_64 : f32 to vector<256x128xf32>
    %67 = arith.maximumf %65, %66 : vector<256x128xf32>
    %68 = vector.shape_cast %67 : vector<256x128xf32> to vector<16x16x128xf32>
    %c0_65 = arith.constant 0 : index
    %c0_66 = arith.constant 0 : index
    %c0_67 = arith.constant 0 : index
    %c0_68 = arith.constant 0 : index
    %69 = vector.load %arg5[%c0_65, %c0_66, %c0_67, %c0_68] : memref<1x16x16x128xf32, #tpu.memory_space<vmem>>, vector<1x16x16x128xf32>
    %70 = vector.shape_cast %69 : vector<1x16x16x128xf32> to vector<16x16x128xf32>
    %71 = vector.shape_cast %68 : vector<16x16x128xf32> to vector<1x16x16x128xf32>
    tpu.vector_store %arg5[%c0_65, %c0_66, %c0_67, %c0_68], %71 {strides = array<i32>} : memref<1x16x16x128xf32, #tpu.memory_space<vmem>>, vector<1x16x16x128xf32>,
    return
  }
  func.func @transform_0(%arg0: i32) -> (i32, i32, i32, i32) {
    %c0_i32 = arith.constant 0 : i32
    %c0_i32_0 = arith.constant 0 : i32
    %c0_i32_1 = arith.constant 0 : i32
    %c0_i32_2 = arith.constant 0 : i32
    return %arg0, %c0_i32, %c0_i32_0, %c0_i32_1 : i32, i32, i32, i32
  }
  func.func @transform_1(%arg0: i32) -> (i32, i32, i32) {
    %c0_i32 = arith.constant 0 : i32
    %c0_i32_0 = arith.constant 0 : i32
    %c0_i32_1 = arith.constant 0 : i32
    %c0_i32_2 = arith.constant 0 : i32
    return %c0_i32, %c0_i32_0, %c0_i32_1 : i32, i32, i32
  }
  func.func @transform_2(%arg0: i32) -> (i32, i32, i32) {
    %c0_i32 = arith.constant 0 : i32
    %c0_i32_0 = arith.constant 0 : i32
    %c0_i32_1 = arith.constant 0 : i32
    %c0_i32_2 = arith.constant 0 : i32
    return %c0_i32, %c0_i32_0, %c0_i32_1 : i32, i32, i32
  }
  func.func @transform_3(%arg0: i32) -> (i32, i32) {
    %c0_i32 = arith.constant 0 : i32
    %c0_i32_0 = arith.constant 0 : i32
    %c0_i32_1 = arith.constant 0 : i32
    return %c0_i32, %c0_i32_0 : i32, i32
  }
  func.func @transform_4(%arg0: i32) -> (i32, i32, i32, i32) {
    %c0_i32 = arith.constant 0 : i32
    %c0_i32_0 = arith.constant 0 : i32
    %c0_i32_1 = arith.constant 0 : i32
    %c0_i32_2 = arith.constant 0 : i32
    return %arg0, %c0_i32, %c0_i32_0, %c0_i32_1 : i32, i32, i32, i32
  }
}

</mosaic_0001>

<bundles_post_ra>
// kernel: residual_block.1
= control target key start
LH: loop header
LB: loop body
LE: loop exit
PB: predicated region body
PF: predicated region fallthrough
CT: control target
= control target key end

     0   :  { %s8015_s15 = smov 0   ;;  %s10599_s0 = inlined_call_operand.vmem [shape: f32[2,16,16,128], index: 0, kind: input, shape index: {}]   ;;  %s10600_s1 = inlined_call_operand.vmem [shape: bf16[3,384,128], index: 1, kind: input, shape index: {}]   ;;  %s10601_s2 = inlined_call_operand.vmem [shape: bf16[3,384,128], index: 2, kind: input, shape index: {}]   ;;  %s10602_s3 = inlined_call_operand.vmem [shape: f32[2,128], index: 3, kind: input, shape index: {}]   ;;  %s10603_s4 = inlined_call_operand.vmem [shape: f32[2,16,16,128], index: 4, kind: output, shape index: {}]  }
   0x1 LB: > { %s5998_s16 = sadd.s32 4294967295, %s7987_s15   ;;  %p6002_p0 = scmp.ge.s32.totalorder %s7987_s15, 1  ;;  %s7987_s15 = sphi %s8015_s15, %s14_s15  }
   0x2   : > { %p162_p1 = scmp.lt.s32.totalorder %s7987_s15, 3 }
   0x4   : > { %p163_p2 = pnand %p6002_p0, %p162_p1 }
   0x6   : > { %166 = sbr.rel (%p163_p2) target bundleno = 1063 (0x427), region = 36 }
   0xb   : > { %v7696_v0 = vld [vmem:[%s10600_s1 + $0x138] sm:$0xff]   ;;  %v7699_v3 = vld [vmem:[%s10600_s1 + $0x130] sm:$0xff]   ;;  %v7702_v6 = vld [vmem:[%s10600_s1 + $0x128] sm:$0xff]   ;;  %p188_p3 = scmp.lt.s32.totalorder %s5998_s16, 1  ;;  %v7989_v15 = vmov 0   ;;  %vm240_vm0 = vcmask 1040384  }
   0xc   : > { %v7697_v1 = vld [vmem:[%s10600_s1 + $0x178] sm:$0xff]   ;;  %6583 = vmatprep.subr.bf16.mxu0 %v7696_v0  ;;  %v7700_v4 = vld [vmem:[%s10600_s1 + $0x170] sm:$0xff]   ;;  %v7703_v7 = vld [vmem:[%s10600_s1 + $0x168] sm:$0xff]   ;;  %232 = vst [vmem:[#allocation2] sm:$0xf] %v7989_v15  ;;  %v10634_v27 = vmov 0 }
   0xd   : > { %v7698_v2 = vld [vmem:[%s10600_s1 + $0xf8] sm:$0xff]   ;;  %7399 = vmatprep.subr.bf16.mxu1 %v7697_v1  ;;  %v7701_v5 = vld [vmem:[%s10600_s1 + $0xf0] sm:$0xff]   ;;  %v7704_v8 = vld [vmem:[%s10600_s1 + $0xe8] sm:$0xff]   ;;  %s10703_s16 = smov (!%p188_p3, %s5998_s16), 1  ;;  %233 = vst [vmem:[#allocation2 + $0x4] sm:$0xf] %v7989_v15 }
   0xe   : > { %6584 = vmatpush3.bf16.msra.mxu0 %v7698_v2  ;;  %7400 = vmatpush3.bf16.msra.mxu1 %v7697_v1  ;;  %v7705_v9 = vld [vmem:[%s10600_s1 + $0x120] sm:$0xff]   ;;  %v7708_v12 = vld [vmem:[%s10600_s1 + $0x118] sm:$0xff]   ;;  %234 = vst [vmem:[#allocation2 + $0x8] sm:$0x1] %v7989_v15  ;;  %236 = vst [vmem:[#allocation2 + $0xcc] sm:$0xf] %v7989_v15 }
   0xf   : > { %6585 = vmatprep.subr.bf16.mxu0 %v7699_v3  ;;  %7401 = vmatprep.subr.bf16.mxu1 %v7700_v4  ;;  %v7706_v10 = vld [vmem:[%s10600_s1 + $0x160] sm:$0xff]   ;;  %v7709_v13 = vld [vmem:[%s10600_s1 + $0x158] sm:$0xff]   ;;  %237 = vst [vmem:[#allocation2 + $0xd0] sm:$0xf] %v7989_v15  ;;  %238 = vst [vmem:[#allocation2 + $0xd4] sm:$0x1] %v7989_v15 }
  0x10   : > { %v7707_v11 = vld [vmem:[%s10600_s1 + $0xe0] sm:$0xff]   ;;  %v7710_v14 = vld [vmem:[%s10600_s1 + $0xd8] sm:$0xff]   ;;  %v7711_v16 = vld [vmem:[%s10600_s1 + $0x110] sm:$0xff]   ;;  %s6517_s27 = sshll.u32 %s10703_s16, 8  ;;  %vm241_vm1 = vsmask.f32 256 }
  0x11   : > { %v7712_v17 = vld [vmem:[%s10600_s1 + $0x150] sm:$0xff]   ;;  %v7714_v19 = vld [vmem:[%s10600_s1 + $0x108] sm:$0xff]   ;;  %s8095_s10 = scalar_lea.vmem %s10599_s0, %s6517_s27  ;;  %v7717_v22 = vld [vmem:[%s10600_s1 + $0x100] sm:$0xff]   ;;  %vm291_vm3 = vsmask.f32 7938  ;;  %vm759_vm6 = vcmask 1043456   ;;  %s10428_s25 = scalar_lea.vmem %s10603_s4, %s6517_s27 }
  0x12   : > { %6586 = vmatpush3.bf16.msra.mxu0 %v7701_v5  ;;  %7402 = vmatpush3.bf16.msra.mxu1 %v7700_v4  ;;  %v7713_v18 = vld [vmem:[%s10600_s1 + $0xd0] sm:$0xff]   ;;  %v7715_v20 = vld [vmem:[%s10600_s1 + $0x148] sm:$0xff]   ;;  %v200_v23 = vld [vmem:[%s8095_s10] sm:$0xff]  ;;  %vm437_vm5 = vsmask.f32 4368  ;;  %v10639_v50 = vmov 0 }
  0x13   : > { %6587 = vmatprep.subr.bf16.mxu0 %v7702_v6  ;;  %7403 = vmatprep.subr.bf16.mxu1 %v7703_v7  ;;  %v7716_v21 = vld [vmem:[%s10600_s1 + $0xc8] sm:$0xff]   ;;  %v7718_v26 = vld [vmem:[%s10600_s1 + $0x140] sm:$0xff]   ;;  %vm8110_vm2 = vmand %vm240_vm0, %vm241_vm1  ;;  %v6519_v29 = vpack.c.bf16 %v200_v23, %v200_v23  ;;  %v10642_v60 = vmov 0  ;;  %vm1396_vm9 = vcmask 1046528   ;;  %vm1107_vm10 = vsmask.f32 7424 }
  0x14   : > { %v201_v24 = vld [vmem:[%s8095_s10 + $0x8] sm:$0xff]  ;;  %v10635_v27 = vsel %vm8110_vm2, 4294967295, %v10634_v27  ;;  %v293_v28 = vld [vmem:[#allocation2 + $0x14] sm:$0x1]  ;;  %v7719_v31 = vld [vmem:[%s10600_s1 + $0xc0] sm:$0xff]  }
  0x15   : > { %v243_v25 = vld [vmem:[#allocation2 + $0xc] sm:$0x1]  ;;  %10636 = vst [vmem:[#allocation3_spill] sm:$0xff] %v10635_v27  ;;  %v6520_v30 = vpack.c.bf16 %v201_v24, %v201_v24  ;;  %vm8121_vm4 = vmand %vm240_vm0, %vm291_vm3  ;;  %v202_v34 = vld [vmem:[%s8095_s10 + $0x10] sm:$0xff]  ;;  %v440_v37 = vshrl.u32 %v6519_v29, 16  ;;  %v443_v38 = vshll.u32 %v6519_v29, 16 }
  0x16   : > { %6588 = vmatpush3.bf16.msra.mxu0 %v7704_v8  ;;  %7404 = vmatpush3.bf16.msra.mxu1 %v7703_v7  ;;  %v244_v32 = vsel %vm8110_vm2, 0, %v243_v25  ;;  %v203_v35 = vld [vmem:[%s8095_s10 + $0x18] sm:$0xff]  ;;  %v294_v36 = vsel %vm8121_vm4, 0, %v293_v28  ;;  %v296_v43 = vld [vmem:[#allocation2 + $0x20] sm:$0x1]  ;;  %v6521_v44 = vpack.c.bf16 %v202_v34, %v202_v34  ;;  %vm8140_vm7 = vmor %vm241_vm1, %vm437_vm5 }
  0x17   : > { %6589 = vmatprep.subr.bf16.mxu0 %v7705_v9  ;;  %7405 = vmatprep.subr.bf16.mxu1 %v7706_v10  ;;  %245 = vst [vmem:[#allocation2 + $0xc] sm:$0x1] %v244_v32  ;;  %v448_v39 = vshrl.u32 %v6520_v30, 16  ;;  %v246_v40 = vld [vmem:[#allocation2 + $0x18] sm:$0x1]  ;;  %v451_v41 = vshll.u32 %v6520_v30, 16  ;;  %v6522_v45 = vpack.c.bf16 %v203_v35, %v203_v35  ;;  %vm8149_vm8 = vmand %vm759_vm6, %vm291_vm3 }
  0x18   : > { %295 = vst [vmem:[#allocation2 + $0x14] sm:$0x1] %v294_v36  ;;  %v247_v42 = vsel %vm8110_vm2, 0, %v246_v40  ;;  %v442_v46 = vrot.slane %v440_v37, 7  ;;  %v297_v48 = vsel %vm8121_vm4, 0, %v296_v43  ;;  %v8136_v49 = vld [vmem:[%s10600_s1 + $0xb8] sm:$0xff]  }
  0x19   : > { %v450_v47 = vrot.slane %v448_v39, 7  ;;  %248 = vst [vmem:[#allocation2 + $0x18] sm:$0x1] %v247_v42  ;;  %v10640_v50 = vsel %vm8140_vm7, 4294967295, %v10639_v50  ;;  %298 = vst [vmem:[#allocation2 + $0x20] sm:$0x1] %v297_v48 }
  0x1a   : > { %6590 = vmatpush3.bf16.msra.mxu0 %v7707_v11  ;;  %7406 = vmatpush3.bf16.msra.mxu1 %v7706_v10  ;;  %10641 = vst [vmem:[#allocation4_spill] sm:$0xff] %v10640_v50  ;;  %v457_v51 = vshrl.u32 %v6521_v44, 16  ;;  %v460_v52 = vshll.u32 %v6521_v44, 16  ;;  %v465_v53 = vshrl.u32 %v6522_v45, 16  ;;  %v468_v54 = vshll.u32 %v6522_v45, 16  ;;  %v7727_v59 = vld [vmem:[%s10600_s1 + $0x78] sm:$0xff]  }
  0x1b   : > { %6591 = vmatprep.subr.bf16.mxu0 %v7708_v12  ;;  %7407 = vmatprep.subr.bf16.mxu1 %v7709_v13  ;;  %v445_v55 = vor.u32 %v443_v38, %v442_v46  ;;  %v446_v56 = vrot.slane %v442_v46, 4  ;;  %v453_v57 = vor.u32 %v451_v41, %v450_v47  ;;  %v455_v58 = vrot.slane %v450_v47, 4  ;;  %v204_v0 = vld [vmem:[%s8095_s10 + $0x20] sm:$0xff]  ;;  %v205_v1 = vld [vmem:[%s8095_s10 + $0x28] sm:$0xff]  ;;  %v207_v15 = vld [vmem:[%s8095_s10 + $0x38] sm:$0xff] }
  0x1c   : > { %v10643_v60 = vsel %vm8149_vm8, 4294967295, %v10642_v60  ;;  %v459_v61 = vrot.slane %v457_v51, 7  ;;  %v467_v62 = vrot.slane %v465_v53, 7  ;;  %v249_v2 = vld [vmem:[#allocation2 + $0x24] sm:$0x1]  ;;  %v8178_v35 = vpack.c.bf16 %v207_v15, %v207_v15  ;;  %v209_v48 = vld [vmem:[%s8095_s10 + $0x48] sm:$0xff] }
  0x1d   : > { %10644 = vst [vmem:[#allocation5_spill] sm:$0xff] %v10643_v60  ;;  %v454_v63 = vsel %vm8140_vm7, %v446_v56, %v453_v57  ;;  %v299_v8 = vld [vmem:[#allocation2 + $0x2c] sm:$0x1]  ;;  %v250_v11 = vsel %vm8110_vm2, 0, %v249_v2  ;;  %v208_v47 = vld [vmem:[%s8095_s10 + $0x40] sm:$0xff] }
  0x1e   : > { %6592 = vmatpush3.bf16.msra.mxu0 %v7710_v14  ;;  %7408 = vmatpush3.bf16.msra.mxu1 %v7709_v13  ;;  %v761_v3 = vld [vmem:[#allocation2 + $0xc] sm:$0xf]  ;;  %764 = vst [vmem:[#allocation2 + $0x10] sm:$0xf] %v454_v63  ;;  %v462_v4 = vor.u32 %v460_v52, %v459_v61  ;;  %v463_v5 = vrot.slane %v459_v61, 4  ;;  %v470_v6 = vor.u32 %v468_v54, %v467_v62  ;;  %v472_v7 = vrot.slane %v467_v62, 4 }
  0x1f   : > { %6593 = vmatprep.subr.bf16.mxu0 %v7711_v16  ;;  %7409 = vmatprep.subr.bf16.mxu1 %v7712_v17  ;;  %v762_v9 = vsel %vm8149_vm8, %v445_v55, %v761_v3  ;;  %v765_v10 = vld [vmem:[#allocation2 + $0x14] sm:$0x1]  ;;  %v300_v12 = vsel %vm8121_vm4, 0, %v299_v8  ;;  %v6523_v13 = vpack.c.bf16 %v204_v0, %v204_v0  ;;  %251 = vst [vmem:[#allocation2 + $0x24] sm:$0x1] %v250_v11  ;;  %v499_v45 = vshrl.u32 %v8178_v35, 16 }
  0x20   : > { %v206_v14 = vld [vmem:[%s8095_s10 + $0x30] sm:$0xff]  ;;  %763 = vst [vmem:[#allocation2 + $0xc] sm:$0xf] %v762_v9  ;;  %v766_v16 = vsel %vm8110_vm2, %v455_v58, %v765_v10  ;;  %301 = vst [vmem:[#allocation2 + $0x2c] sm:$0x1] %v300_v12  ;;  %v502_v46 = vshll.u32 %v8178_v35, 16  ;;  %v8192_v63 = vpack.c.bf16 %v208_v47, %v208_v47  ;;  %v8194_v0 = vpack.c.bf16 %v209_v48, %v209_v48 }
  0x21   : > { %767 = vst [vmem:[#allocation2 + $0x14] sm:$0x1] %v766_v16  ;;  %v772_v24 = vld [vmem:[#allocation2 + $0x20] sm:$0x1]  ;;  %v474_v25 = vshrl.u32 %v6523_v13, 16 }
  0x22   : > { %6594 = vmatpush3.bf16.msra.mxu0 %v7713_v18  ;;  %7410 = vmatpush3.bf16.msra.mxu1 %v7712_v17  ;;  %v471_v17 = vsel %vm8140_vm7, %v463_v5, %v470_v6  ;;  %v768_v18 = vld [vmem:[#allocation2 + $0x18] sm:$0xf]  ;;  %v773_v29 = vsel %vm8110_vm2, %v472_v7, %v772_v24  ;;  %v255_v5 = vld [vmem:[#allocation2 + $0x3c] sm:$0x1]  ;;  %v305_v6 = vld [vmem:[#allocation2 + $0x44] sm:$0x1] }
  0x23   : > { %6595 = vmatprep.subr.bf16.mxu0 %v7714_v19  ;;  %7411 = vmatprep.subr.bf16.mxu1 %v7715_v20  ;;  %v6524_v19 = vpack.c.bf16 %v205_v1, %v205_v1  ;;  %v769_v23 = vsel %vm8149_vm8, %v462_v4, %v768_v18  ;;  %771 = vst [vmem:[#allocation2 + $0x1c] sm:$0xf] %v471_v17  ;;  %774 = vst [vmem:[#allocation2 + $0x20] sm:$0x1] %v773_v29  ;;  %v476_v34 = vrot.slane %v474_v25, 7  ;;  %v8219_v29 = vld [vmem:[%s10600_s1 + $0xb0] sm:$0xff]  }
  0x24   : > { %770 = vst [vmem:[#allocation2 + $0x18] sm:$0xf] %v769_v23  ;;  %v256_v35 = vsel %vm8110_vm2, 0, %v255_v5  ;;  %v508_v48 = vshrl.u32 %v8192_v63, 16 }
  0x25   : > { %v482_v30 = vshrl.u32 %v6524_v19, 16  ;;  %v876_v38 = vld [vmem:[#allocation2 + $0x10] sm:$0xf]  ;;  %v480_v40 = vrot.slane %v476_v34, 4  ;;  %257 = vst [vmem:[#allocation2 + $0x3c] sm:$0x1] %v256_v35 }
  0x26   : > { %6596 = vmatpush3.bf16.msra.mxu0 %v7716_v21  ;;  %7412 = vmatpush3.bf16.msra.mxu1 %v7715_v20  ;;  %v252_v20 = vld [vmem:[#allocation2 + $0x30] sm:$0x1]  ;;  %v302_v21 = vld [vmem:[#allocation2 + $0x38] sm:$0x1]  ;;  %v775_v53 = vld [vmem:[#allocation2 + $0x24] sm:$0xf] }
  0x27   : > { %6597 = vmatprep.subr.bf16.mxu0 %v7717_v22  ;;  %7413 = vmatprep.subr.bf16.mxu1 %v7718_v26  ;;  %v6525_v22 = vpack.c.bf16 %v206_v14, %v206_v14  ;;  %v253_v28 = vsel %vm8110_vm2, 0, %v252_v20  ;;  %v303_v32 = vsel %vm8121_vm4, 0, %v302_v21  ;;  %v484_v37 = vrot.slane %v482_v30, 7  ;;  %v875_v51 = vld [vmem:[#allocation2 + $0xc] sm:$0xf]  ;;  %v7728_v21 = vld [vmem:[%s10600_s1 + $0x38] sm:$0xff]  }
  0x28   : > { %254 = vst [vmem:[#allocation2 + $0x30] sm:$0x1] %v253_v28  ;;  %304 = vst [vmem:[#allocation2 + $0x38] sm:$0x1] %v303_v32  ;;  %v928_v52 = vld [vmem:[#allocation2 + $0xc] sm:$0xe]  ;;  %v8186_v54 = vcombine.low %v875_v51, %v876_v38 }
  0x29   : > { %v491_v36 = vshrl.u32 %v6525_v22, 16  ;;  %v494_v42 = vshll.u32 %v6525_v22, 16  ;;  %v489_v44 = vrot.slane %v484_v37, 4  ;;  %v7721_v55 = vld [vmem:[#allocation2 + $0x14] ss:$0 sps:$4 sm:$0x11]   ;;  %v6076_v56 = vcombine.low %v928_v52, %v876_v38 }
  0x2a   : > { %6598 = vmatpush3.bf16.msra.mxu0 %v7719_v31  ;;  %7414 = vmatpush3.bf16.msra.mxu1 %v7718_v26  ;;  %v477_v26 = vshll.u32 %v6523_v13, 16  ;;  %v485_v31 = vshll.u32 %v6524_v19, 16  ;;  %v878_v61 = vld [vmem:[#allocation2 + $0x1c] sm:$0xf]  ;;  %v1121_v1 = vshrl.u32 %v8186_v54, 16  ;;  %v1123_v2 = vshll.u32 %v8186_v54, 16 }
  0x2b   : > { %7447 = vmatprep.subr.bf16.mxu0 %v8136_v49  ;;  %6719 = vmatprep.subr.bf16.mxu1 %v7727_v59  ;;  %v8180_v41 = vrot.slane %v491_v36, 7  ;;  %v877_v59 = vld [vmem:[#allocation2 + $0x18] sm:$0xf]  ;;  %v1128_v3 = vshll.u32 %v7721_v55, 16  ;;  %v1400_v4 = vrot.slane %v6076_v56, 1  ;;  %v1401_v7 = vrot.slane %v7721_v55, 1 }
  0x2c   : > { %v479_v39 = vor.u32 %v477_v26, %v476_v34  ;;  %v487_v43 = vor.u32 %v485_v31, %v484_v37  ;;  %v929_v62 = vld [vmem:[#allocation2 + $0x18] sm:$0xe]  ;;  %v8198_v8 = vcombine.low %v877_v59, %v878_v61  ;;  %v7724_v9 = vld [vmem:[#allocation2 + $0x20] ss:$0 sps:$4 sm:$0x11]   ;;  %v1125_v13 = vrot.slane %v1123_v2, 1 }
  0x2d   : > { %v6077_v10 = vcombine.low %v929_v62, %v878_v61  ;;  %v779_v11 = vld [vmem:[#allocation2 + $0x2c] sm:$0x1]  ;;  %v496_v12 = vor.u32 %v494_v42, %v8180_v41  ;;  %v1130_v14 = vrot.slane %v1128_v3, 1  ;;  %v497_v16 = vrot.slane %v8180_v41, 4  ;;  %v7735_v28 = vld [vmem:[%s10600_s1 + $0x70] sm:$0xff]   ;;  %v211_v52 = vld [vmem:[%s8095_s10 + $0x58] sm:$0xff] }
  0x2e   : > { %v488_v57 = vsel %vm8140_vm7, %v480_v40, %v487_v43  ;;  %v776_v58 = vsel %vm8149_vm8, %v479_v39, %v775_v53  ;;  %v780_v15 = vsel %vm8110_vm2, %v489_v44, %v779_v11  ;;  %v8205_v18 = vsel %vm1396_vm9, %v1400_v4, %v1401_v7  ;;  %v7736_v34 = vld [vmem:[%s10600_s1 + $0x30] sm:$0xff]   ;;  %v258_v53 = vld [vmem:[#allocation2 + $0x48] sm:$0x1]  ;;  %v212_v2 = vld [vmem:[%s8095_s10 + $0x60] sm:$0xff] }
  0x2f   : > { %777 = vst [vmem:[#allocation2 + $0x24] sm:$0xf] %v776_v58  ;;  %778 = vst [vmem:[#allocation2 + $0x28] sm:$0xf] %v488_v57  ;;  %v782_v17 = vld [vmem:[#allocation2 + $0x30] sm:$0xf]  ;;  %v1126_v23 = vor.u32 %v1125_v13, %v1121_v1  ;;  %7415 = vmatprep.mubr.bf16.mxu1 %v8205_v18  ;;  %v6530_v7 = vpack.c.bf16 %v211_v52, %v211_v52 }
  0x30   : > { %v1403_v19 = vrot.slane %v6077_v10, 1  ;;  %v1404_v20 = vrot.slane %v7724_v9, 1  ;;  %v1133_v22 = vshrl.u32 %v8198_v8, 16  ;;  %781 = vst [vmem:[#allocation2 + $0x2c] sm:$0x1] %v780_v15  ;;  %v1135_v24 = vshll.u32 %v8198_v8, 16 }
  0x31   : > { %v1140_v25 = vshll.u32 %v7724_v9, 16  ;;  %v501_v26 = vrot.slane %v499_v45, 7  ;;  %v783_v31 = vsel %vm8149_vm8, %v496_v12, %v782_v17  ;;  %v786_v32 = vld [vmem:[#allocation2 + $0x38] sm:$0x1]  ;;  %v306_v36 = vsel %vm8121_vm4, 0, %v305_v6  ;;  %v210_v37 = vld [vmem:[%s8095_s10 + $0x50] sm:$0xff] }
  0x32   : > { %v8222_v30 = vsel %vm1396_vm9, %v1403_v19, %v1404_v20  ;;  %v8235_v38 = vsel %vm1107_vm10, %v1126_v23, %v1130_v14  ;;  %v1137_v39 = vrot.slane %v1135_v24, 1  ;;  %784 = vst [vmem:[#allocation2 + $0x30] sm:$0xf] %v783_v31  ;;  %307 = vst [vmem:[#allocation2 + $0x44] sm:$0x1] %v306_v36  ;;  %v511_v51 = vshll.u32 %v8192_v63, 16 }
  0x33   : > { %7416 = vmatmul.mubr.bf16.vlgmr.msra.gmra.mxu1 %v8222_v30  ;;  %v1142_v40 = vrot.slane %v1140_v25, 1  ;;  %v504_v43 = vor.u32 %v502_v46, %v501_v26  ;;  %1742 = vmatprep.mubr.bf16.mxu0 %v8235_v38  ;;  %v506_v47 = vrot.slane %v501_v26, 4  ;;  %v516_v57 = vshrl.u32 %v8194_v0, 16  ;;  %v308_v58 = vld [vmem:[#allocation2 + $0x50] sm:$0x1]  ;;  %v7744_v59 = vld [vmem:[%s10600_s1 + $0x68] sm:$0xff]  }
  0x34   : > { %6720 = vmatpush3.bf16.msra.mxu1 %v7728_v21  ;;  %1743 = vmatmul.mubr.bf16.vlgmr.msra.gmra.mxu0 %v8186_v54  ;;  %v1138_v46 = vor.u32 %v1137_v39, %v1133_v22  ;;  %v510_v1 = vrot.slane %v508_v48, 7  ;;  %v6529_v6 = vpack.c.bf16 %v210_v37, %v210_v37  ;;  %v7745_v12 = vld [vmem:[%s10600_s1 + $0x28] sm:$0xff]   ;;  %v519_v15 = vshll.u32 %v8194_v0, 16  ;;  %v261_v37 = vld [vmem:[#allocation2 + $0x54] sm:$0x1] }
  0x35   : > { %v505_v56 = vsel %vm8140_vm7, %v497_v16, %v504_v43  ;;  %6721 = vmatprep.subr.bf16.mxu1 %v7735_v28  ;;  %7448 = vmatpush3.bf16.msra.mxu0 %v8136_v49  ;;  %v787_v61 = vsel %vm8110_vm2, %v506_v47, %v786_v32  ;;  %v518_v11 = vrot.slane %v516_v57, 7  ;;  %v259_v16 = vsel %vm8110_vm2, 0, %v258_v53  ;;  %v213_v17 = vld [vmem:[%s8095_s10 + $0x68] sm:$0xff]  ;;  %v789_v28 = vld [vmem:[#allocation2 + $0x3c] sm:$0xf] }
  0x36   : > { %v879_v41 = vld [vmem:[#allocation2 + $0x24] sm:$0xf]  ;;  %v880_v42 = vld [vmem:[#allocation2 + $0x28] sm:$0xf]  ;;  %785 = vst [vmem:[#allocation2 + $0x34] sm:$0xf] %v505_v56  ;;  %v8258_v3 = vsel %vm1107_vm10, %v1138_v46, %v1142_v40  ;;  %7449 = vmatprep.subr.bf16.mxu0 %v8219_v29  ;;  %v513_v9 = vor.u32 %v511_v51, %v510_v1  ;;  %v8272_v24 = vpack.c.bf16 %v212_v2, %v212_v2 }
  0x37   : > { %v930_v44 = vld [vmem:[#allocation2 + $0x24] sm:$0xe]  ;;  %v8239_v45 = vcombine.low %v879_v41, %v880_v42  ;;  %v7730_v4 = vld [vmem:[#allocation2 + $0x2c] ss:$0 sps:$4 sm:$0x11]   ;;  %1750 = vmatprep.mubr.bf16.mxu0 %v8258_v3  ;;  %v514_v10 = vrot.slane %v510_v1, 4  ;;  %v521_v26 = vor.u32 %v519_v15, %v518_v11  ;;  %v8291_v53 = vpack.c.bf16 %v213_v17, %v213_v17 }
  0x38   : > { %v6078_v55 = vcombine.low %v930_v44, %v880_v42  ;;  %788 = vst [vmem:[#allocation2 + $0x38] sm:$0x1] %v787_v61  ;;  %6722 = vmatpush3.bf16.msra.mxu1 %v7736_v34  ;;  %v1407_v13 = vrot.slane %v7730_v4, 1  ;;  %v1152_v14 = vshll.u32 %v7730_v4, 16  ;;  %v523_v22 = vrot.slane %v518_v11, 4  ;;  %v214_v1 = vld [vmem:[%s8095_s10 + $0x70] sm:$0xff] }
  0x39   : > { %v1145_v62 = vshrl.u32 %v8239_v45, 16  ;;  %v1147_v63 = vshll.u32 %v8239_v45, 16  ;;  %6723 = vmatprep.subr.bf16.mxu1 %v7744_v59  ;;  %v881_v19 = vld [vmem:[#allocation2 + $0x30] sm:$0xf]  ;;  %260 = vst [vmem:[#allocation2 + $0x48] sm:$0x1] %v259_v16  ;;  %7450 = vmatpush3.bf16.msra.mxu0 %v8219_v29  ;;  %v790_v34 = vsel %vm8149_vm8, %v513_v9, %v789_v28  ;;  %v522_v42 = vsel %vm8140_vm7, %v514_v10, %v521_v26 }
  0x3a   : > { %v1406_v5 = vrot.slane %v6078_v55, 1  ;;  %v931_v20 = vld [vmem:[#allocation2 + $0x30] sm:$0xe]  ;;  %v309_v23 = vsel %vm8121_vm4, 0, %v308_v58  ;;  %v1154_v0 = vrot.slane %v1152_v14, 1  ;;  %v525_v32 = vshrl.u32 %v6529_v6, 16 }
  0x3b   : > { %v1149_v49 = vrot.slane %v1147_v63, 1  ;;  %v793_v31 = vld [vmem:[#allocation2 + $0x44] sm:$0x1]  ;;  %310 = vst [vmem:[#allocation2 + $0x50] sm:$0x1] %v309_v23  ;;  %v528_v29 = vshll.u32 %v6529_v6, 16  ;;  %v6533_v28 = vpack.c.bf16 %v214_v1, %v214_v1 }
  0x3c   : > { %v8275_v25 = vsel %vm1396_vm9, %v1406_v5, %v1407_v13  ;;  %v794_v35 = vsel %vm8110_vm2, %v523_v22, %v793_v31  ;;  %v533_v36 = vshrl.u32 %v6530_v7, 16  ;;  %6724 = vmatpush3.bf16.msra.mxu1 %v7745_v12  ;;  %v311_v39 = vld [vmem:[#allocation2 + $0x5c] sm:$0x1]  ;;  %1751 = vmatmul.mubr.bf16.gmra.mxu0 %v8198_v8  ;;  %791 = vst [vmem:[#allocation2 + $0x3c] sm:$0xf] %v790_v34  ;;  %v527_v43 = vrot.slane %v525_v32, 7 }
  0x3d   : > { %v1150_v21 = vor.u32 %v1149_v49, %v1145_v62  ;;  %7419 = vmatprep.mubr.bf16.mxu1 %v8275_v25  ;;  %v882_v40 = vld [vmem:[#allocation2 + $0x34] sm:$0xf]  ;;  %795 = vst [vmem:[#allocation2 + $0x44] sm:$0x1] %v794_v35  ;;  %v536_v44 = vshll.u32 %v6530_v7, 16  ;;  %v262_v56 = vsel %vm8110_vm2, 0, %v261_v37 }
  0x3e   : > { %v8288_v47 = vcombine.low %v881_v19, %v882_v40  ;;  %v6079_v51 = vcombine.low %v931_v20, %v882_v40  ;;  %792 = vst [vmem:[#allocation2 + $0x40] sm:$0xf] %v522_v42  ;;  %v535_v52 = vrot.slane %v533_v36, 7  ;;  %v530_v46 = vor.u32 %v528_v29, %v527_v43  ;;  %v7752_v58 = vld [vmem:[%s10600_s1 + $0x60] sm:$0xff]   ;;  %263 = vst [vmem:[#allocation2 + $0x54] sm:$0x1] %v262_v56 }
  0x3f   : > { %v8284_v41 = vsel %vm1107_vm10, %v1150_v21, %v1154_v0  ;;  %v7733_v48 = vld [vmem:[#allocation2 + $0x38] ss:$0 sps:$4 sm:$0x11]   ;;  %v531_v55 = vrot.slane %v527_v43, 4  ;;  %v312_v57 = vsel %vm8121_vm4, 0, %v311_v39  ;;  %v7753_v2 = vld [vmem:[%s10600_s1 + $0x20] sm:$0xff]   ;;  %6725 = vmatprep.subr.bf16.mxu1 %v7752_v58 }
  0x40   : > { %1758 = vmatprep.mubr.bf16.mxu0 %v8284_v41  ;;  %v1409_v59 = vrot.slane %v6079_v51, 1  ;;  %v1410_v61 = vrot.slane %v7733_v48, 1  ;;  %v538_v62 = vor.u32 %v536_v44, %v535_v52  ;;  %v540_v63 = vrot.slane %v535_v52, 4  ;;  %313 = vst [vmem:[#allocation2 + $0x5c] sm:$0x1] %v312_v57  ;;  %v215_v14 = vld [vmem:[%s8095_s10 + $0x78] sm:$0xff]  ;;  %6726 = vmatpush3.bf16.msra.mxu1 %v7753_v2 }
  0x41   : > { %v796_v4 = vld [vmem:[#allocation2 + $0x48] sm:$0xf]  ;;  %v1157_v5 = vshrl.u32 %v8288_v47, 16  ;;  %v1159_v6 = vshll.u32 %v8288_v47, 16  ;;  %v1164_v7 = vshll.u32 %v7733_v48, 16  ;;  %v542_v49 = vshrl.u32 %v8272_v24, 16 }
  0x42   : > { %v8308_v9 = vsel %vm1396_vm9, %v1409_v59, %v1410_v61  ;;  %v539_v10 = vsel %vm8140_vm7, %v531_v55, %v538_v62  ;;  %v797_v11 = vsel %vm8149_vm8, %v530_v46, %v796_v4  ;;  %v800_v12 = vld [vmem:[#allocation2 + $0x50] sm:$0x1]  ;;  %v545_v13 = vshll.u32 %v8272_v24, 16  ;;  %v264_v15 = vld [vmem:[#allocation2 + $0x60] sm:$0x1]  ;;  %v7760_v61 = vld [vmem:[%s10600_s1 + $0xa8] sm:$0xff]  }
  0x43   : > { %7420 = vmatmul.mubr.bf16.gmra.mxu1 %v8308_v9  ;;  %798 = vst [vmem:[#allocation2 + $0x48] sm:$0xf] %v797_v11  ;;  %799 = vst [vmem:[#allocation2 + $0x4c] sm:$0xf] %v539_v10  ;;  %v801_v16 = vsel %vm8110_vm2, %v540_v63, %v800_v12  ;;  %v1161_v17 = vrot.slane %v1159_v6, 1  ;;  %v1166_v19 = vrot.slane %v1164_v7, 1  ;;  %v6534_v31 = vpack.c.bf16 %v215_v14, %v215_v14 }
  0x44   : > { %v544_v20 = vrot.slane %v542_v49, 7  ;;  %v932_v21 = vld [vmem:[#allocation2 + $0x3c] sm:$0xe]  ;;  %802 = vst [vmem:[#allocation2 + $0x50] sm:$0x1] %v801_v16  ;;  %1759 = vmatmul.mubr.bf16.gmra.mxu0 %v8239_v45  ;;  %v216_v32 = vld [vmem:[%s8095_s10 + $0x80] sm:$0xff]  ;;  %7451 = vmatprep.subr.bf16.mxu0 %v7760_v61 }
  0x45   : > { %v314_v22 = vld [vmem:[#allocation2 + $0x68] sm:$0x1]  ;;  %v884_v23 = vld [vmem:[#allocation2 + $0x40] sm:$0xf]  ;;  %v1162_v24 = vor.u32 %v1161_v17, %v1157_v5  ;;  %v883_v34 = vld [vmem:[#allocation2 + $0x3c] sm:$0xf]  ;;  %v8340_v59 = vpack.c.bf16 %v216_v32, %v216_v32  ;;  %7452 = vmatpush3.bf16.msra.mxu0 %v7760_v61 }
  0x46   : > { %v8319_v0 = vld [vmem:[#allocation2 + $0x44] ss:$0 sps:$4 sm:$0x11]   ;;  %v547_v26 = vor.u32 %v545_v13, %v544_v20  ;;  %v6080_v35 = vcombine.low %v932_v21, %v884_v23  ;;  %v550_v29 = vshrl.u32 %v8291_v53, 16  ;;  %v553_v36 = vshll.u32 %v8291_v53, 16  ;;  %v217_v53 = vld [vmem:[%s8095_s10 + $0x88] sm:$0xff] }
  0x47   : > { %v1413_v37 = vrot.slane %v8319_v0, 1  ;;  %v8327_v39 = vsel %vm1107_vm10, %v1162_v24, %v1166_v19  ;;  %v548_v40 = vrot.slane %v544_v20, 4  ;;  %v803_v42 = vld [vmem:[#allocation2 + $0x54] sm:$0xf]  ;;  %v265_v43 = vsel %vm8110_vm2, 0, %v264_v15  ;;  %v7761_v19 = vld [vmem:[%s10600_s1 + $0x58] sm:$0xff]  }
  0x48   : > { %v1412_v44 = vrot.slane %v6080_v35, 1  ;;  %1766 = vmatprep.mubr.bf16.mxu0 %v8327_v39  ;;  %v552_v48 = vrot.slane %v550_v29, 7  ;;  %v804_v51 = vsel %vm8149_vm8, %v547_v26, %v803_v42  ;;  %266 = vst [vmem:[#allocation2 + $0x60] sm:$0x1] %v265_v43  ;;  %v315_v52 = vsel %vm8121_vm4, 0, %v314_v22  ;;  %v218_v46 = vld [vmem:[%s8095_s10 + $0x90] sm:$0xff]  ;;  %6727 = vmatprep.subr.bf16.mxu1 %v7761_v19 }
  0x49   : > { %v8338_v55 = vcombine.low %v883_v34, %v884_v23  ;;  %805 = vst [vmem:[#allocation2 + $0x54] sm:$0xf] %v804_v51  ;;  %v807_v56 = vld [vmem:[#allocation2 + $0x5c] sm:$0x1]  ;;  %316 = vst [vmem:[#allocation2 + $0x68] sm:$0x1] %v315_v52  ;;  %v8354_v11 = vpack.c.bf16 %v217_v53, %v217_v53  ;;  %v8356_v12 = vpack.c.bf16 %v218_v46, %v218_v46 }
  0x4a   : > { %v559_v57 = vshrl.u32 %v6533_v28, 16  ;;  %v567_v58 = vshrl.u32 %v6534_v31, 16  ;;  %v8346_v62 = vsel %vm1396_vm9, %v1412_v44, %v1413_v37  ;;  %v8348_v63 = vld [vmem:[#allocation2 + $0x4c] sm:$0xf]  ;;  %v933_v1 = vld [vmem:[#allocation2 + $0x48] sm:$0xe]  ;;  %v555_v2 = vor.u32 %v553_v36, %v552_v48 }
  0x4b   : > { %v562_v4 = vshll.u32 %v6533_v28, 16  ;;  %v570_v5 = vshll.u32 %v6534_v31, 16  ;;  %v267_v6 = vld [vmem:[#allocation2 + $0x6c] sm:$0x1]  ;;  %7423 = vmatprep.mubr.bf16.mxu1 %v8346_v62  ;;  %v6081_v49 = vcombine.low %v933_v1, %v8348_v63  ;;  %v557_v10 = vrot.slane %v552_v48, 4  ;;  %v219_v24 = vld [vmem:[%s8095_s10 + $0x98] sm:$0xff] }
  0x4c   : > { %v8351_v7 = vld [vmem:[#allocation2 + $0x50] ss:$0 sps:$4 sm:$0x11]   ;;  %v556_v13 = vsel %vm8140_vm7, %v548_v40, %v555_v2  ;;  %v561_v14 = vrot.slane %v559_v57, 7  ;;  %v569_v15 = vrot.slane %v567_v58, 7  ;;  %v1169_v16 = vshrl.u32 %v8338_v55, 16  ;;  %1767 = vmatmul.mubr.bf16.gmra.mxu0 %v8288_v47 }
  0x4d   : > { %v317_v17 = vld [vmem:[#allocation2 + $0x74] sm:$0x1]  ;;  %v1415_v20 = vrot.slane %v6081_v49, 1  ;;  %v1416_v21 = vrot.slane %v8351_v7, 1  ;;  %806 = vst [vmem:[#allocation2 + $0x58] sm:$0xf] %v556_v13  ;;  %v808_v22 = vsel %vm8110_vm2, %v557_v10, %v807_v56  ;;  %v8384_v53 = vpack.c.bf16 %v219_v24, %v219_v24 }
  0x4e   : > { %v1171_v23 = vshll.u32 %v8338_v55, 16  ;;  %v7762_v26 = vld [vmem:[%s10600_s1 + $0x18] sm:$0xff]   ;;  %809 = vst [vmem:[#allocation2 + $0x5c] sm:$0x1] %v808_v22  ;;  %v564_v28 = vor.u32 %v562_v4, %v561_v14  ;;  %v565_v31 = vrot.slane %v561_v14, 4  ;;  %v572_v32 = vor.u32 %v570_v5, %v569_v15  ;;  %v220_v13 = vld [vmem:[%s8095_s10 + $0xa0] sm:$0xff] }
  0x4f   : > { %v574_v34 = vrot.slane %v569_v15, 4  ;;  %v270_v35 = vld [vmem:[#allocation2 + $0x78] sm:$0x1]  ;;  %v8374_v29 = vsel %vm1396_vm9, %v1415_v20, %v1416_v21  ;;  %v810_v36 = vld [vmem:[#allocation2 + $0x60] sm:$0xf]  ;;  %v1176_v40 = vshll.u32 %v8319_v0, 16  ;;  %6728 = vmatpush3.bf16.msra.mxu1 %v7762_v26 }
  0x50   : > { %v1173_v37 = vrot.slane %v1171_v23, 1  ;;  %v268_v42 = vsel %vm8110_vm2, 0, %v267_v6  ;;  %7424 = vmatmul.mubr.bf16.gmra.mxu1 %v8374_v29  ;;  %v934_v43 = vld [vmem:[#allocation2 + $0x54] sm:$0xe]  ;;  %v573_v44 = vsel %vm8140_vm7, %v565_v31, %v572_v32  ;;  %v811_v48 = vsel %vm8149_vm8, %v564_v28, %v810_v36  ;;  %v814_v51 = vld [vmem:[#allocation2 + $0x68] sm:$0x1] }
  0x51   : > { %269 = vst [vmem:[#allocation2 + $0x6c] sm:$0x1] %v268_v42  ;;  %v320_v52 = vld [vmem:[#allocation2 + $0x80] sm:$0x1]  ;;  %v885_v46 = vld [vmem:[#allocation2 + $0x48] sm:$0xf]  ;;  %v815_v0 = vsel %vm8110_vm2, %v574_v34, %v814_v51  ;;  %v8417_v34 = vpack.c.bf16 %v220_v13, %v220_v13 }
  0x52   : > { %812 = vst [vmem:[#allocation2 + $0x60] sm:$0xf] %v811_v48  ;;  %813 = vst [vmem:[#allocation2 + $0x64] sm:$0xf] %v573_v44  ;;  %v1174_v56 = vor.u32 %v1173_v37, %v1169_v16  ;;  %v1178_v57 = vrot.slane %v1176_v40, 1  ;;  %v318_v58 = vsel %vm8121_vm4, 0, %v317_v17  ;;  %v8413_v21 = vcombine.low %v885_v46, %v8348_v63 }
  0x53   : > { %816 = vst [vmem:[#allocation2 + $0x68] sm:$0x1] %v815_v0  ;;  %319 = vst [vmem:[#allocation2 + $0x74] sm:$0x1] %v318_v58  ;;  %v576_v61 = vshrl.u32 %v8340_v59, 16  ;;  %v579_v1 = vshll.u32 %v8340_v59, 16 }
  0x54   : > { %v584_v2 = vshrl.u32 %v8354_v11, 16  ;;  %v587_v4 = vshll.u32 %v8354_v11, 16  ;;  %v8395_v5 = vsel %vm1107_vm10, %v1174_v56, %v1178_v57  ;;  %v271_v6 = vsel %vm8110_vm2, 0, %v270_v35  ;;  %v8403_v14 = vld [vmem:[#allocation2 + $0x58] sm:$0xf]  ;;  %v221_v26 = vld [vmem:[%s8095_s10 + $0xa8] sm:$0xff] }
  0x55   : > { %v321_v49 = vsel %vm8121_vm4, 0, %v320_v52  ;;  %v593_v10 = vshrl.u32 %v8356_v12, 16  ;;  %1774 = vmatprep.mubr.bf16.mxu0 %v8395_v5  ;;  %v578_v59 = vrot.slane %v576_v61, 7  ;;  %272 = vst [vmem:[#allocation2 + $0x78] sm:$0x1] %v271_v6  ;;  %v596_v11 = vshll.u32 %v8356_v12, 16 }
  0x56   : > { %v586_v15 = vrot.slane %v584_v2, 7  ;;  %322 = vst [vmem:[#allocation2 + $0x80] sm:$0x1] %v321_v49  ;;  %v601_v16 = vshrl.u32 %v8384_v53, 16  ;;  %v6082_v19 = vcombine.low %v934_v43, %v8403_v14  ;;  %1775 = vmatmul.mubr.bf16.gmra.mxu0 %v8338_v55  ;;  %v273_v43 = vld [vmem:[#allocation2 + $0x84] sm:$0x1]  ;;  %v8431_v0 = vpack.c.bf16 %v221_v26, %v221_v26 }
  0x57   : > { %v8408_v17 = vld [vmem:[#allocation2 + $0x5c] ss:$0 sps:$4 sm:$0x11]   ;;  %v595_v20 = vrot.slane %v593_v10, 7  ;;  %v581_v22 = vor.u32 %v579_v1, %v578_v59  ;;  %v582_v23 = vrot.slane %v578_v59, 4  ;;  %v222_v56 = vld [vmem:[%s8095_s10 + $0xb0] sm:$0xff] }
  0x58   : > { %v589_v24 = vor.u32 %v587_v4, %v586_v15  ;;  %v1418_v28 = vrot.slane %v6082_v19, 1  ;;  %v1419_v31 = vrot.slane %v8408_v17, 1  ;;  %v591_v12 = vrot.slane %v586_v15, 4  ;;  %v817_v32 = vld [vmem:[#allocation2 + $0x6c] sm:$0xf]  ;;  %v223_v59 = vld [vmem:[%s8095_s10 + $0xb8] sm:$0xff] }
  0x59   : > { %v8419_v35 = vld [vmem:[#allocation2 + $0x64] sm:$0xf]  ;;  %v935_v36 = vld [vmem:[#allocation2 + $0x60] sm:$0xe]  ;;  %v818_v63 = vsel %vm8149_vm8, %v581_v22, %v817_v32  ;;  %v598_v40 = vor.u32 %v596_v11, %v595_v20  ;;  %v599_v42 = vrot.slane %v595_v20, 4  ;;  %v603_v46 = vrot.slane %v601_v16, 7 }
  0x5a   : > { %v590_v37 = vsel %vm8140_vm7, %v582_v23, %v589_v24  ;;  %v323_v44 = vld [vmem:[#allocation2 + $0x8c] sm:$0x1]  ;;  %v8426_v48 = vsel %vm1396_vm9, %v1418_v28, %v1419_v31  ;;  %v8428_v51 = vld [vmem:[#allocation2 + $0x68] ss:$0 sps:$4 sm:$0x11]   ;;  %v6083_v52 = vcombine.low %v935_v36, %v8419_v35  ;;  %v604_v58 = vshll.u32 %v8384_v53, 16 }
  0x5b   : > { %819 = vst [vmem:[#allocation2 + $0x6c] sm:$0xf] %v818_v63  ;;  %820 = vst [vmem:[#allocation2 + $0x70] sm:$0xf] %v590_v37  ;;  %7427 = vmatprep.mubr.bf16.mxu1 %v8426_v48  ;;  %v821_v57 = vld [vmem:[#allocation2 + $0x74] sm:$0x1]  ;;  %v8458_v32 = vpack.c.bf16 %v222_v56, %v222_v56 }
  0x5c   : > { %v1181_v61 = vshrl.u32 %v8413_v21, 16  ;;  %v1183_v1 = vshll.u32 %v8413_v21, 16  ;;  %v1188_v2 = vshll.u32 %v8351_v7, 16  ;;  %v1421_v4 = vrot.slane %v6083_v52, 1  ;;  %v824_v13 = vld [vmem:[#allocation2 + $0x78] sm:$0xf] }
  0x5d   : > { %v1422_v6 = vrot.slane %v8428_v51, 1  ;;  %v822_v49 = vsel %vm8110_vm2, %v591_v12, %v821_v57  ;;  %v608_v10 = vrot.slane %v603_v46, 4  ;;  %v606_v15 = vor.u32 %v604_v58, %v603_v46  ;;  %v828_v11 = vld [vmem:[#allocation2 + $0x80] sm:$0x1]  ;;  %v276_v20 = vld [vmem:[#allocation2 + $0x90] sm:$0x1] }
  0x5e   : > { %823 = vst [vmem:[#allocation2 + $0x74] sm:$0x1] %v822_v49  ;;  %v825_v53 = vsel %vm8149_vm8, %v598_v40, %v824_v13  ;;  %v1185_v16 = vrot.slane %v1183_v1, 1  ;;  %v1190_v19 = vrot.slane %v1188_v2, 1  ;;  %v274_v23 = vsel %vm8110_vm2, 0, %v273_v43  ;;  %v7769_v36 = vld [vmem:[%s10600_s1 + $0x50] sm:$0xff]  }
  0x5f   : > { %v8446_v7 = vsel %vm1396_vm9, %v1421_v4, %v1422_v6  ;;  %826 = vst [vmem:[#allocation2 + $0x78] sm:$0xf] %v825_v53  ;;  %v829_v22 = vsel %vm8110_vm2, %v608_v10, %v828_v11  ;;  %v324_v24 = vsel %vm8121_vm4, 0, %v323_v44  ;;  %v326_v26 = vld [vmem:[#allocation2 + $0x98] sm:$0x1]  ;;  %v607_v28 = vsel %vm8140_vm7, %v599_v42, %v606_v15  ;;  %v7770_v37 = vld [vmem:[%s10600_s1 + $0x10] sm:$0xff]   ;;  %6729 = vmatprep.subr.bf16.mxu1 %v7769_v36 }
  0x60   : > { %10645 = vst [vmem:[#allocation6_spill] sm:$0xff] %v8446_v7  ;;  %7428 = vmatmul.mubr.bf16.gmra.mxu1 %v8446_v7  ;;  %830 = vst [vmem:[#allocation2 + $0x80] sm:$0x1] %v829_v22  ;;  %v1186_v31 = vor.u32 %v1185_v16, %v1181_v61  ;;  %v610_v12 = vshrl.u32 %v8417_v34, 16  ;;  %v618_v63 = vshrl.u32 %v8431_v0, 16  ;;  %v621_v40 = vshll.u32 %v8431_v0, 16 }
  0x61   : > { %275 = vst [vmem:[#allocation2 + $0x84] sm:$0x1] %v274_v23  ;;  %325 = vst [vmem:[#allocation2 + $0x8c] sm:$0x1] %v324_v24  ;;  %v277_v42 = vsel %vm8110_vm2, 0, %v276_v20  ;;  %v327_v43 = vsel %vm8121_vm4, 0, %v326_v26  ;;  %v6542_v57 = vpack.c.bf16 %v223_v59, %v223_v59  ;;  %6730 = vmatpush3.bf16.msra.mxu1 %v7770_v37 }
  0x62   : > { %827 = vst [vmem:[#allocation2 + $0x7c] sm:$0xf] %v607_v28  ;;  %v8472_v44 = vld [vmem:[#allocation2 + $0x70] sm:$0xf]  ;;  %v936_v52 = vld [vmem:[#allocation2 + $0x6c] sm:$0xe]  ;;  %v8475_v46 = vsel %vm1107_vm10, %v1186_v31, %v1190_v19 }
  0x63   : > { %v613_v56 = vshll.u32 %v8417_v34, 16  ;;  %278 = vst [vmem:[#allocation2 + $0x90] sm:$0x1] %v277_v42  ;;  %328 = vst [vmem:[#allocation2 + $0x98] sm:$0x1] %v327_v43  ;;  %v6084_v0 = vcombine.low %v936_v52, %v8472_v44  ;;  %1782 = vmatprep.mubr.bf16.mxu0 %v8475_v46  ;;  %v612_v58 = vrot.slane %v610_v12, 7 }
  0x64   : > { %v620_v61 = vrot.slane %v618_v63, 7  ;;  %v887_v1 = vld [vmem:[#allocation2 + $0x54] sm:$0xf]  ;;  %1783 = vmatmul.mubr.bf16.gmra.mxu0 %v8413_v21  ;;  %v627_v2 = vshrl.u32 %v8458_v32, 16  ;;  %v630_v4 = vshll.u32 %v8458_v32, 16  ;;  %v635_v34 = vshrl.u32 %v6542_v57, 16 }
  0x65   : > { %v224_v6 = vld [vmem:[%s8095_s10 + $0xc0] sm:$0xff]  ;;  %v8484_v49 = vld [vmem:[#allocation2 + $0x74] ss:$0 sps:$4 sm:$0x11]   ;;  %v1424_v10 = vrot.slane %v6084_v0, 1  ;;  %v615_v15 = vor.u32 %v613_v56, %v612_v58  ;;  %v616_v53 = vrot.slane %v612_v58, 4  ;;  %v8488_v20 = vcombine.low %v887_v1, %v8403_v14 }
  0x66   : > { %v623_v13 = vor.u32 %v621_v40, %v620_v61  ;;  %v937_v59 = vld [vmem:[#allocation2 + $0x78] sm:$0xe]  ;;  %v625_v11 = vrot.slane %v620_v61, 4  ;;  %v638_v16 = vshll.u32 %v6542_v57, 16  ;;  %v225_v19 = vld [vmem:[%s8095_s10 + $0xc8] sm:$0xff]  ;;  %v1425_v22 = vrot.slane %v8484_v49, 1 }
  0x67   : > { %v8491_v23 = vld [vmem:[#allocation2 + $0x80] ss:$0 sps:$4 sm:$0x11]   ;;  %v279_v12 = vld [vmem:[#allocation2 + $0x9c] sm:$0x1]  ;;  %v8497_v32 = vpack.c.bf16 %v224_v6, %v224_v6  ;;  %v8504_v42 = vpack.c.bf16 %v225_v19, %v225_v19  ;;  %v629_v56 = vrot.slane %v627_v2, 7 }
  0x68   : > { %v624_v26 = vsel %vm8140_vm7, %v616_v53, %v623_v13  ;;  %v831_v28 = vld [vmem:[#allocation2 + $0x84] sm:$0xf]  ;;  %v835_v31 = vld [vmem:[#allocation2 + $0x8c] sm:$0x1]  ;;  %v8500_v36 = vsel %vm1396_vm9, %v1424_v10, %v1425_v22  ;;  %v1428_v37 = vrot.slane %v8491_v23, 1  ;;  %v637_v57 = vrot.slane %v635_v34, 7 }
  0x69   : > { %v8493_v24 = vld [vmem:[#allocation2 + $0x7c] sm:$0xf]  ;;  %10646 = vst [vmem:[#allocation7_spill] sm:$0xff] %v8500_v36  ;;  %834 = vst [vmem:[#allocation2 + $0x88] sm:$0xf] %v624_v26  ;;  %7431 = vmatprep.mubr.bf16.mxu1 %v8500_v36  ;;  %v832_v43 = vsel %vm8149_vm8, %v615_v15, %v831_v28  ;;  %v836_v52 = vsel %vm8110_vm2, %v625_v11, %v835_v31  ;;  %v7777_v58 = vld [vmem:[%s10600_s1 + $0xa0] sm:$0xff]   ;;  %v632_v15 = vor.u32 %v630_v4, %v629_v56 }
  0x6a   : > { %v6085_v14 = vcombine.low %v937_v59, %v8493_v24  ;;  %v838_v63 = vld [vmem:[#allocation2 + $0x90] sm:$0xf]  ;;  %v842_v40 = vld [vmem:[#allocation2 + $0x98] sm:$0x1]  ;;  %v329_v0 = vld [vmem:[#allocation2 + $0xa4] sm:$0x1]  ;;  %v640_v53 = vor.u32 %v638_v16, %v637_v57  ;;  %7453 = vmatprep.subr.bf16.mxu0 %v7777_v58 }
  0x6b   : > { %833 = vst [vmem:[#allocation2 + $0x84] sm:$0xf] %v832_v43  ;;  %837 = vst [vmem:[#allocation2 + $0x8c] sm:$0x1] %v836_v52  ;;  %v1193_v1 = vshrl.u32 %v8488_v20, 16  ;;  %v1195_v6 = vshll.u32 %v8488_v20, 16  ;;  %7454 = vmatpush3.bf16.msra.mxu0 %v7777_v58  ;;  %v839_v16 = vsel %vm8149_vm8, %v632_v15, %v838_v63 }
  0x6c   : > { %v1427_v61 = vrot.slane %v6085_v14, 1  ;;  %v1200_v10 = vshll.u32 %v8408_v17, 16  ;;  %v226_v13 = vld [vmem:[%s8095_s10 + $0xd0] sm:$0xff]  ;;  %v282_v59 = vld [vmem:[#allocation2 + $0xa8] sm:$0x1]  ;;  %v633_v2 = vrot.slane %v629_v56, 4 }
  0x6d   : > { %v642_v34 = vrot.slane %v637_v57, 4  ;;  %v227_v11 = vld [vmem:[%s8095_s10 + $0xd8] sm:$0xff]  ;;  %v332_v19 = vld [vmem:[#allocation2 + $0xb0] sm:$0x1]  ;;  %v1197_v26 = vrot.slane %v1195_v6, 1  ;;  %v280_v31 = vsel %vm8110_vm2, 0, %v279_v12 }
  0x6e   : > { %v8520_v22 = vsel %vm1396_vm9, %v1427_v61, %v1428_v37  ;;  %v1202_v28 = vrot.slane %v1200_v10, 1  ;;  %v7778_v17 = vld [vmem:[%s10600_s1 + $0x48] sm:$0xff]   ;;  %v641_v4 = vsel %vm8140_vm7, %v633_v2, %v640_v53  ;;  %281 = vst [vmem:[#allocation2 + $0x9c] sm:$0x1] %v280_v31  ;;  %v330_v12 = vsel %vm8121_vm4, 0, %v329_v0 }
  0x6f   : > { %10647 = vst [vmem:[#allocation8_spill] sm:$0xff] %v8520_v22  ;;  %7432 = vmatmul.mubr.bf16.gmra.mxu1 %v8520_v22  ;;  %v843_v14 = vsel %vm8110_vm2, %v642_v34, %v842_v40  ;;  %v7779_v37 = vld [vmem:[%s10600_s1 + $0x8] sm:$0xff]   ;;  %840 = vst [vmem:[#allocation2 + $0x90] sm:$0xf] %v839_v16  ;;  %v1198_v43 = vor.u32 %v1197_v26, %v1193_v1  ;;  %v644_v52 = vshrl.u32 %v8497_v32, 16  ;;  %v647_v63 = vshll.u32 %v8497_v32, 16 }
  0x70   : > { %841 = vst [vmem:[#allocation2 + $0x94] sm:$0xf] %v641_v4  ;;  %844 = vst [vmem:[#allocation2 + $0x98] sm:$0x1] %v843_v14  ;;  %v652_v56 = vshrl.u32 %v8504_v42, 16  ;;  %6731 = vmatprep.subr.bf16.mxu1 %v7778_v17  ;;  %v655_v57 = vshll.u32 %v8504_v42, 16  ;;  %v6545_v61 = vpack.c.bf16 %v226_v13, %v226_v13  ;;  %v6546_v10 = vpack.c.bf16 %v227_v11, %v227_v11 }
  0x71   : > { %331 = vst [vmem:[#allocation2 + $0xa4] sm:$0x1] %v330_v12  ;;  %v8542_v40 = vld [vmem:[#allocation2 + $0x88] sm:$0xf]  ;;  %v283_v0 = vsel %vm8110_vm2, 0, %v282_v59  ;;  %v333_v58 = vsel %vm8121_vm4, 0, %v332_v19  ;;  %6732 = vmatpush3.bf16.msra.mxu1 %v7779_v37  ;;  %v8550_v1 = vsel %vm1107_vm10, %v1198_v43, %v1202_v28 }
  0x72   : > { %v646_v6 = vrot.slane %v644_v52, 7  ;;  %v654_v32 = vrot.slane %v652_v56, 7  ;;  %284 = vst [vmem:[#allocation2 + $0xa8] sm:$0x1] %v283_v0  ;;  %334 = vst [vmem:[#allocation2 + $0xb0] sm:$0x1] %v333_v58  ;;  %1790 = vmatprep.mubr.bf16.mxu0 %v8550_v1 }
  0x73   : > { %v938_v15 = vld [vmem:[#allocation2 + $0x84] sm:$0xe]  ;;  %v889_v42 = vld [vmem:[#allocation2 + $0x60] sm:$0xf]  ;;  %1791 = vmatmul.mubr.bf16.gmra.mxu0 %v8488_v20  ;;  %v661_v26 = vshrl.u32 %v6545_v61, 16  ;;  %v229_v31 = vld [vmem:[%s8095_s10 + $0xe8] sm:$0xff] }
  0x74   : > { %v8553_v59 = vld [vmem:[#allocation2 + $0x8c] ss:$0 sps:$4 sm:$0x11]   ;;  %v6086_v2 = vcombine.low %v938_v15, %v8542_v40  ;;  %v649_v13 = vor.u32 %v647_v63, %v646_v6  ;;  %v650_v53 = vrot.slane %v646_v6, 4  ;;  %v657_v34 = vor.u32 %v655_v57, %v654_v32  ;;  %v228_v28 = vld [vmem:[%s8095_s10 + $0xe0] sm:$0xff] }
  0x75   : > { %v659_v19 = vrot.slane %v654_v32, 4  ;;  %v7786_v11 = vld [vmem:[%s10600_s1 + $0x40] sm:$0xff]   ;;  %v1431_v4 = vrot.slane %v8553_v59, 1  ;;  %v845_v16 = vld [vmem:[#allocation2 + $0x9c] sm:$0xf]  ;;  %v664_v14 = vshll.u32 %v6545_v61, 16  ;;  %v8564_v37 = vcombine.low %v889_v42, %v8419_v35 }
  0x76   : > { %v1430_v17 = vrot.slane %v6086_v2, 1  ;;  %v669_v12 = vshrl.u32 %v6546_v10, 16  ;;  %v658_v52 = vsel %vm8140_vm7, %v650_v53, %v657_v34  ;;  %v846_v63 = vsel %vm8149_vm8, %v649_v13, %v845_v16  ;;  %v285_v57 = vld [vmem:[#allocation2 + $0xb4] sm:$0x1]  ;;  %v335_v0 = vld [vmem:[#allocation2 + $0xbc] sm:$0x1]  ;;  %6733 = vmatprep.subr.bf16.mxu1 %v7786_v11 }
  0x77   : > { %v8566_v43 = vld [vmem:[#allocation2 + $0x94] sm:$0xf]  ;;  %v672_v56 = vshll.u32 %v6546_v10, 16  ;;  %v939_v61 = vld [vmem:[#allocation2 + $0x90] sm:$0xe]  ;;  %v663_v35 = vrot.slane %v661_v26, 7  ;;  %v8577_v32 = vpack.c.bf16 %v228_v28, %v228_v28  ;;  %v8582_v53 = vpack.c.bf16 %v229_v31, %v229_v31 }
  0x78   : > { %v8573_v58 = vsel %vm1396_vm9, %v1430_v17, %v1431_v4  ;;  %v8575_v6 = vld [vmem:[#allocation2 + $0x98] ss:$0 sps:$4 sm:$0x11]   ;;  %847 = vst [vmem:[#allocation2 + $0x9c] sm:$0xf] %v846_v63  ;;  %v6087_v15 = vcombine.low %v939_v61, %v8566_v43  ;;  %v671_v42 = vrot.slane %v669_v12, 7 }
  0x79   : > { %10648 = vst [vmem:[#allocation9_spill] sm:$0xff] %v8573_v58  ;;  %848 = vst [vmem:[#allocation2 + $0xa0] sm:$0xf] %v658_v52  ;;  %7435 = vmatprep.mubr.bf16.mxu1 %v8573_v58  ;;  %v849_v10 = vld [vmem:[#allocation2 + $0xa4] sm:$0x1]  ;;  %v1205_v13 = vshrl.u32 %v8564_v37, 16  ;;  %v666_v26 = vor.u32 %v664_v14, %v663_v35 }
  0x7a   : > { %v852_v2 = vld [vmem:[#allocation2 + $0xa8] sm:$0xf]  ;;  %v1434_v34 = vrot.slane %v8575_v6, 1  ;;  %v850_v11 = vsel %vm8110_vm2, %v659_v19, %v849_v10  ;;  %v667_v28 = vrot.slane %v663_v35, 4  ;;  %v856_v17 = vld [vmem:[#allocation2 + $0xb0] sm:$0x1]  ;;  %v674_v16 = vor.u32 %v672_v56, %v671_v42 }
  0x7b   : > { %v1433_v4 = vrot.slane %v6087_v15, 1  ;;  %851 = vst [vmem:[#allocation2 + $0xa4] sm:$0x1] %v850_v11  ;;  %v676_v52 = vrot.slane %v671_v42, 4  ;;  %v1207_v63 = vshll.u32 %v8564_v37, 16  ;;  %v230_v12 = vld [vmem:[%s8095_s10 + $0xf0] sm:$0xff]  ;;  %v853_v61 = vsel %vm8149_vm8, %v666_v26, %v852_v2 }
  0x7c   : > { %v7787_v31 = vld [vmem:[%s10600_s1] sm:$0xff]   ;;  %v1212_v58 = vshll.u32 %v8428_v51, 16  ;;  %v286_v19 = vsel %vm8110_vm2, 0, %v285_v57  ;;  %v336_v14 = vsel %vm8121_vm4, 0, %v335_v0  ;;  %v338_v35 = vld [vmem:[#allocation2 + $0xc8] sm:$0x1]  ;;  %v675_v42 = vsel %vm8140_vm7, %v667_v28, %v674_v16 }
  0x7d   : > { %v288_v56 = vld [vmem:[#allocation2 + $0xc0] sm:$0x1]  ;;  %v7790_v15 = vld [vmem:[%s10600_s1 + $0x98] sm:$0xff]   ;;  %v8603_v10 = vsel %vm1396_vm9, %v1433_v4, %v1434_v34  ;;  %854 = vst [vmem:[#allocation2 + $0xa8] sm:$0xf] %v853_v61  ;;  %v857_v51 = vsel %vm8110_vm2, %v676_v52, %v856_v17  ;;  %v1209_v57 = vrot.slane %v1207_v63, 1  ;;  %6734 = vmatpush3.bf16.msra.mxu1 %v7787_v31  ;;  %v6549_v52 = vpack.c.bf16 %v230_v12, %v230_v12 }
  0x7e   : > { %10649 = vst [vmem:[#allocation10_spill] sm:$0xff] %v8603_v10  ;;  %287 = vst [vmem:[#allocation2 + $0xb4] sm:$0x1] %v286_v19  ;;  %v8612_v0 = vld [vmem:[%s10600_s1 + $0x238] sm:$0xff]   ;;  %7436 = vmatmul.mubr.bf16.gmra.mxu1 %v8603_v10  ;;  %v1214_v2 = vrot.slane %v1212_v58, 1  ;;  %v678_v34 = vshrl.u32 %v8577_v32, 16  ;;  %7455 = vmatprep.subr.bf16.mxu0 %v7790_v15 }
  0x7f   : > { %337 = vst [vmem:[#allocation2 + $0xbc] sm:$0x1] %v336_v14  ;;  %855 = vst [vmem:[#allocation2 + $0xac] sm:$0xf] %v675_v42  ;;  %v681_v11 = vshll.u32 %v8577_v32, 16  ;;  %v686_v26 = vshrl.u32 %v8582_v53, 16  ;;  %v1210_v4 = vor.u32 %v1209_v57, %v1205_v13  ;;  %7456 = vmatpush3.bf16.msra.mxu0 %v7790_v15  ;;  %7495 = vmatprep.subr.bf16.mxu1 %v8612_v0 }
  0x80   : > { %858 = vst [vmem:[#allocation2 + $0xb0] sm:$0x1] %v857_v51  ;;  %v8618_v28 = vld [vmem:[#allocation2 + $0xa0] sm:$0xf]  ;;  %v940_v17 = vld [vmem:[#allocation2 + $0x9c] sm:$0xe] }
  0x81   : > { %v231_v16 = vld [vmem:[%s8095_s10 + $0xf8] sm:$0xff]  ;;  %v891_v63 = vld [vmem:[#allocation2 + $0x6c] sm:$0xf]  ;;  %v6088_v31 = vcombine.low %v940_v17, %v8618_v28  ;;  %v680_v58 = vrot.slane %v678_v34, 7  ;;  %v688_v61 = vrot.slane %v686_v26, 7  ;;  %v8624_v19 = vsel %vm1107_vm10, %v1210_v4, %v1214_v2  ;;  %v7792_v15 = vld [vmem:[%s10600_s1 + $0x90] sm:$0xff]  }
  0x82   : > { %v689_v32 = vshll.u32 %v8582_v53, 16  ;;  %v289_v14 = vsel %vm8110_vm2, 0, %v288_v56  ;;  %v339_v13 = vsel %vm8121_vm4, 0, %v338_v35  ;;  %v873_v12 = vld [vmem:[#allocation2] sm:$0xf]  ;;  %1798 = vmatprep.mubr.bf16.mxu0 %v8624_v19  ;;  %v6550_v53 = vpack.c.bf16 %v231_v16, %v231_v16  ;;  %7457 = vmatprep.subr.bf16.mxu0 %v7792_v15 }
  0x83   : > { %v8634_v42 = vld [vmem:[#allocation2 + $0xa4] ss:$0 sps:$4 sm:$0x11]   ;;  %v1436_v51 = vrot.slane %v6088_v31, 1  ;;  %v683_v57 = vor.u32 %v681_v11, %v680_v58  ;;  %290 = vst [vmem:[#allocation2 + $0xc0] sm:$0x1] %v289_v14  ;;  %1799 = vmatmul.mubr.bf16.gmra.mxu0 %v8564_v37  ;;  %v8641_v26 = vcombine.low %v891_v63, %v8472_v44 }
  0x84   : > { %340 = vst [vmem:[#allocation2 + $0xc8] sm:$0x1] %v339_v13  ;;  %v684_v2 = vrot.slane %v680_v58, 4  ;;  %v691_v34 = vor.u32 %v689_v32, %v688_v61  ;;  %v693_v56 = vrot.slane %v688_v61, 4  ;;  %v695_v33 = vshrl.u32 %v6549_v52, 16  ;;  %7458 = vmatpush3.bf16.msra.mxu0 %v7792_v15 }
  0x85   : > { %v8638_v35 = vld [vmem:[#allocation2 + $0x4] sm:$0xf]  ;;  %v893_v17 = vld [vmem:[#allocation2 + $0x78] sm:$0xf]  ;;  %v1437_v4 = vrot.slane %v8634_v42, 1  ;;  %v698_v11 = vshll.u32 %v6549_v52, 16 }
  0x86   : > { %v941_v31 = vld [vmem:[#allocation2 + $0xa8] sm:$0xe]  ;;  %v895_v14 = vld [vmem:[#allocation2 + $0x84] sm:$0xf]  ;;  %v8644_v16 = vld [vmem:[#allocation2 + $0xac] sm:$0xf]  ;;  %v692_v58 = vsel %vm8140_vm7, %v684_v2, %v691_v34  ;;  %v8657_v15 = vcombine.low %v873_v12, %v8638_v35 }
  0x87   : > { %v859_v61 = vld [vmem:[#allocation2 + $0xb4] sm:$0xf]  ;;  %v8649_v32 = vsel %vm1396_vm9, %v1436_v51, %v1437_v4  ;;  %v8651_v13 = vld [vmem:[#allocation2 + $0xb0] ss:$0 sps:$4 sm:$0x11]   ;;  %v6089_v44 = vcombine.low %v941_v31, %v8644_v16  ;;  %v697_v51 = vrot.slane %v695_v33, 7 }
  0x88   : > { %10650 = vst [vmem:[#allocation11_spill] sm:$0xff] %v8649_v32  ;;  %v860_v63 = vsel %vm8149_vm8, %v683_v57, %v859_v61  ;;  %862 = vst [vmem:[#allocation2 + $0xb8] sm:$0xf] %v692_v58  ;;  %v863_v52 = vld [vmem:[#allocation2 + $0xbc] sm:$0x1]  ;;  %7439 = vmatprep.mubr.bf16.mxu1 %v8649_v32  ;;  %v703_v34 = vshrl.u32 %v6550_v53, 16 }
  0x89   : > { %861 = vst [vmem:[#allocation2 + $0xb4] sm:$0xf] %v860_v63  ;;  %v864_v2 = vsel %vm8110_vm2, %v693_v56, %v863_v52  ;;  %v706_v4 = vshll.u32 %v6550_v53, 16  ;;  %v7794_v31 = vld [vmem:[%s10600_s1 + $0x88] sm:$0xff]   ;;  %v1439_v10 = vrot.slane %v6089_v44, 1  ;;  %v1440_v57 = vrot.slane %v8651_v13, 1 }
  0x8a   : > { %865 = vst [vmem:[#allocation2 + $0xbc] sm:$0x1] %v864_v2  ;;  %v1217_v12 = vshrl.u32 %v8641_v26, 16  ;;  %v1219_v58 = vshll.u32 %v8641_v26, 16  ;;  %v8671_v63 = vcombine.low %v893_v17, %v8493_v24  ;;  %v897_v56 = vld [vmem:[#allocation2 + $0x90] sm:$0xf]  ;;  %v700_v33 = vor.u32 %v698_v11, %v697_v51  ;;  %7459 = vmatprep.subr.bf16.mxu0 %v7794_v31 }
  0x8b   : > { %v8668_v61 = vld [vmem:[#allocation2 + $0x8] ss:$0 sps:$4 sm:$0x11]   ;;  %v701_v53 = vrot.slane %v697_v51, 4  ;;  %v705_v52 = vrot.slane %v703_v34, 7  ;;  %v8674_v44 = vcombine.low %v895_v14, %v8542_v40  ;;  %v8677_v2 = vsel %vm1396_vm9, %v1439_v10, %v1440_v57  ;;  %7460 = vmatpush3.bf16.msra.mxu0 %v7794_v31 }
  0x8c   : > { %v866_v32 = vld [vmem:[#allocation2 + $0xc0] sm:$0xf]  ;;  %v870_v22 = vld [vmem:[#allocation2 + $0xc8] sm:$0x1]  ;;  %v1221_v36 = vrot.slane %v1219_v58, 1  ;;  %v1224_v7 = vshll.u32 %v8484_v49, 16  ;;  %7440 = vmatmul.mubr.bf16.gmra.mxu1 %v8677_v2  ;;  %v8685_v40 = vcombine.low %v897_v56, %v8566_v43 }
  0x8d   : > { %v708_v24 = vor.u32 %v706_v4, %v705_v52  ;;  %v710_v17 = vrot.slane %v705_v52, 4  ;;  %v867_v11 = vsel %vm8149_vm8, %v700_v33, %v866_v32  ;;  %v1111_v51 = vshll.u32 %v8657_v15, 16  ;;  %v7796_v49 = vld [vmem:[%s10600_s1 + $0x80] sm:$0xff]  }
  0x8e   : > { %868 = vst [vmem:[#allocation2 + $0xc0] sm:$0xf] %v867_v11  ;;  %v1222_v10 = vor.u32 %v1221_v36, %v1217_v12  ;;  %v1226_v14 = vrot.slane %v1224_v7, 1  ;;  %v1109_v34 = vshrl.u32 %v8657_v15, 16  ;;  %v1229_v43 = vshrl.u32 %v8671_v63, 16  ;;  %7461 = vmatprep.subr.bf16.mxu0 %v7796_v49 }
  0x8f   : > { %v8691_v31 = vld [vmem:[#allocation2 + $0xb8] sm:$0xf]  ;;  %v709_v4 = vsel %vm8140_vm7, %v701_v53, %v708_v24  ;;  %v871_v32 = vsel %vm8110_vm2, %v710_v17, %v870_v22  ;;  %v1231_v57 = vshll.u32 %v8671_v63, 16  ;;  %v1113_v12 = vrot.slane %v1111_v51, 1  ;;  %7462 = vmatpush3.bf16.msra.mxu0 %v7796_v49 }
  0x90   : > { %v942_v36 = vld [vmem:[#allocation2 + $0xb4] sm:$0xe]  ;;  %869 = vst [vmem:[#allocation2 + $0xc4] sm:$0xf] %v709_v4  ;;  %872 = vst [vmem:[#allocation2 + $0xc8] sm:$0x1] %v871_v32  ;;  %v8700_v7 = vsel %vm1107_vm10, %v1222_v10, %v1226_v14 }
  0x91   : > { %v1116_v58 = vshll.u32 %v8668_v61, 16  ;;  %v1236_v56 = vshll.u32 %v8491_v23, 16  ;;  %v8704_v33 = vld [vmem:[#allocation2 + $0xbc] ss:$0 sps:$4 sm:$0x11]   ;;  %v6090_v22 = vcombine.low %v942_v36, %v8691_v31  ;;  %1806 = vmatprep.mubr.bf16.mxu0 %v8700_v7  ;;  %v1233_v53 = vrot.slane %v1231_v57, 1 }
  0x92   : > { %1807 = vmatmul.mubr.bf16.gmra.mxu0 %v8641_v26  ;;  %v1241_v24 = vshrl.u32 %v8674_v44, 16  ;;  %v1243_v17 = vshll.u32 %v8674_v44, 16  ;;  %v1248_v11 = vshll.u32 %v8553_v59, 16  ;;  %v1443_v23 = vrot.slane %v8704_v33, 1  ;;  %v899_v36 = vld [vmem:[#allocation2 + $0x9c] sm:$0xf] }
  0x93   : > { %v1238_v52 = vrot.slane %v1236_v56, 1  ;;  %v1442_v51 = vrot.slane %v6090_v22, 1  ;;  %v1234_v10 = vor.u32 %v1233_v53, %v1229_v43  ;;  %v1255_v32 = vshll.u32 %v8685_v40, 16 }
  0x94   : > { %v1245_v14 = vrot.slane %v1243_v17, 1  ;;  %v1250_v4 = vrot.slane %v1248_v11, 1  ;;  %v1118_v27 = vrot.slane %v1116_v58, 1  ;;  %v1253_v43 = vshrl.u32 %v8685_v40, 16  ;;  %v7799_v58 = vld [vmem:[%s10600_s1 + $0x1f8] sm:$0xff]  }
  0x95   : > { %v8715_v49 = vsel %vm1396_vm9, %v1442_v51, %v1443_v23  ;;  %v943_v57 = vld [vmem:[#allocation2 + $0xc0] sm:$0xe]  ;;  %v8718_v56 = vsel %vm1107_vm10, %v1234_v10, %v1238_v52  ;;  %v1114_v53 = vor.u32 %v1113_v12, %v1109_v34  ;;  %v1257_v17 = vrot.slane %v1255_v32, 1  ;;  %6855 = vmatprep.subr.bf16.mxu0 %v7799_v58  ;;  %v901_v32 = vld [vmem:[#allocation2 + $0xa8] sm:$0xf] }
  0x96   : > { %7443 = vmatprep.mubr.bf16.mxu1 %v8715_v49  ;;  %1814 = vmatprep.mubr.bf16.mxu0 %v8718_v56  ;;  %v1246_v59 = vor.u32 %v1245_v14, %v1241_v24  ;;  %v1260_v11 = vshll.u32 %v8575_v6, 16  ;;  %v8725_v51 = vcombine.low %v899_v36, %v8618_v28 }
  0x97   : > { %v906_v22 = vld [vmem:[#allocation2 + $0xc4] sm:$0xf]  ;;  %v8727_v23 = vld [vmem:[#allocation2 + $0xc8] ss:$0 sps:$4 sm:$0x11]   ;;  %v1119_v6 = vsel %vm1107_vm10, %v1114_v53, %v1118_v27  ;;  %v1258_v34 = vor.u32 %v1257_v17, %v1253_v43  ;;  %v1272_v53 = vshll.u32 %v8634_v42, 16 }
  0x98   : > { %v6091_v52 = vcombine.low %v943_v57, %v906_v22  ;;  %v8730_v10 = vsel %vm1107_vm10, %v1246_v59, %v1250_v4  ;;  %v1446_v14 = vrot.slane %v8727_v23, 1  ;;  %v1262_v12 = vrot.slane %v1260_v11, 1  ;;  %v7793_v43 = vld [vmem:[%s10600_s1 + $0x230] sm:$0xff]   ;;  %v905_v17 = vld [vmem:[#allocation2 + $0xc0] sm:$0xf] }
  0x99   : > { %v1267_v4 = vshll.u32 %v8725_v51, 16  ;;  %v1265_v36 = vshrl.u32 %v8725_v51, 16  ;;  %v8746_v57 = vcombine.low %v901_v32, %v8644_v16  ;;  %v1274_v58 = vrot.slane %v1272_v53, 1 }
  0x9a   : > { %v1445_v24 = vrot.slane %v6091_v52, 1  ;;  %1815 = vmatmul.mubr.bf16.gmra.mxu0 %v8671_v63  ;;  %v8749_v27 = vsel %vm1107_vm10, %v1258_v34, %v1262_v12  ;;  %v903_v52 = vld [vmem:[#allocation2 + $0xb4] sm:$0xf]  ;;  %v8764_v42 = vcombine.low %v905_v17, %v906_v22  ;;  %v1296_v12 = vshll.u32 %v8704_v33, 16  ;;  %v7801_v33 = vld [vmem:[%s10600_s1 + $0x218] sm:$0xff]  }
  0x9b   : > { %1822 = vmatprep.mubr.bf16.mxu0 %v8730_v10  ;;  %v1269_v59 = vrot.slane %v1267_v4, 1  ;;  %v1279_v16 = vshll.u32 %v8746_v57, 16 }
  0x9c   : > { %v8740_v28 = vsel %vm1396_vm9, %v1445_v24, %v1446_v14  ;;  %v8760_v24 = vcombine.low %v903_v52, %v8691_v31  ;;  %10651 = vst [vmem:[#allocation12_spill] sm:$0xff] %v8764_v42  ;;  %v7795_v14 = vld [vmem:[%s10600_s1 + $0x228] sm:$0xff]   ;;  %v1284_v31 = vshll.u32 %v8651_v13, 16  ;;  %v1303_v32 = vshll.u32 %v8764_v42, 16 }
  0x9d   : > { %7444 = vmatmul.mubr.bf16.gmra.mxu1 %v8740_v28  ;;  %v1270_v11 = vor.u32 %v1269_v59, %v1265_v36  ;;  %v1308_v59 = vshll.u32 %v8727_v23, 16  ;;  %v1301_v52 = vshrl.u32 %v8764_v42, 16  ;;  %v1298_v17 = vrot.slane %v1296_v12, 1  ;;  %v7802_v12 = vld [vmem:[%s10600_s1 + $0x1f0] sm:$0xff]  }
  0x9e   : > { %2208 = vmatprep.mubr.bf16.mxu1 %v1119_v6  ;;  %v1277_v6 = vshrl.u32 %v8746_v57, 16  ;;  %v1291_v22 = vshll.u32 %v8760_v24, 16  ;;  %v1289_v4 = vshrl.u32 %v8760_v24, 16  ;;  %v1286_v36 = vrot.slane %v1284_v31, 1 }
  0x9f   : > { %v8771_v34 = vsel %vm1107_vm10, %v1270_v11, %v1274_v58  ;;  %v1305_v11 = vrot.slane %v1303_v32, 1  ;;  %v1398_v58 = vrot.slane %v8668_v61, 1  ;;  %v7811_v61 = vld [vmem:[%s10600_s1 + $0x208] sm:$0xff]  }
  0xa0   : > { %v7804_v32 = vld [vmem:[%s10600_s1 + $0x1e8] sm:$0xff]  }
  0xa1   : > { %v1306_v31 = vor.u32 %v1305_v11, %v1301_v52  ;;  %v7812_v52 = vld [vmem:[%s10600_s1 + $0x1d0] sm:$0xff]   ;;  %v7817_v11 = vld [vmem:[%s10600_s1 + $0x1c0] sm:$0xff]  }
  0xa2   : > { %1823 = vmatmul.mubr.bf16.gmra.mxu0 %v8674_v44 }
  0xa3   : > { %1830 = vmatprep.mubr.bf16.mxu0 %v8749_v27 }
  0xa5   : > { %2209 = vmatmul.mubr.bf16.vlgmr.msra.gmra.mxu1 %v8657_v15  ;;  %v1281_v15 = vrot.slane %v1279_v16, 1  ;;  %v7806_v16 = vld [vmem:[%s10600_s1 + $0x210] sm:$0xff]  }
  0xa6   : > { %7496 = vmatpush3.bf16.msra.mxu1 %v8612_v0  ;;  %2216 = vmatprep.mubr.bf16.mxu1 %v8235_v38  ;;  %v7797_v0 = vld [vmem:[%s10600_s1 + $0x220] sm:$0xff]  }
  0xa7   : > { %7497 = vmatprep.subr.bf16.mxu1 %v7793_v43  ;;  %v927_v38 = vld [vmem:[#allocation2] sm:$0xe]  ;;  %v1282_v13 = vor.u32 %v1281_v15, %v1277_v6 }
  0xa8   : > { %v6075_v53 = vcombine.low %v927_v38, %v8638_v35  ;;  %v1310_v35 = vrot.slane %v1308_v59, 1  ;;  %v7816_v15 = vld [vmem:[%s10600_s1 + $0x200] sm:$0xff]   ;;  %v7809_v59 = vld [vmem:[%s10600_s1 + $0x1d8] sm:$0xff]  }
  0xa9   : > { %v8793_v23 = vsel %vm1107_vm10, %v1282_v13, %v1286_v36  ;;  %v7805_v13 = vld [vmem:[%s10600_s1 + $0x1a8] sm:$0xff]   ;;  %v7808_v36 = vld [vmem:[%s10600_s1 + $0x1a0] sm:$0xff]  }
  0xaa   : > { %7498 = vmatpush3.bf16.msra.mxu1 %v7793_v43  ;;  %1831 = vmatmul.mubr.bf16.gmra.mxu0 %v8685_v40  ;;  %v1293_v43 = vrot.slane %v1291_v22, 1  ;;  %v7800_v22 = vld [vmem:[%s10600_s1 + $0x1b8] sm:$0xff]  }
  0xab   : > { %1838 = vmatprep.mubr.bf16.mxu0 %v8771_v34  ;;  %7499 = vmatprep.subr.bf16.mxu1 %v7795_v14 }
  0xad   : > { %2217 = vmatmul.mubr.bf16.gmra.mxu1 %v8186_v54  ;;  %v1397_v54 = vrot.slane %v6075_v53, 1  ;;  %v7810_v53 = vld [vmem:[%s10600_s1 + $0x198] sm:$0xff]  }
  0xae   : > { %2224 = vmatprep.mubr.bf16.mxu1 %v8258_v3  ;;  %7500 = vmatpush3.bf16.msra.mxu1 %v7795_v14  ;;  %v1294_v14 = vor.u32 %v1293_v43, %v1289_v4  ;;  %v7803_v4 = vld [vmem:[%s10600_s1 + $0x1b0] sm:$0xff]   ;;  %v7814_v43 = vld [vmem:[%s10600_s1 + $0x1c8] sm:$0xff]  }
  0xaf   : > { %7501 = vmatprep.subr.bf16.mxu1 %v7797_v0  ;;  %v1399_v38 = vsel %vm1396_vm9, %v1397_v54, %v1398_v58  ;;  %v10652_v58 = vld [vmem:[#allocation6_spill] sm:$0xff]  ;;  %v10653_v54 = vld [vmem:[#allocation7_spill] sm:$0xff] }
  0xb0   : > { %v8806_v6 = vsel %vm1107_vm10, %v1294_v14, %v1298_v17  ;;  %v7815_v17 = vld [vmem:[%s10600_s1 + $0x188] sm:$0xff]  }
  0xb2   : > { %1839 = vmatmul.mubr.bf16.gmra.mxu0 %v8725_v51  ;;  %7502 = vmatpush3.bf16.msra.mxu1 %v7797_v0  ;;  %v8816_v0 = vsel %vm1107_vm10, %v1306_v31, %v1310_v35  ;;  %v7818_v35 = vld [vmem:[%s10600_s1 + $0x180] sm:$0xff]   ;;  %v10656_v31 = vld [vmem:[#allocation10_spill] sm:$0xff] }
  0xb3   : > { %1846 = vmatprep.mubr.bf16.mxu0 %v8793_v23  ;;  %7503 = vmatprep.subr.bf16.mxu1 %v7801_v33 }
  0xb5   : > { %2225 = vmatmul.mubr.bf16.gmra.mxu1 %v8198_v8 }
  0xb6   : > { %2232 = vmatprep.mubr.bf16.mxu1 %v8284_v41  ;;  %7504 = vmatpush3.bf16.msra.mxu1 %v7801_v33  ;;  %v7813_v33 = vld [vmem:[%s10600_s1 + $0x190] sm:$0xff]  }
  0xb7   : > { %7505 = vmatprep.subr.bf16.mxu1 %v7806_v16 }
  0xba   : > { %1847 = vmatmul.mubr.bf16.gmra.mxu0 %v8746_v57  ;;  %7506 = vmatpush3.bf16.msra.mxu1 %v7806_v16  ;;  %v10654_v16 = vld [vmem:[#allocation8_spill] sm:$0xff] }
  0xbb   : > { %1854 = vmatprep.mubr.bf16.mxu0 %v8806_v6  ;;  %7507 = vmatprep.subr.bf16.mxu1 %v7811_v61 }
  0xbd   : > { %2233 = vmatmul.mubr.bf16.gmra.mxu1 %v8239_v45 }
  0xbe   : > { %2240 = vmatprep.mubr.bf16.mxu1 %v8327_v39  ;;  %7508 = vmatpush3.bf16.msra.mxu1 %v7811_v61  ;;  %v10655_v61 = vld [vmem:[#allocation9_spill] sm:$0xff] }
  0xbf   : > { %7509 = vmatprep.subr.bf16.mxu1 %v7816_v15 }
  0xc2   : > { %1855 = vmatmul.mubr.bf16.gmra.mxu0 %v8760_v24  ;;  %7510 = vmatpush3.bf16.msra.mxu1 %v7816_v15 }
  0xc3   : > { %1862 = vmatprep.mubr.bf16.mxu0 %v8816_v0 }
  0xc5   : > { %2241 = vmatmul.mubr.bf16.gmra.mxu1 %v8288_v47 }
  0xc6   : > { %2248 = vmatprep.mubr.bf16.mxu1 %v8395_v5 }
  0xca   : > { %1863 = vmatmul.mubr.bf16.gmra.mxu0 %v8764_v42 }
  0xcb   : > { %7463 = vmatprep.mubr.bf16.mxu0 %v1399_v38 }
  0xcd   : > { %2249 = vmatmul.mubr.bf16.gmra.mxu1 %v8338_v55 }
  0xce   : > { %2256 = vmatprep.mubr.bf16.mxu1 %v8475_v46 }
  0xd2   : > { %7464 = vmatmul.mubr.bf16.vlgmr.msra.gmra.mxu0 %v8205_v18  ;;  %v7807_v18 = vld [vmem:[%s10600_s1 + $0x1e0] sm:$0xff]  }
  0xd3   : > { %6856 = vmatpush3.bf16.msra.mxu0 %v7800_v22  ;;  %7467 = vmatprep.mubr.bf16.mxu0 %v8222_v30 }
  0xd4   : > { %6857 = vmatprep.subr.bf16.mxu0 %v7802_v12 }
  0xd5   : > { %2257 = vmatmul.mubr.bf16.gmra.mxu1 %v8413_v21 }
  0xd6   : > { %2264 = vmatprep.mubr.bf16.mxu1 %v8550_v1 }
  0xd7   : > { %6858 = vmatpush3.bf16.msra.mxu0 %v7803_v4 }
  0xd8   : > { %6859 = vmatprep.subr.bf16.mxu0 %v7804_v32 }
  0xda   : > { %7468 = vmatmul.mubr.bf16.gmra.mxu0 %v8275_v25 }
  0xdb   : > { %7471 = vmatprep.mubr.bf16.mxu0 %v8308_v9  ;;  %6860 = vmatpush3.bf16.msra.mxu0 %v7805_v13 }
  0xdc   : > { %6861 = vmatprep.subr.bf16.mxu0 %v7807_v18 }
  0xdd   : > { %2265 = vmatmul.mubr.bf16.gmra.mxu1 %v8488_v20 }
  0xde   : > { %2272 = vmatprep.mubr.bf16.mxu1 %v8624_v19 }
  0xdf   : > { %6862 = vmatpush3.bf16.msra.mxu0 %v7808_v36 }
  0xe0   : > { %6863 = vmatprep.subr.bf16.mxu0 %v7809_v59  ;;  %v10657_v59 = vld [vmem:[#allocation11_spill] sm:$0xff] }
  0xe2   : > { %7472 = vmatmul.mubr.bf16.gmra.mxu0 %v8346_v62 }
  0xe3   : > { %7475 = vmatprep.mubr.bf16.mxu0 %v8374_v29  ;;  %6864 = vmatpush3.bf16.msra.mxu0 %v7810_v53 }
  0xe4   : > { %6865 = vmatprep.subr.bf16.mxu0 %v7812_v52 }
  0xe5   : > { %2273 = vmatmul.mubr.bf16.gmra.mxu1 %v8564_v37 }
  0xe6   : > { %2280 = vmatprep.mubr.bf16.mxu1 %v8700_v7 }
  0xe7   : > { %6866 = vmatpush3.bf16.msra.mxu0 %v7813_v33 }
  0xe8   : > { %6867 = vmatprep.subr.bf16.mxu0 %v7814_v43 }
  0xea   : > { %7476 = vmatmul.mubr.bf16.gmra.mxu0 %v8426_v48 }
  0xeb   : > { %7479 = vmatprep.mubr.bf16.mxu0 %v10652_v58  ;;  %6868 = vmatpush3.bf16.msra.mxu0 %v7815_v17 }
  0xec   : > { %6869 = vmatprep.subr.bf16.mxu0 %v7817_v11 }
  0xed   : > { %2281 = vmatmul.mubr.bf16.gmra.mxu1 %v8641_v26 }
  0xee   : > { %2288 = vmatprep.mubr.bf16.mxu1 %v8718_v56 }
  0xef   : > { %6870 = vmatpush3.bf16.msra.mxu0 %v7818_v35 }
  0xf2   : > { %7480 = vmatmul.mubr.bf16.gmra.mxu0 %v10653_v54 }
  0xf3   : > { %7483 = vmatprep.mubr.bf16.mxu0 %v10654_v16  ;;  %v7417_v14 = vpop.f32.mrf.mxu1 }
  0xf4   : > { %v6599_v15 = vpop.f32.mrf.mxu0 }
  0xf5   : > { %2289 = vmatmul.mubr.bf16.gmra.mxu1 %v8671_v63  ;;  %v1905_v22 = vpop.f32.mrf.mxu1 }
  0xf6   : > { %2296 = vmatprep.mubr.bf16.mxu1 %v8730_v10  ;;  %v6600_v38 = vpop.f32.mrf.mxu0 }
  0xf7   : > { %v6601_v12 = vadd.f32 %v6600_v38, %v6599_v15  ;;  %v7418_v13 = vpop.f32.mrf.mxu1 }
  0xf8   : > { %v6602_v4 = vpop.f32.mrf.mxu0 }
  0xf9   : > { %v8895_v32 = vadd.f32 %v6601_v12, %v1905_v22  ;;  %v8901_v52 = vpop.f32.mrf.mxu1 }
  0xfa   : > { %7484 = vmatmul.mubr.bf16.gmra.mxu0 %v10655_v61  ;;  %v6603_v18 = vpop.f32.mrf.mxu0 }
  0xfb   : > { %7487 = vmatprep.mubr.bf16.mxu0 %v10656_v31  ;;  %v8897_v36 = vadd.f32 %v6603_v18, %v6602_v4 }
  0xfc   : > { %v6605_v53 = vpop.f32.mrf.mxu0 }
  0xfd   : > { %2297 = vmatmul.mubr.bf16.gmra.mxu1 %v8674_v44 }
  0xfe   : > { %2304 = vmatprep.mubr.bf16.mxu1 %v8749_v27  ;;  %v6606_v33 = vpop.f32.mrf.mxu0 }
  0xff   : > { %v6607_v43 = vadd.f32 %v6606_v33, %v6605_v53 }
 0x100   : > { %v6608_v17 = vpop.f32.mrf.mxu0 }
 0x101   : > { %v8905_v11 = vadd.f32 %v7417_v14, %v6607_v43 }
 0x102   : > { %7488 = vmatmul.mubr.bf16.gmra.mxu0 %v10657_v59  ;;  %v6609_v15 = vpop.f32.mrf.mxu0 }
 0x103   : > { %7491 = vmatprep.mubr.bf16.mxu0 %v8677_v2  ;;  %v7421_v35 = vpop.f32.mrf.mxu1  ;;  %v6610_v38 = vadd.f32 %v6609_v15, %v6608_v17 }
 0x104   : > { %v6611_v12 = vpop.f32.mrf.mxu0 }
 0x105   : > { %2305 = vmatmul.mubr.bf16.gmra.mxu1 %v8685_v40  ;;  %v1921_v22 = vpop.f32.mrf.mxu1  ;;  %v8909_v4 = vadd.f32 %v7418_v13, %v6610_v38 }
 0x106   : > { %2312 = vmatprep.mubr.bf16.mxu1 %v8771_v34  ;;  %v6612_v18 = vpop.f32.mrf.mxu0 }
 0x107   : > { %v7422_v53 = vpop.f32.mrf.mxu1  ;;  %v6613_v33 = vadd.f32 %v6612_v18, %v6611_v12 }
 0x108   : > { %v6614_v14 = vpop.f32.mrf.mxu0 }
 0x109   : > { %v8913_v43 = vadd.f32 %v6613_v33, %v1921_v22  ;;  %v1924_v17 = vpop.f32.mrf.mxu1 }
 0x10a   : > { %7492 = vmatmul.mubr.bf16.gmra.mxu0 %v8715_v49  ;;  %v6615_v50 = vpop.f32.mrf.mxu0 }
 0x10b   : > { %2723 = vmatprep.mubr.bf16.mxu0 %v8258_v3  ;;  %v6616_v15 = vadd.f32 %v6615_v50, %v6614_v14 }
 0x10c   : > { %v6617_v60 = vpop.f32.mrf.mxu0 }
 0x10d   : > { %2313 = vmatmul.mubr.bf16.gmra.mxu1 %v8725_v51  ;;  %v8917_v3 = vadd.f32 %v6616_v15, %v1924_v17 }
 0x10e   : > { %2320 = vmatprep.mubr.bf16.mxu1 %v8793_v23  ;;  %v6618_v13 = vpop.f32.mrf.mxu0 }
 0x10f   : > { %v6619_v12 = vadd.f32 %v6618_v13, %v6617_v60 }
 0x110   : > { %v7425_v38 = vpop.f32.mrf.mxu1  ;;  %v6620_v18 = vpop.f32.mrf.mxu0 }
 0x111   : > { %v8921_v33 = vadd.f32 %v7421_v35, %v6619_v12 }
 0x112   : > { %2724 = vmatmul.mubr.bf16.vlgmr.msra.gmra.mxu0 %v8198_v8  ;;  %v1937_v22 = vpop.f32.mrf.mxu1  ;;  %v6621_v42 = vpop.f32.mrf.mxu0 }
 0x113   : > { %2731 = vmatprep.mubr.bf16.mxu0 %v8284_v41  ;;  %v6622_v50 = vadd.f32 %v6621_v42, %v6620_v18 }
 0x114   : > { %v7426_v41 = vpop.f32.mrf.mxu1 }
 0x115   : > { %2321 = vmatmul.mubr.bf16.gmra.mxu1 %v8746_v57  ;;  %v8925_v14 = vadd.f32 %v7422_v53, %v6622_v50 }
 0x116   : > { %2328 = vmatprep.mubr.bf16.mxu1 %v8806_v6  ;;  %v6623_v8 = vpop.f32.mrf.mxu0  ;;  %v1940_v13 = vpop.f32.mrf.mxu1 }
 0x118   : > { %v6624_v17 = vpop.f32.mrf.mxu0 }
 0x119   : > { %v6625_v60 = vadd.f32 %v6624_v17, %v6623_v8 }
 0x11a   : > { %2732 = vmatmul.mubr.bf16.gmra.mxu0 %v8239_v45  ;;  %v6626_v15 = vpop.f32.mrf.mxu0 }
 0x11b   : > { %2739 = vmatprep.mubr.bf16.mxu0 %v8327_v39  ;;  %v8929_v35 = vadd.f32 %v6625_v60, %v1937_v22 }
 0x11c   : > { %v6627_v12 = vpop.f32.mrf.mxu0 }
 0x11d   : > { %2329 = vmatmul.mubr.bf16.gmra.mxu1 %v8760_v24  ;;  %v6628_v42 = vadd.f32 %v6627_v12, %v6626_v15 }
 0x11e   : > { %7511 = vmatprep.mubr.bf16.mxu1 %v8222_v30 }
 0x11f   : > { %v8933_v39 = vadd.f32 %v6628_v42, %v1940_v13 }
 0x120   : > { %v7429_v45 = vpop.f32.mrf.mxu1 }
 0x122   : > { %2740 = vmatmul.mubr.bf16.gmra.mxu0 %v8288_v47  ;;  %v1953_v53 = vpop.f32.mrf.mxu1 }
 0x123   : > { %2747 = vmatprep.mubr.bf16.mxu0 %v8395_v5 }
 0x124   : > { %v6629_v18 = vpop.f32.mrf.mxu0  ;;  %v7430_v30 = vpop.f32.mrf.mxu1 }
 0x125   : > { %7512 = vmatmul.mubr.bf16.vlgmr.msra.gmra.mxu1 %v8275_v25 }
 0x126   : > { %7515 = vmatprep.mubr.bf16.mxu1 %v8308_v9  ;;  %v6630_v50 = vpop.f32.mrf.mxu0  ;;  %v1956_v5 = vpop.f32.mrf.mxu1 }
 0x127   : > { %v6631_v22 = vadd.f32 %v6630_v50, %v6629_v18 }
 0x128   : > { %v6632_v8 = vpop.f32.mrf.mxu0 }
 0x129   : > { %v8939_v47 = vadd.f32 %v7425_v38, %v6631_v22  ;;  %v944_v22 = vld [vmem:[#allocation2 + $0xcc] sm:$0xe] }
 0x12a   : > { %2748 = vmatmul.mubr.bf16.gmra.mxu0 %v8338_v55  ;;  %v6633_v17 = vpop.f32.mrf.mxu0 }
 0x12b   : > { %2755 = vmatprep.mubr.bf16.mxu0 %v8475_v46  ;;  %v6634_v25 = vadd.f32 %v6633_v17, %v6632_v8 }
 0x12d   : > { %7516 = vmatmul.mubr.bf16.gmra.mxu1 %v8346_v62  ;;  %v8943_v60 = vadd.f32 %v7426_v41, %v6634_v25 }
 0x12e   : > { %7519 = vmatprep.mubr.bf16.mxu1 %v8374_v29 }
 0x12f   : > { %v8945_v9 = vpop.f32.mrf.mxu1 }
 0x131   : > { %v1969_v55 = vpop.f32.mrf.mxu1 }
 0x132   : > { %2756 = vmatmul.mubr.bf16.gmra.mxu0 %v8413_v21 }
 0x133   : > { %2763 = vmatprep.mubr.bf16.mxu0 %v8550_v1  ;;  %v6635_v46 = vpop.f32.mrf.mxu0  ;;  %v8951_v62 = vpop.f32.mrf.mxu1 }
 0x135   : > { %7520 = vmatmul.mubr.bf16.gmra.mxu1 %v8426_v48  ;;  %v6636_v38 = vpop.f32.mrf.mxu0  ;;  %v8957_v21 = vpop.f32.mrf.mxu1 }
 0x136   : > { %7523 = vmatprep.mubr.bf16.mxu1 %v10652_v58  ;;  %v6637_v15 = vadd.f32 %v6636_v38, %v6635_v46 }
 0x137   : > { %v6638_v29 = vpop.f32.mrf.mxu0 }
 0x138   : > { %v8955_v41 = vadd.f32 %v6637_v15, %v1953_v53 }
 0x139   : > { %v6639_v1 = vpop.f32.mrf.mxu0 }
 0x13a   : > { %2764 = vmatmul.mubr.bf16.gmra.mxu0 %v8488_v20  ;;  %v6640_v48 = vadd.f32 %v6639_v1, %v6638_v29 }
 0x13b   : > { %2771 = vmatprep.mubr.bf16.mxu0 %v8624_v19 }
 0x13c   : > { %v8961_v58 = vadd.f32 %v6640_v48, %v1956_v5  ;;  %v7824_v5 = vld [vmem:[%s10601_s2 + $0x178] sm:$0xff]   ;;  %v7825_v48 = vld [vmem:[%s10601_s2 + $0x130] sm:$0xff]  }
 0x13d   : > { %7524 = vmatmul.mubr.bf16.gmra.mxu1 %v10653_v54  ;;  %7543 = vmatprep.subr.bf16.mxu0 %v7824_v5 }
 0x13e   : > { %7527 = vmatprep.mubr.bf16.mxu1 %v10654_v16  ;;  %v8963_v13 = vpop.f32.mrf.mxu1  ;;  %7544 = vmatpush3.bf16.msra.mxu0 %v7824_v5 }
 0x140   : > { %v8965_v12 = vpop.f32.mrf.mxu1 }
 0x142   : > { %2772 = vmatmul.mubr.bf16.gmra.mxu0 %v8564_v37  ;;  %v8969_v20 = vpop.f32.mrf.mxu1 }
 0x143   : > { %2779 = vmatprep.mubr.bf16.mxu0 %v8700_v7  ;;  %v6641_v19 = vpop.f32.mrf.mxu0 }
 0x144   : > { %v8973_v16 = vpop.f32.mrf.mxu1 }
 0x145   : > { %7528 = vmatmul.mubr.bf16.gmra.mxu1 %v10655_v61  ;;  %v6642_v54 = vpop.f32.mrf.mxu0 }
 0x146   : > { %7531 = vmatprep.mubr.bf16.mxu1 %v10656_v31  ;;  %v6643_v42 = vadd.f32 %v6642_v54, %v6641_v19  ;;  %v8985_v31 = vld [vmem:[#allocation2 + $0xd0] sm:$0xf] }
 0x147   : > { %v6644_v53 = vpop.f32.mrf.mxu0 }
 0x148   : > { %v8976_v18 = vadd.f32 %v7429_v45, %v6643_v42 }
 0x149   : > { %v6645_v50 = vpop.f32.mrf.mxu0 }
 0x14a   : > { %2780 = vmatmul.mubr.bf16.gmra.mxu0 %v8641_v26  ;;  %v6646_v37 = vadd.f32 %v6645_v50, %v6644_v53  ;;  %v7822_v26 = vld [vmem:[%s10601_s2 + $0x138] sm:$0xff]  }
 0x14b   : > { %2787 = vmatprep.mubr.bf16.mxu0 %v8718_v56  ;;  %v7823_v56 = vld [vmem:[%s10601_s2 + $0xf8] sm:$0xff]   ;;  %6991 = vmatprep.subr.bf16.mxu1 %v7822_v26 }
 0x14c   : > { %v8979_v7 = vpop.f32.mrf.mxu1  ;;  %v8982_v61 = vadd.f32 %v7430_v30, %v6646_v37  ;;  %6992 = vmatpush3.bf16.msra.mxu1 %v7823_v56 }
 0x14d   : > { %7532 = vmatmul.mubr.bf16.gmra.mxu1 %v10657_v59  ;;  %v8996_v59 = vld [vmem:[#allocation2 + $0xd4] ss:$0 sps:$4 sm:$0x11]   ;;  %6993 = vmatprep.subr.bf16.mxu1 %v7825_v48 }
 0x14e   : > { %7535 = vmatprep.mubr.bf16.mxu1 %v8677_v2  ;;  %v8987_v8 = vpop.f32.mrf.mxu1  ;;  %v6092_v2 = vcombine.low %v944_v22, %v8985_v31  ;;  %v1449_v38 = vrot.slane %v8996_v59, 1 }
 0x150   : > { %v9003_v17 = vpop.f32.mrf.mxu1 }
 0x152   : > { %v6647_v45 = vpop.f32.mrf.mxu0  ;;  %2788 = vmatmul.mubr.bf16.gmra.mxu0 %v8671_v63  ;;  %v1448_v63 = vrot.slane %v6092_v2, 1  ;;  %v9010_v29 = vpop.f32.mrf.mxu1 }
 0x153   : > { %2795 = vmatprep.mubr.bf16.mxu0 %v8730_v10 }
 0x154   : > { %v6648_v30 = vpop.f32.mrf.mxu0 }
 0x155   : > { %v6649_v25 = vadd.f32 %v6648_v30, %v6647_v45  ;;  %7536 = vmatmul.mubr.bf16.gmra.mxu1 %v8715_v49  ;;  %v7826_v49 = vld [vmem:[%s10601_s2 + $0xf0] sm:$0xff]   ;;  %v7828_v30 = vld [vmem:[%s10601_s2 + $0xe8] sm:$0xff]  }
 0x156   : > { %v6650_v46 = vpop.f32.mrf.mxu0  ;;  %7539 = vmatprep.mubr.bf16.mxu1 %v8740_v28  ;;  %6994 = vmatpush3.bf16.msra.mxu1 %v7826_v49 }
 0x157   : > { %v9008_v10 = vadd.f32 %v6649_v25, %v1969_v55  ;;  %v1450_v55 = vsel %vm1396_vm9, %v1448_v63, %v1449_v38  ;;  %v7829_v38 = vld [vmem:[%s10601_s2 + $0x170] sm:$0xff]  }
 0x158   : > { %v6651_v15 = vpop.f32.mrf.mxu0  ;;  %7545 = vmatprep.subr.bf16.mxu0 %v7829_v38 }
 0x159   : > { %v9012_v1 = vadd.f32 %v6651_v15, %v6650_v46  ;;  %7546 = vmatpush3.bf16.msra.mxu0 %v7829_v38 }
 0x15a   : > { %v6653_v28 = vpop.f32.mrf.mxu0  ;;  %2796 = vmatmul.mubr.bf16.gmra.mxu0 %v8674_v44 }
 0x15b   : > { %2803 = vmatprep.mubr.bf16.mxu0 %v8749_v27 }
 0x15c   : > { %v6654_v19 = vpop.f32.mrf.mxu0 }
 0x15d   : > { %v9023_v54 = vpop.f32.mrf.mxu1  ;;  %v6655_v42 = vadd.f32 %v6654_v19, %v6653_v28  ;;  %7540 = vmatmul.mubr.bf16.gmra.mxu1 %v1450_v55 }
 0x15e   : > { %v6656_v53 = vpop.f32.mrf.mxu0 }
 0x15f   : > { %v9025_v50 = vpop.f32.mrf.mxu1  ;;  %v9028_v37 = vadd.f32 %v8945_v9, %v6655_v42  ;;  %v7827_v9 = vld [vmem:[%s10601_s2 + $0x128] sm:$0xff]  }
 0x160   : > { %v6657_v22 = vpop.f32.mrf.mxu0  ;;  %6995 = vmatprep.subr.bf16.mxu1 %v7827_v9 }
 0x161   : > { %v9030_v26 = vpop.f32.mrf.mxu1  ;;  %v6658_v44 = vadd.f32 %v6657_v22, %v6656_v53  ;;  %6996 = vmatpush3.bf16.msra.mxu1 %v7828_v30 }
 0x162   : > { %v6659_v56 = vpop.f32.mrf.mxu0  ;;  %2804 = vmatmul.mubr.bf16.gmra.mxu0 %v8685_v40 }
 0x163   : > { %v9033_v27 = vpop.f32.mrf.mxu1  ;;  %v9036_v45 = vadd.f32 %v8951_v62, %v6658_v44  ;;  %2811 = vmatprep.mubr.bf16.mxu0 %v8771_v34  ;;  %v907_v44 = vld [vmem:[#allocation2 + $0xcc] sm:$0xf] }
 0x164   : > { %v6660_v2 = vpop.f32.mrf.mxu0 }
 0x165   : > { %v6735_v5 = vpop.f32.mrf.mxu1  ;;  %v6661_v25 = vadd.f32 %v6660_v2, %v6659_v56 }
 0x166   : > { %v6662_v46 = vpop.f32.mrf.mxu0 }
 0x167   : > { %v6736_v40 = vpop.f32.mrf.mxu1  ;;  %v9046_v63 = vadd.f32 %v6661_v25, %v8965_v12  ;;  %v1909_v12 = vadd.f32 %v8897_v36, %v8901_v52 }
 0x168   : > { %v6737_v62 = vadd.f32 %v6736_v40, %v6735_v5  ;;  %v6663_v34 = vpop.f32.mrf.mxu0 }
 0x169   : > { %v6738_v15 = vpop.f32.mrf.mxu1  ;;  %v9051_v48 = vadd.f32 %v6663_v34, %v6662_v46 }
 0x16a   : > { %v6665_v49 = vpop.f32.mrf.mxu0  ;;  %2812 = vmatmul.mubr.bf16.gmra.mxu0 %v8725_v51  ;;  %v9055_v28 = vadd.f32 %v6737_v62, %v8895_v32 }
 0x16b   : > { %v6739_v55 = vpop.f32.mrf.mxu1  ;;  %2819 = vmatprep.mubr.bf16.mxu0 %v8793_v23  ;;  %v9066_v23 = vcombine.low %v907_v44, %v8985_v31  ;;  %v7834_v44 = vld [vmem:[%s10601_s2 + $0x168] sm:$0xff]  }
 0x16c   : > { %v6740_v19 = vadd.f32 %v6739_v55, %v6738_v15  ;;  %v6666_v42 = vpop.f32.mrf.mxu0  ;;  %7547 = vmatprep.subr.bf16.mxu0 %v7834_v44 }
 0x16d   : > { %v6741_v53 = vpop.f32.mrf.mxu1  ;;  %v6667_v22 = vadd.f32 %v6666_v42, %v6665_v49  ;;  %v1315_v34 = vshll.u32 %v9066_v23, 16  ;;  %7548 = vmatpush3.bf16.msra.mxu0 %v7834_v44 }
 0x16e   : > { %v6668_v56 = vpop.f32.mrf.mxu0  ;;  %v9060_v2 = vadd.f32 %v6740_v19, %v1909_v12  ;;  %v1320_v19 = vshll.u32 %v8996_v59, 16 }
 0x16f   : > { %v6742_v51 = vpop.f32.mrf.mxu1  ;;  %v9063_v32 = vadd.f32 %v8963_v13, %v6667_v22  ;;  %v1317_v12 = vrot.slane %v1315_v34, 1 }
 0x170   : > { %v6743_v9 = vadd.f32 %v6742_v51, %v6741_v53  ;;  %v6669_v30 = vpop.f32.mrf.mxu0  ;;  %v7830_v53 = vld [vmem:[%s10601_s2 + $0x120] sm:$0xff]  }
 0x171   : > { %v6744_v5 = vpop.f32.mrf.mxu1  ;;  %v6670_v25 = vadd.f32 %v6669_v30, %v6668_v56  ;;  %6997 = vmatprep.subr.bf16.mxu1 %v7830_v53  ;;  %v1322_v30 = vrot.slane %v1320_v19, 1  ;;  %v7836_v19 = vld [vmem:[%s10601_s2 + $0xd0] sm:$0xff]  }
 0x172   : > { %v6671_v36 = vpop.f32.mrf.mxu0  ;;  %2820 = vmatmul.mubr.bf16.gmra.mxu0 %v8746_v57  ;;  %v9070_v52 = vadd.f32 %v6743_v9, %v8905_v11 }
 0x173   : > { %v6745_v46 = vpop.f32.mrf.mxu1  ;;  %v9073_v40 = vadd.f32 %v8969_v20, %v6670_v25  ;;  %2827 = vmatprep.mubr.bf16.mxu0 %v8806_v6  ;;  %v1313_v6 = vshrl.u32 %v9066_v23, 16 }
 0x174   : > { %v6746_v13 = vadd.f32 %v6745_v46, %v6744_v5  ;;  %v6672_v62 = vpop.f32.mrf.mxu0  ;;  %v7837_v46 = vld [vmem:[%s10601_s2 + $0x160] sm:$0xff]  }
 0x175   : > { %v6747_v31 = vpop.f32.mrf.mxu1  ;;  %v6673_v38 = vadd.f32 %v6672_v62, %v6671_v36  ;;  %v1318_v9 = vor.u32 %v1317_v12, %v1313_v6  ;;  %7549 = vmatprep.subr.bf16.mxu0 %v7837_v46  ;;  %v10658_v6 = vld [vmem:[#allocation12_spill] sm:$0xff] }
 0x176   : > { %v9077_v15 = vpop.f32.mrf.mxu0  ;;  %v9080_v49 = vadd.f32 %v6746_v13, %v8909_v4  ;;  %v7831_v4 = vld [vmem:[%s10601_s2 + $0xe0] sm:$0xff]   ;;  %7550 = vmatpush3.bf16.msra.mxu0 %v7837_v46  ;;  %v7844_v46 = vld [vmem:[%s10601_s2 + $0x148] sm:$0xff]  }
 0x177   : > { %v6748_v57 = vpop.f32.mrf.mxu1  ;;  %v9083_v11 = vadd.f32 %v6673_v38, %v8987_v8  ;;  %6998 = vmatpush3.bf16.msra.mxu1 %v7831_v4  ;;  %v1323_v38 = vsel %vm1107_vm10, %v1318_v9, %v1322_v30  ;;  %v7841_v9 = vld [vmem:[%s10601_s2 + $0x150] sm:$0xff]  }
 0x178   : > { %v6749_v55 = vadd.f32 %v6748_v57, %v6747_v31  ;;  %v9085_v20 = vpop.f32.mrf.mxu0 }
 0x179   : > { %v6750_v42 = vpop.f32.mrf.mxu1 }
 0x17a   : > { %v6677_v22 = vpop.f32.mrf.mxu0  ;;  %2828 = vmatmul.mubr.bf16.gmra.mxu0 %v8760_v24  ;;  %v9097_v8 = vadd.f32 %v6749_v55, %v8913_v43  ;;  %v7832_v24 = vld [vmem:[%s10601_s2 + $0x118] sm:$0xff]  }
 0x17b   : > { %v6751_v59 = vpop.f32.mrf.mxu1  ;;  %2835 = vmatprep.mubr.bf16.mxu0 %v8816_v0  ;;  %v7833_v0 = vld [vmem:[%s10601_s2 + $0xd8] sm:$0xff]   ;;  %6999 = vmatprep.subr.bf16.mxu1 %v7832_v24 }
 0x17c   : > { %v6752_v56 = vadd.f32 %v6751_v59, %v6750_v42  ;;  %v6678_v51 = vpop.f32.mrf.mxu0  ;;  %7000 = vmatpush3.bf16.msra.mxu1 %v7833_v0  ;;  %v7840_v42 = vld [vmem:[%s10601_s2 + $0x158] sm:$0xff]  }
 0x17d   : > { %v6753_v5 = vpop.f32.mrf.mxu1  ;;  %v6679_v25 = vadd.f32 %v6678_v51, %v6677_v22  ;;  %7551 = vmatprep.subr.bf16.mxu0 %v7840_v42 }
 0x17e   : > { %v6680_v43 = vpop.f32.mrf.mxu0  ;;  %v9107_v36 = vadd.f32 %v6752_v56, %v8917_v3  ;;  %7552 = vmatpush3.bf16.msra.mxu0 %v7840_v42 }
 0x17f   : > { %v6754_v13 = vpop.f32.mrf.mxu1  ;;  %v9116_v62 = vadd.f32 %v8979_v7, %v6679_v25  ;;  %v7835_v7 = vld [vmem:[%s10601_s2 + $0x110] sm:$0xff]   ;;  %7553 = vmatprep.subr.bf16.mxu0 %v7841_v9 }
 0x180   : > { %v6755_v34 = vadd.f32 %v6754_v13, %v6753_v5  ;;  %v6681_v31 = vpop.f32.mrf.mxu0  ;;  %7001 = vmatprep.subr.bf16.mxu1 %v7835_v7  ;;  %v7838_v5 = vld [vmem:[%s10601_s2 + $0x108] sm:$0xff]  }
 0x181   : > { %v6756_v3 = vpop.f32.mrf.mxu1  ;;  %v6682_v57 = vadd.f32 %v6681_v31, %v6680_v43  ;;  %7002 = vmatpush3.bf16.msra.mxu1 %v7836_v19  ;;  %v7848_v19 = vld [vmem:[%s10601_s2 + $0x140] sm:$0xff]  }
 0x182   : > { %v6683_v55 = vpop.f32.mrf.mxu0  ;;  %2836 = vmatmul.mubr.bf16.gmra.mxu0 %v10658_v6  ;;  %v9121_v12 = vadd.f32 %v6755_v34, %v8921_v33  ;;  %7003 = vmatprep.subr.bf16.mxu1 %v7838_v5  ;;  %v7842_v34 = vld [vmem:[%s10601_s2 + $0x100] sm:$0xff]  }
 0x183   : > { %v6757_v53 = vpop.f32.mrf.mxu1  ;;  %v9133_v4 = vadd.f32 %v9003_v17, %v6682_v57  ;;  %2843 = vmatprep.mubr.bf16.mxu0 %v1323_v38  ;;  %7554 = vmatpush3.bf16.msra.mxu0 %v7841_v9 }
 0x184   : > { %v6758_v22 = vadd.f32 %v6757_v53, %v6756_v3  ;;  %v6684_v33 = vpop.f32.mrf.mxu0  ;;  %v7843_v3 = vld [vmem:[%s10601_s2 + $0xc0] sm:$0xff]   ;;  %7555 = vmatprep.subr.bf16.mxu0 %v7844_v46 }
 0x185   : > { %v6759_v44 = vpop.f32.mrf.mxu1  ;;  %v6685_v59 = vadd.f32 %v6684_v33, %v6683_v55 }
 0x186   : > { %v9135_v56 = vpop.f32.mrf.mxu0  ;;  %v9138_v51 = vadd.f32 %v6758_v22, %v8925_v14  ;;  %v7839_v14 = vld [vmem:[%s10601_s2 + $0xc8] sm:$0xff]  }
 0x187   : > { %v6760_v17 = vpop.f32.mrf.mxu1  ;;  %v9144_v30 = vadd.f32 %v6685_v59, %v9025_v50  ;;  %7004 = vmatpush3.bf16.msra.mxu1 %v7839_v14  ;;  %7556 = vmatpush3.bf16.msra.mxu0 %v7844_v46 }
 0x188   : > { %v6761_v25 = vadd.f32 %v6760_v17, %v6759_v44  ;;  %v9149_v24 = vpop.f32.mrf.mxu0  ;;  %7005 = vmatprep.subr.bf16.mxu1 %v7842_v34  ;;  %7557 = vmatprep.subr.bf16.mxu0 %v7848_v19 }
 0x189   : > { %v6762_v43 = vpop.f32.mrf.mxu1 }
 0x18a   : > { %v6689_v0 = vpop.f32.mrf.mxu0  ;;  %2844 = vmatmul.mubr.bf16.gmra.mxu0 %v9066_v23  ;;  %v9156_v50 = vadd.f32 %v6761_v25, %v8929_v35 }
 0x18b   : > { %v6763_v13 = vpop.f32.mrf.mxu1  ;;  %7006 = vmatpush3.bf16.msra.mxu1 %v7843_v3  ;;  %7558 = vmatpush3.bf16.msra.mxu0 %v7848_v19 }
 0x18c   : > { %v6764_v31 = vadd.f32 %v6763_v13, %v6762_v43  ;;  %v6690_v38 = vpop.f32.mrf.mxu0  ;;  %v9189_v43 = vld [vmem:[%s10601_s2 + $0xb8] sm:$0xff]  }
 0x18d   : > { %v6765_v23 = vpop.f32.mrf.mxu1  ;;  %v6691_v35 = vadd.f32 %v6690_v38, %v6689_v0  ;;  %7591 = vmatprep.subr.bf16.mxu1 %v9189_v43 }
 0x18e   : > { %v6692_v57 = vpop.f32.mrf.mxu0  ;;  %v9168_v55 = vadd.f32 %v6764_v31, %v8933_v39 }
 0x18f   : > { %v6766_v6 = vpop.f32.mrf.mxu1  ;;  %v9171_v7 = vadd.f32 %v9023_v54, %v6691_v35 }
 0x190   : > { %v6767_v42 = vadd.f32 %v6766_v6, %v6765_v23  ;;  %v6693_v53 = vpop.f32.mrf.mxu0 }
 0x191   : > { %v6768_v22 = vpop.f32.mrf.mxu1  ;;  %v6694_v33 = vadd.f32 %v6693_v53, %v6692_v57 }
 0x192   : > { %v7465_v44 = vpop.f32.mrf.mxu0  ;;  %v2251_v59 = vadd.f32 %v6767_v42, %v8939_v47 }
 0x193   : > { %v6769_v39 = vpop.f32.mrf.mxu1  ;;  %v9178_v9 = vadd.f32 %v9030_v26, %v6694_v33  ;;  %v9181_v54 = vadd.f32 %v7465_v44, %v9070_v52 }
 0x194   : > { %v6770_v17 = vadd.f32 %v6769_v39, %v6768_v22  ;;  %v2371_v5 = vpop.f32.mrf.mxu0 }
 0x195   : > { %v6771_v25 = vpop.f32.mrf.mxu1  ;;  %v9184_v14 = vadd.f32 %v2371_v5, %v9055_v28 }
 0x196   : > { %v7466_v47 = vpop.f32.mrf.mxu0  ;;  %v2254_v0 = vadd.f32 %v6770_v17, %v8943_v60 }
 0x197   : > { %v6772_v46 = vpop.f32.mrf.mxu1  ;;  %v9193_v26 = vadd.f32 %v7466_v47, %v9080_v49 }
 0x198   : > { %v6773_v52 = vadd.f32 %v6772_v46, %v6771_v25  ;;  %v9196_v13 = vpop.f32.mrf.mxu0 }
 0x199   : > { %v6774_v34 = vpop.f32.mrf.mxu1 }
 0x19a   : > { %v7469_v28 = vpop.f32.mrf.mxu0  ;;  %v2259_v31 = vadd.f32 %v6773_v52, %v8955_v41 }
 0x19b   : > { %v6775_v38 = vpop.f32.mrf.mxu1  ;;  %v9200_v3 = vadd.f32 %v7469_v28, %v9121_v12 }
 0x19c   : > { %v6776_v23 = vadd.f32 %v6775_v38, %v6774_v34  ;;  %v2387_v35 = vpop.f32.mrf.mxu0 }
 0x19d   : > { %v6777_v60 = vpop.f32.mrf.mxu1  ;;  %v9203_v57 = vadd.f32 %v2387_v35, %v9097_v8 }
 0x19e   : > { %v7470_v49 = vpop.f32.mrf.mxu0  ;;  %v9206_v6 = vadd.f32 %v6776_v23, %v8961_v58 }
 0x19f   : > { %v6778_v19 = vpop.f32.mrf.mxu1  ;;  %v9209_v42 = vadd.f32 %v7470_v49, %v9138_v51 }
 0x1a0   : > { %v6779_v53 = vadd.f32 %v6778_v19, %v6777_v60  ;;  %v9211_v41 = vpop.f32.mrf.mxu0 }
 0x1a1   : > { %v6780_v22 = vpop.f32.mrf.mxu1 }
 0x1a2   : > { %v7473_v12 = vpop.f32.mrf.mxu0  ;;  %v2267_v33 = vadd.f32 %v6779_v53, %v8976_v18 }
 0x1a3   : > { %v6781_v44 = vpop.f32.mrf.mxu1  ;;  %v9214_v39 = vadd.f32 %v7473_v12, %v2251_v59 }
 0x1a4   : > { %v6782_v8 = vadd.f32 %v6781_v44, %v6780_v22  ;;  %v2403_v17 = vpop.f32.mrf.mxu0 }
 0x1a5   : > { %v6783_v5 = vpop.f32.mrf.mxu1  ;;  %v9217_v58 = vadd.f32 %v2403_v17, %v9156_v50  ;;  %v1973_v50 = vadd.f32 %v9012_v1, %v8957_v21 }
 0x1a6   : > { %v7474_v25 = vpop.f32.mrf.mxu0  ;;  %v2270_v51 = vadd.f32 %v6782_v8, %v8982_v61 }
 0x1a7   : > { %v6784_v47 = vpop.f32.mrf.mxu1  ;;  %v9220_v46 = vadd.f32 %v7474_v25, %v2254_v0 }
 0x1a8   : > { %v6785_v52 = vadd.f32 %v6784_v47, %v6783_v5  ;;  %v9222_v34 = vpop.f32.mrf.mxu0 }
 0x1a9   : > { %v6786_v28 = vpop.f32.mrf.mxu1 }
 0x1aa   : > { %v7477_v18 = vpop.f32.mrf.mxu0  ;;  %v2275_v59 = vadd.f32 %v6785_v52, %v9008_v10 }
 0x1ab   : > { %v6787_v38 = vpop.f32.mrf.mxu1  ;;  %v9225_v23 = vadd.f32 %v7477_v18, %v2267_v33 }
 0x1ac   : > { %v6788_v35 = vadd.f32 %v6787_v38, %v6786_v28  ;;  %v2419_v60 = vpop.f32.mrf.mxu0 }
 0x1ad   : > { %v6789_v49 = vpop.f32.mrf.mxu1  ;;  %v9229_v61 = vadd.f32 %v2419_v60, %v2259_v31 }
 0x1ae   : > { %v7478_v0 = vpop.f32.mrf.mxu0  ;;  %v9231_v19 = vadd.f32 %v6788_v35, %v1973_v50 }
 0x1af   : > { %v6790_v53 = vpop.f32.mrf.mxu1  ;;  %v9233_v22 = vadd.f32 %v7478_v0, %v2270_v51 }
 0x1b0   : > { %v6791_v12 = vadd.f32 %v6790_v53, %v6789_v49  ;;  %v9235_v44 = vpop.f32.mrf.mxu0  ;;  %v1989_v49 = vadd.f32 %v9051_v48, %v8973_v16 }
 0x1b1   : > { %v6792_v10 = vpop.f32.mrf.mxu1 }
 0x1b2   : > { %v2283_v33 = vadd.f32 %v6791_v12, %v9028_v37  ;;  %v7481_v8 = vpop.f32.mrf.mxu0 }
 0x1b3   : > { %v6793_v17 = vpop.f32.mrf.mxu1 }
 0x1b4   : > { %v6794_v21 = vadd.f32 %v6793_v17, %v6792_v10  ;;  %v9238_v1 = vadd.f32 %v7481_v8, %v2283_v33  ;;  %v2435_v5 = vpop.f32.mrf.mxu0 }
 0x1b5   : > { %v6795_v31 = vpop.f32.mrf.mxu1  ;;  %v9240_v25 = vadd.f32 %v2435_v5, %v2275_v59 }
 0x1b6   : > { %v2286_v47 = vadd.f32 %v6794_v21, %v9036_v45  ;;  %v7482_v52 = vpop.f32.mrf.mxu0 }
 0x1b7   : > { %v6796_v51 = vpop.f32.mrf.mxu1 }
 0x1b8   : > { %v6797_v28 = vadd.f32 %v6796_v51, %v6795_v31  ;;  %v9243_v18 = vadd.f32 %v7482_v52, %v2286_v47  ;;  %v9245_v38 = vpop.f32.mrf.mxu0 }
 0x1b9   : > { %v6798_v50 = vpop.f32.mrf.mxu1 }
 0x1ba   : > { %v7485_v37 = vpop.f32.mrf.mxu0  ;;  %v2291_v35 = vadd.f32 %v6797_v28, %v9046_v63 }
 0x1bb   : > { %v6799_v60 = vpop.f32.mrf.mxu1 }
 0x1bc   : > { %v6800_v0 = vadd.f32 %v6799_v60, %v6798_v50  ;;  %v2451_v59 = vpop.f32.mrf.mxu0 }
 0x1bd   : > { %v6801_v53 = vpop.f32.mrf.mxu1  ;;  %v9250_v12 = vadd.f32 %v2451_v59, %v2291_v35  ;;  %v6676_v35 = vadd.f32 %v9085_v20, %v9077_v15 }
 0x1be   : > { %v7486_v45 = vpop.f32.mrf.mxu0  ;;  %v9252_v10 = vadd.f32 %v6800_v0, %v1989_v49 }
 0x1bf   : > { %v6802_v33 = vpop.f32.mrf.mxu1 }
 0x1c0   : > { %v6803_v8 = vadd.f32 %v6802_v33, %v6801_v53  ;;  %v9254_v17 = vpop.f32.mrf.mxu0  ;;  %v2005_v33 = vadd.f32 %v6676_v35, %v9010_v29 }
 0x1c1   : > { %v6804_v21 = vpop.f32.mrf.mxu1 }
 0x1c2   : > { %v2299_v5 = vadd.f32 %v6803_v8, %v9063_v32  ;;  %v7489_v63 = vpop.f32.mrf.mxu0 }
 0x1c3   : > { %v6805_v31 = vpop.f32.mrf.mxu1 }
 0x1c4   : > { %v6806_v47 = vadd.f32 %v6805_v31, %v6804_v21  ;;  %v9257_v52 = vadd.f32 %v7485_v37, %v2299_v5  ;;  %v2467_v16 = vpop.f32.mrf.mxu0 }
 0x1c5   : > { %v6807_v48 = vpop.f32.mrf.mxu1 }
 0x1c6   : > { %10659 = vst [vmem:[#allocation6_spill] sm:$0xff] %v9257_v52  ;;  %v2302_v51 = vadd.f32 %v6806_v47, %v9073_v40  ;;  %v7490_v28 = vpop.f32.mrf.mxu0 }
 0x1c7   : > { %v6808_v50 = vpop.f32.mrf.mxu1 }
 0x1c8   : > { %v6809_v60 = vadd.f32 %v6808_v50, %v6807_v48  ;;  %v9262_v49 = vadd.f32 %v7486_v45, %v2302_v51  ;;  %v9264_v0 = vpop.f32.mrf.mxu0 }
 0x1c9   : > { %v6810_v32 = vpop.f32.mrf.mxu1 }
 0x1ca   : > { %10660 = vst [vmem:[#allocation7_spill] sm:$0xff] %v9262_v49  ;;  %v2307_v59 = vadd.f32 %v6809_v60, %v9083_v11  ;;  %v7493_v53 = vpop.f32.mrf.mxu0 }
 0x1cb   : > { %v6811_v37 = vpop.f32.mrf.mxu1 }
 0x1cc   : > { %v6812_v8 = vadd.f32 %v6811_v37, %v6810_v32  ;;  %v9268_v21 = vadd.f32 %v2467_v16, %v2307_v59  ;;  %v2483_v40 = vpop.f32.mrf.mxu0  ;;  %v6688_v37 = vadd.f32 %v9149_v24, %v9135_v56 }
 0x1cd   : > { %v6813_v5 = vpop.f32.mrf.mxu1 }
 0x1ce   : > { %10661 = vst [vmem:[#allocation8_spill] sm:$0xff] %v9268_v21  ;;  %v9270_v31 = vadd.f32 %v6812_v8, %v2005_v33  ;;  %v7494_v15 = vpop.f32.mrf.mxu0 }
 0x1cf   : > { %v6814_v20 = vpop.f32.mrf.mxu1 }
 0x1d0   : > { %v6815_v45 = vadd.f32 %v6814_v20, %v6813_v5  ;;  %v9272_v47 = vpop.f32.mrf.mxu0 }
 0x1d1   : > { %v6816_v48 = vpop.f32.mrf.mxu1 }
 0x1d2   : > { %v2315_v51 = vadd.f32 %v6815_v45, %v9116_v62  ;;  %v6871_v11 = vpop.f32.mrf.mxu0 }
 0x1d3   : > { %v6817_v50 = vpop.f32.mrf.mxu1 }
 0x1d4   : > { %v6818_v60 = vadd.f32 %v6817_v50, %v6816_v48  ;;  %v9275_v49 = vadd.f32 %v7489_v63, %v2315_v51  ;;  %v6872_v29 = vpop.f32.mrf.mxu0  ;;  %v3045_v63 = vlaneseq  ;;  %v2021_v51 = vadd.f32 %v6688_v37, %v9033_v27 }
 0x1d5   : > { %v6819_v16 = vpop.f32.mrf.mxu1 }
 0x1d6   : > { %10662 = vst [vmem:[#allocation9_spill] sm:$0xff] %v9275_v49  ;;  %v2318_v35 = vadd.f32 %v6818_v60, %v9133_v4  ;;  %v6874_v32 = vpop.f32.mrf.mxu0 }
 0x1d7   : > { %v6820_v59 = vpop.f32.mrf.mxu1 }
 0x1d8   : > { %v6821_v33 = vadd.f32 %v6820_v59, %v6819_v16  ;;  %v9280_v8 = vadd.f32 %v7490_v28, %v2318_v35  ;;  %v6875_v5 = vpop.f32.mrf.mxu0  ;;  %v9288_v28 = vshrl.u32 %v3045_v63, 7 }
 0x1d9   : > { %v6822_v20 = vpop.f32.mrf.mxu1 }
 0x1da   : > { %10663 = vst [vmem:[#allocation10_spill] sm:$0xff] %v9280_v8  ;;  %v2323_v62 = vadd.f32 %v6821_v33, %v9144_v30  ;;  %v6877_v45 = vpop.f32.mrf.mxu0  ;;  %10664 = vst [vmem:[#allocation11_spill] sm:$0xff] %v9288_v28  ;;  %v3047_v27 = vsub.s32 0, %v9288_v28 }
 0x1db   : > { %v6823_v48 = vpop.f32.mrf.mxu1 }
 0x1dc   : > { %v6824_v50 = vadd.f32 %v6823_v48, %v6822_v20  ;;  %v9284_v49 = vadd.f32 %v2483_v40, %v2323_v62  ;;  %v6878_v4 = vpop.f32.mrf.mxu0  ;;  %v6873_v20 = vadd.f32 %v6872_v29, %v6871_v11  ;;  %v199_v62 = vld [vmem:[%s10602_s3] sm:$0x3]  ;;  %v6876_v29 = vadd.f32 %v6875_v5, %v6874_v32 }
 0x1dd   : > { %v6825_v60 = vpop.f32.mrf.mxu1  ;;  %v6879_v33 = vadd.f32 %v6878_v4, %v6877_v45  ;;  %v7878_v45 = vld [vmem:[%s10601_s2 + $0x78] sm:$0xff]   ;;  %v9316_v32 = vadd.f32 %v9222_v34, %v9168_v55 }
 0x1de   : > { %v9286_v21 = vadd.f32 %v6824_v50, %v2021_v51  ;;  %v6880_v56 = vpop.f32.mrf.mxu0  ;;  %7127 = vmatprep.subr.bf16.mxu0 %v7878_v45 }
 0x1df   : > { %v6826_v24 = vpop.f32.mrf.mxu1 }
 0x1e0   : > { %v6827_v16 = vadd.f32 %v6826_v24, %v6825_v60  ;;  %v6881_v35 = vpop.f32.mrf.mxu0 }
 0x1e1   : > { %v6828_v59 = vpop.f32.mrf.mxu1  ;;  %v6882_v60 = vadd.f32 %v6881_v35, %v6880_v56 }
 0x1e2   : > { %v2331_v30 = vadd.f32 %v6827_v16, %v9171_v7  ;;  %v6883_v8 = vpop.f32.mrf.mxu0 }
 0x1e3   : > { %v6829_v52 = vpop.f32.mrf.mxu1 }
 0x1e4   : > { %v9292_v40 = vadd.f32 %v7493_v53, %v2331_v30  ;;  %v6830_v37 = vadd.f32 %v6829_v52, %v6828_v59  ;;  %v6884_v48 = vpop.f32.mrf.mxu0  ;;  %v9301_v53 = vrot.slane %v199_v62, %v3047_v27  ;;  %v9322_v62 = vadd.f32 %v9235_v44, %v9206_v6 }
 0x1e5   : > { %v7513_v63 = vpop.f32.mrf.mxu1  ;;  %v9335_v6 = vadd.f32 %v9264_v0, %v9270_v31 }
 0x1e6   : > { %v2334_v51 = vadd.f32 %v6830_v37, %v9178_v9  ;;  %v2895_v50 = vadd.f32 %v7513_v63, %v6879_v33  ;;  %v6886_v7 = vpop.f32.mrf.mxu0  ;;  %v2375_v33 = vadd.f32 %v9196_v13, %v9060_v2  ;;  %v9326_v2 = vadd.f32 %v9245_v38, %v9231_v19 }
 0x1e7   : > { %v2886_v4 = vpop.f32.mrf.mxu1  ;;  %v6885_v13 = vadd.f32 %v6884_v48, %v6883_v8 }
 0x1e8   : > { %v9303_v52 = vadd.f32 %v7494_v15, %v2334_v51  ;;  %v2887_v11 = vadd.f32 %v6873_v20, %v2886_v4  ;;  %v3015_v24 = vadd.f32 %v2895_v50, %v9181_v54  ;;  %v6887_v16 = vpop.f32.mrf.mxu0  ;;  %v9312_v15 = vadd.f32 %v9211_v41, %v9107_v36 }
 0x1e9   : > { %v7514_v59 = vpop.f32.mrf.mxu1  ;;  %v6888_v19 = vadd.f32 %v6887_v16, %v6886_v7 }
 0x1ea   : > { %v3013_v9 = vadd.f32 %v2887_v11, %v9184_v14  ;;  %v3051_v56 = vadd.f32 %v9301_v53, %v3015_v24  ;;  %v2898_v35 = vadd.f32 %v7514_v59, %v6882_v60  ;;  %v6889_v30 = vpop.f32.mrf.mxu0 }
 0x1eb   : > { %v2889_v54 = vpop.f32.mrf.mxu1 }
 0x1ec   : > { %v3049_v5 = vadd.f32 %v9301_v53, %v3013_v9  ;;  %v2890_v27 = vadd.f32 %v6876_v29, %v2889_v54  ;;  %v3083_v14 = vmax.f32 %v3051_v56, 0.0  ;;  %v3016_v37 = vadd.f32 %v2898_v35, %v9193_v26  ;;  %v6890_v20 = vpop.f32.mrf.mxu0 }
 0x1ed   : > { %v7517_v36 = vpop.f32.mrf.mxu1  ;;  %v6891_v55 = vadd.f32 %v6890_v20, %v6889_v30  ;;  %v9331_v26 = vadd.f32 %v9254_v17, %v9252_v10  ;;  %v3529_v20 = vld [vmem:[#allocation2 + $0xc] sm:$0xf] }
 0x1ee   : > { %v3081_v41 = vmax.f32 %v3049_v5, 0.0  ;;  %v3014_v34 = vadd.f32 %v2890_v27, %v2375_v33  ;;  %v6553_v63 = vpack.c.bf16 %v3083_v14, %v3083_v14  ;;  %v3052_v51 = vadd.f32 %v9301_v53, %v3016_v37  ;;  %v6892_v50 = vpop.f32.mrf.mxu0  ;;  %v3536_v37 = vld [vmem:[#allocation2 + $0x18] sm:$0xf] }
 0x1ef   : > { %v2902_v44 = vpop.f32.mrf.mxu1  ;;  %v2911_v38 = vadd.f32 %v7517_v36, %v6891_v55 }
 0x1f0   : > { %v6551_v60 = vpack.c.bf16 %v3081_v41, %v3081_v41  ;;  %v3050_v8 = vadd.f32 %v9301_v53, %v3014_v34  ;;  %v3227_v48 = vshrl.u32 %v6553_v63, 16  ;;  %v3230_v45 = vshll.u32 %v6553_v63, 16  ;;  %v6893_v4 = vpop.f32.mrf.mxu0 }
 0x1f1   : > { %v3084_v11 = vmax.f32 %v3052_v51, 0.0  ;;  %v7518_v29 = vpop.f32.mrf.mxu1  ;;  %v2903_v24 = vadd.f32 %v6885_v13, %v2902_v44  ;;  %v3019_v59 = vadd.f32 %v2911_v38, %v9200_v3  ;;  %v6894_v10 = vadd.f32 %v6893_v4, %v6892_v50 }
 0x1f2   : > { %v3210_v17 = vshrl.u32 %v6551_v60, 16  ;;  %v3213_v9 = vshll.u32 %v6551_v60, 16  ;;  %v3082_v56 = vmax.f32 %v3050_v8, 0.0  ;;  %v3229_v0 = vrot.slane %v3227_v48, 7  ;;  %v9339_v31 = vpop.f32.mrf.mxu0 }
 0x1f3   : > { %v6554_v7 = vpack.c.bf16 %v3084_v11, %v3084_v11  ;;  %v3017_v16 = vadd.f32 %v2903_v24, %v9203_v57  ;;  %v2905_v35 = vpop.f32.mrf.mxu1  ;;  %v3055_v30 = vadd.f32 %v9301_v53, %v3019_v59  ;;  %v2914_v33 = vadd.f32 %v7518_v29, %v6894_v10  ;;  %v3533_v10 = vld [vmem:[#allocation2 + $0x14] sm:$0x1] }
 0x1f4   : > { %v3212_v54 = vrot.slane %v3210_v17, 7  ;;  %v6552_v5 = vpack.c.bf16 %v3082_v56, %v3082_v56  ;;  %v3232_v27 = vor.u32 %v3230_v45, %v3229_v0  ;;  %v3233_v14 = vrot.slane %v3229_v0, 4  ;;  %v6896_v3 = vpop.f32.mrf.mxu0 }
 0x1f5   : > { %v3235_v36 = vshrl.u32 %v6554_v7, 16  ;;  %v3238_v13 = vshll.u32 %v6554_v7, 16  ;;  %v3053_v55 = vadd.f32 %v9301_v53, %v3017_v16  ;;  %v2906_v41 = vadd.f32 %v6888_v19, %v2905_v35  ;;  %v9344_v34 = vpop.f32.mrf.mxu1  ;;  %v3540_v19 = vld [vmem:[#allocation2 + $0x20] sm:$0x1] }
 0x1f6   : > { %v3215_v63 = vor.u32 %v3213_v9, %v3212_v54  ;;  %v3216_v57 = vrot.slane %v3212_v54, 4  ;;  %v3218_v51 = vshrl.u32 %v6552_v5, 16  ;;  %v3221_v50 = vshll.u32 %v6552_v5, 16  ;;  %v6898_v44 = vpop.f32.mrf.mxu0 }
 0x1f7   : > { %v3537_v60 = vsel %vm8149_vm8, %v3232_v27, %v3536_v37  ;;  %v3237_v8 = vrot.slane %v3235_v36, 7  ;;  %v3085_v48 = vmax.f32 %v3053_v55, 0.0  ;;  %v3018_v45 = vadd.f32 %v2906_v41, %v9312_v15  ;;  %v2918_v7 = vpop.f32.mrf.mxu1 }
 0x1f8   : > { %v3530_v4 = vsel %vm8149_vm8, %v3215_v63, %v3529_v20  ;;  %v3220_v11 = vrot.slane %v3218_v51, 7  ;;  %3538 = vst [vmem:[#allocation2 + $0x18] sm:$0xf] %v3537_v60  ;;  %v3087_v29 = vmax.f32 %v3055_v30, 0.0  ;;  %v3020_v24 = vadd.f32 %v2914_v33, %v9209_v42  ;;  %v6899_v59 = vpop.f32.mrf.mxu0 }
 0x1f9   : > { %3531 = vst [vmem:[#allocation2 + $0xc] sm:$0xf] %v3530_v4  ;;  %v3240_v17 = vor.u32 %v3238_v13, %v3237_v8  ;;  %v3242_v9 = vrot.slane %v3237_v8, 4  ;;  %v6555_v56 = vpack.c.bf16 %v3085_v48, %v3085_v48  ;;  %v3054_v0 = vadd.f32 %v9301_v53, %v3018_v45  ;;  %v9362_v60 = vpop.f32.mrf.mxu1  ;;  %v3543_v48 = vld [vmem:[#allocation2 + $0x24] sm:$0xf] }
 0x1fa   : > { %v3223_v16 = vor.u32 %v3221_v50, %v3220_v11  ;;  %v3225_v15 = vrot.slane %v3220_v11, 4  ;;  %v6557_v35 = vpack.c.bf16 %v3087_v29, %v3087_v29  ;;  %v3056_v54 = vadd.f32 %v9301_v53, %v3020_v24  ;;  %v6901_v5 = vpop.f32.mrf.mxu0 }
 0x1fb   : > { %v3241_v30 = vsel %vm8140_vm7, %v3233_v14, %v3240_v17  ;;  %v3541_v42 = vsel %vm8110_vm2, %v3242_v9, %v3540_v19  ;;  %v3244_v33 = vshrl.u32 %v6555_v56, 16  ;;  %v3247_v20 = vshll.u32 %v6555_v56, 16 }
 0x1fc   : > { %v3224_v36 = vsel %vm8140_vm7, %v3216_v57, %v3223_v16  ;;  %v3534_v13 = vsel %vm8110_vm2, %v3225_v15, %v3533_v10  ;;  %3539 = vst [vmem:[#allocation2 + $0x1c] sm:$0xf] %v3241_v30  ;;  %3542 = vst [vmem:[#allocation2 + $0x20] sm:$0x1] %v3541_v42  ;;  %v3086_v55 = vmax.f32 %v3054_v0, 0.0  ;;  %v3261_v41 = vshrl.u32 %v6557_v35, 16  ;;  %v6902_v63 = vpop.f32.mrf.mxu0 }
 0x1fd   : > { %3532 = vst [vmem:[#allocation2 + $0x10] sm:$0xf] %v3224_v36  ;;  %3535 = vst [vmem:[#allocation2 + $0x14] sm:$0x1] %v3534_v13  ;;  %v3246_v51 = vrot.slane %v3244_v33, 7  ;;  %v3264_v14 = vshll.u32 %v6557_v35, 16  ;;  %v6897_v8 = vadd.f32 %v6896_v3, %v9339_v31  ;;  %v6900_v4 = vadd.f32 %v6899_v59, %v6898_v44 }
 0x1fe   : > { %v3088_v50 = vmax.f32 %v3056_v54, 0.0  ;;  %v6556_v45 = vpack.c.bf16 %v3086_v55, %v3086_v55  ;;  %v3263_v57 = vrot.slane %v3261_v41, 7  ;;  %v6903_v11 = vadd.f32 %v6902_v63, %v6901_v5  ;;  %v6904_v19 = vpop.f32.mrf.mxu0  ;;  %v3550_v10 = vld [vmem:[#allocation2 + $0x30] sm:$0xf]  ;;  %v3547_v3 = vld [vmem:[#allocation2 + $0x2c] sm:$0x1]  ;;  %v2921_v5 = vpop.f32.mrf.mxu1 }
 0x1ff   : > { %v9367_v29 = vadd.f32 %v9272_v47, %v9286_v21  ;;  %v3249_v24 = vor.u32 %v3247_v20, %v3246_v51  ;;  %v2919_v9 = vadd.f32 %v6897_v8, %v2918_v7  ;;  %v3250_v56 = vrot.slane %v3246_v51, 4  ;;  %v3554_v7 = vld [vmem:[#allocation2 + $0x38] sm:$0x1] }
 0x200   : > { %v6558_v17 = vpack.c.bf16 %v3088_v50, %v3088_v50  ;;  %v3252_v0 = vshrl.u32 %v6556_v45, 16  ;;  %v3255_v16 = vshll.u32 %v6556_v45, 16  ;;  %v3266_v15 = vor.u32 %v3264_v14, %v3263_v57  ;;  %v6905_v35 = vpop.f32.mrf.mxu0  ;;  %v3643_v42 = vld [vmem:[#allocation2 + $0xc] sm:$0xf] }
 0x201   : > { %v3544_v31 = vsel %vm8149_vm8, %v3249_v24, %v3543_v48  ;;  %v3267_v44 = vrot.slane %v3263_v57, 4  ;;  %v3021_v54 = vadd.f32 %v2919_v9, %v9217_v58  ;;  %v2922_v30 = vadd.f32 %v6900_v4, %v2921_v5  ;;  %v3696_v41 = vld [vmem:[#allocation2 + $0xc] sm:$0xe] }
 0x202   : > { %v3269_v59 = vshrl.u32 %v6558_v17, 16  ;;  %3545 = vst [vmem:[#allocation2 + $0x24] sm:$0xf] %v3544_v31  ;;  %v3254_v21 = vrot.slane %v3252_v0, 7  ;;  %v3551_v47 = vsel %vm8149_vm8, %v3266_v15, %v3550_v10  ;;  %v2927_v33 = vadd.f32 %v9344_v34, %v6903_v11  ;;  %v9375_v20 = vpop.f32.mrf.mxu0 }
 0x203   : > { %3552 = vst [vmem:[#allocation2 + $0x30] sm:$0xf] %v3551_v47  ;;  %v3272_v13 = vshll.u32 %v6558_v17, 16  ;;  %v3057_v55 = vadd.f32 %v9301_v53, %v3021_v54  ;;  %v6906_v58 = vadd.f32 %v6905_v35, %v6904_v19  ;;  %v3022_v14 = vadd.f32 %v2922_v30, %v9316_v32  ;;  %v9400_v47 = vpop.f32.mrf.mxu1 }
 0x204   : > { %v3271_v36 = vrot.slane %v3269_v59, 7  ;;  %v3257_v63 = vor.u32 %v3255_v16, %v3254_v21  ;;  %v3259_v51 = vrot.slane %v3254_v21, 4  ;;  %v3644_v50 = vld [vmem:[#allocation2 + $0x10] sm:$0xf]  ;;  %v3023_v8 = vadd.f32 %v2927_v33, %v9214_v39  ;;  %v9380_v48 = vpop.f32.mrf.mxu0 }
 0x205   : > { %v3089_v57 = vmax.f32 %v3057_v55, 0.0  ;;  %v9382_v4 = vcombine.low %v3643_v42, %v3644_v50  ;;  %v7846_v11 = vld [vmem:[#allocation2 + $0x14] ss:$0 sps:$4 sm:$0x11]   ;;  %v3058_v10 = vadd.f32 %v9301_v53, %v3022_v14  ;;  %v6330_v32 = vcombine.low %v3696_v41, %v3644_v50  ;;  %v3557_v50 = vld [vmem:[#allocation2 + $0x3c] sm:$0xf] }
 0x206   : > { %v3274_v45 = vor.u32 %v3272_v13, %v3271_v36  ;;  %v3276_v34 = vrot.slane %v3271_v36, 4  ;;  %v3258_v24 = vsel %vm8140_vm7, %v3250_v56, %v3257_v63  ;;  %v3548_v19 = vsel %vm8110_vm2, %v3259_v51, %v3547_v3  ;;  %v9389_v17 = vpop.f32.mrf.mxu0  ;;  %v3646_v3 = vld [vmem:[#allocation2 + $0x1c] sm:$0xf]  ;;  %v3645_v36 = vld [vmem:[#allocation2 + $0x18] sm:$0xf] }
 0x207   : > { %3546 = vst [vmem:[#allocation2 + $0x28] sm:$0xf] %v3258_v24  ;;  %3549 = vst [vmem:[#allocation2 + $0x2c] sm:$0x1] %v3548_v19  ;;  %v6559_v0 = vpack.c.bf16 %v3089_v57, %v3089_v57  ;;  %v4167_v16 = vrot.slane %v7846_v11, 1  ;;  %v3090_v56 = vmax.f32 %v3058_v10, 0.0  ;;  %v3059_v35 = vadd.f32 %v9301_v53, %v3023_v8  ;;  %v2934_v10 = vpop.f32.mrf.mxu1 }
 0x208   : > { %v3275_v39 = vsel %vm8140_vm7, %v3267_v44, %v3274_v45  ;;  %v3555_v9 = vsel %vm8110_vm2, %v3276_v34, %v3554_v7  ;;  %v4166_v15 = vrot.slane %v6330_v32, 1  ;;  %v3888_v31 = vshrl.u32 %v9382_v4, 16  ;;  %v9397_v59 = vpop.f32.mrf.mxu0  ;;  %v9411_v14 = vld [vmem:[#allocation2 + $0x20] ss:$0 sps:$4 sm:$0x11]  }
 0x209   : > { %3553 = vst [vmem:[#allocation2 + $0x34] sm:$0xf] %v3275_v39  ;;  %3556 = vst [vmem:[#allocation2 + $0x38] sm:$0x1] %v3555_v9  ;;  %v3278_v54 = vshrl.u32 %v6559_v0, 16  ;;  %v3281_v5 = vshll.u32 %v6559_v0, 16  ;;  %v6560_v7 = vpack.c.bf16 %v3090_v56, %v3090_v56  ;;  %v2930_v33 = vadd.f32 %v9362_v60, %v6906_v58 }
 0x20a   : > { %v3890_v44 = vshll.u32 %v9382_v4, 16  ;;  %v3895_v21 = vshll.u32 %v7846_v11, 16  ;;  %v9403_v30 = vsel %vm1396_vm9, %v4166_v15, %v4167_v16  ;;  %v3091_v42 = vmax.f32 %v3059_v35, 0.0  ;;  %v9406_v13 = vpop.f32.mrf.mxu0  ;;  %v3697_v11 = vld [vmem:[#allocation2 + $0x18] sm:$0xe] }
 0x20b   : > { %v3280_v55 = vrot.slane %v3278_v54, 7  ;;  %7559 = vmatprep.mubr.bf16.mxu0 %v9403_v30  ;;  %v9409_v51 = vcombine.low %v3645_v36, %v3646_v3  ;;  %v3286_v8 = vshrl.u32 %v6560_v7, 16  ;;  %v3289_v45 = vshll.u32 %v6560_v7, 16  ;;  %v3561_v9 = vld [vmem:[#allocation2 + $0x44] sm:$0x1] }
 0x20c   : > { %v3892_v41 = vrot.slane %v3890_v44, 1  ;;  %v3897_v63 = vrot.slane %v3895_v21, 1  ;;  %v6561_v34 = vpack.c.bf16 %v3091_v42, %v3091_v42  ;;  %v3024_v57 = vadd.f32 %v2930_v33, %v9220_v46  ;;  %v9414_v60 = vpop.f32.mrf.mxu0  ;;  %v3564_v42 = vld [vmem:[#allocation2 + $0x48] sm:$0xf] }
 0x20d   : > { %v3283_v58 = vor.u32 %v3281_v5, %v3280_v55  ;;  %v3284_v24 = vrot.slane %v3280_v55, 4  ;;  %v6331_v32 = vcombine.low %v3697_v11, %v3646_v3  ;;  %v3288_v39 = vrot.slane %v3286_v8, 7  ;;  %v7882_v3 = vld [vmem:[%s10601_s2 + $0x38] sm:$0xff]   ;;  %v7883_v55 = vld [vmem:[%s10601_s2 + $0x70] sm:$0xff]  }
 0x20e   : > { %v3893_v19 = vor.u32 %v3892_v41, %v3888_v31  ;;  %v3295_v0 = vshrl.u32 %v6561_v34, 16  ;;  %v3298_v16 = vshll.u32 %v6561_v34, 16  ;;  %v3060_v56 = vadd.f32 %v9301_v53, %v3024_v57  ;;  %v9417_v15 = vpop.f32.mrf.mxu0  ;;  %v7856_v31 = vld [vmem:[%s10601_s2 + $0xb0] sm:$0xff]   ;;  %v3648_v34 = vld [vmem:[#allocation2 + $0x28] sm:$0xf] }
 0x20f   : > { %v3558_v35 = vsel %vm8149_vm8, %v3283_v58, %v3557_v50  ;;  %v4169_v54 = vrot.slane %v6331_v32, 1  ;;  %v4170_v5 = vrot.slane %v9411_v14, 1  ;;  %v3291_v44 = vor.u32 %v3289_v45, %v3288_v39  ;;  %v9464_v32 = vld [vmem:[%s10601_s2 + $0xa8] sm:$0xff]  }
 0x210   : > { %v9422_v46 = vsel %vm1107_vm10, %v3893_v19, %v3897_v63  ;;  %3559 = vst [vmem:[#allocation2 + $0x3c] sm:$0xf] %v3558_v35  ;;  %v3293_v21 = vrot.slane %v3288_v39, 4  ;;  %v9431_v7 = vrot.slane %v3295_v0, 7  ;;  %v3092_v33 = vmax.f32 %v3060_v56, 0.0  ;;  %v9434_v36 = vpop.f32.mrf.mxu0  ;;  %v9443_v63 = vpop.f32.mrf.mxu1 }
 0x211   : > { %4508 = vmatprep.mubr.bf16.mxu1 %v9422_v46  ;;  %v9441_v41 = vsel %vm1396_vm9, %v4169_v54, %v4170_v5  ;;  %v6909_v50 = vadd.f32 %v9380_v48, %v9375_v20  ;;  %v3900_v8 = vshrl.u32 %v9409_v51, 16  ;;  %v3902_v45 = vshll.u32 %v9409_v51, 16  ;;  %v9457_v20 = vld [vmem:[#allocation2 + $0x2c] ss:$0 sps:$4 sm:$0x11]  }
 0x212   : > { %4509 = vmatmul.mubr.bf16.vlgmr.msra.gmra.mxu1 %v9382_v4  ;;  %v3292_v57 = vsel %vm8140_vm7, %v3284_v24, %v3291_v44  ;;  %v3562_v11 = vsel %vm8110_vm2, %v3293_v21, %v3561_v9  ;;  %v3300_v58 = vor.u32 %v3298_v16, %v9431_v7  ;;  %v3301_v19 = vrot.slane %v9431_v7, 4  ;;  %7560 = vmatmul.mubr.bf16.vlgmr.msra.gmra.mxu0 %v9441_v41  ;;  %v9459_v48 = vpop.f32.mrf.mxu0  ;;  %v7887_v24 = vld [vmem:[%s10601_s2 + $0x30] sm:$0xff]   ;;  %v3647_v16 = vld [vmem:[#allocation2 + $0x24] sm:$0xf] }
 0x213   : > { %7592 = vmatpush3.bf16.msra.mxu1 %v9189_v43  ;;  %3560 = vst [vmem:[#allocation2 + $0x40] sm:$0xf] %v3292_v57  ;;  %3563 = vst [vmem:[#allocation2 + $0x44] sm:$0x1] %v3562_v11  ;;  %v6562_v39 = vpack.c.bf16 %v3092_v33, %v3092_v33  ;;  %v2935_v9 = vadd.f32 %v6909_v50, %v2934_v10  ;;  %v3904_v43 = vrot.slane %v3902_v45, 1  ;;  %v3907_v0 = vshll.u32 %v9411_v14, 16  ;;  %v2937_v50 = vpop.f32.mrf.mxu1 }
 0x214   : > { %v3698_v56 = vld [vmem:[#allocation2 + $0x24] sm:$0xe]  ;;  %7593 = vmatprep.subr.bf16.mxu1 %v7856_v31  ;;  %7128 = vmatpush3.bf16.msra.mxu0 %v7882_v3  ;;  %v3565_v35 = vsel %vm8149_vm8, %v3300_v58, %v3564_v42  ;;  %v6912_v54 = vadd.f32 %v9397_v59, %v9389_v17  ;;  %v9474_v5 = vcombine.low %v3647_v16, %v3648_v34  ;;  %v9476_v21 = vpop.f32.mrf.mxu0  ;;  %v7889_v14 = vld [vmem:[%s10601_s2 + $0x68] sm:$0xff]   ;;  %v4173_v59 = vrot.slane %v9457_v20, 1 }
 0x215   : > { %v6332_v44 = vcombine.low %v3698_v56, %v3648_v34  ;;  %7129 = vmatprep.subr.bf16.mxu0 %v7883_v55  ;;  %3566 = vst [vmem:[#allocation2 + $0x48] sm:$0xf] %v3565_v35  ;;  %v3303_v10 = vshrl.u32 %v6562_v39, 16  ;;  %v3306_v33 = vshll.u32 %v6562_v39, 16  ;;  %v3025_v3 = vadd.f32 %v2935_v9, %v9229_v61  ;;  %v3568_v61 = vld [vmem:[#allocation2 + $0x50] sm:$0x1] }
 0x216   : > { %10668 = vst [vmem:[#allocation12_spill] sm:$0xff] %v9474_v5  ;;  %v3905_v42 = vor.u32 %v3904_v43, %v3900_v8  ;;  %v3909_v45 = vrot.slane %v3907_v0, 1  ;;  %v2938_v57 = vadd.f32 %v6912_v54, %v2937_v50  ;;  %v9483_v34 = vpop.f32.mrf.mxu0  ;;  %v6915_v58 = vadd.f32 %v9414_v60, %v9406_v13  ;;  %v7870_v13 = vld [vmem:[%s10601_s2 + $0xa0] sm:$0xff]   ;;  %v7893_v60 = vld [vmem:[%s10601_s2 + $0x28] sm:$0xff]  }
 0x217   : > { %v4172_v17 = vrot.slane %v6332_v44, 1  ;;  %7594 = vmatpush3.bf16.msra.mxu1 %v7856_v31  ;;  %v3305_v55 = vrot.slane %v3303_v10, 7  ;;  %v3061_v11 = vadd.f32 %v9301_v53, %v3025_v3  ;;  %v3912_v39 = vshrl.u32 %v9474_v5, 16  ;;  %v7894_v35 = vld [vmem:[%s10601_s2 + $0x60] sm:$0xff]  }
 0x218   : > { %7595 = vmatprep.subr.bf16.mxu1 %v9464_v32  ;;  %7130 = vmatpush3.bf16.msra.mxu0 %v7887_v24  ;;  %v9491_v8 = vsel %vm1107_vm10, %v3905_v42, %v3909_v45  ;;  %v3026_v9 = vadd.f32 %v2938_v57, %v9322_v62  ;;  %v3914_v43 = vshll.u32 %v9474_v5, 16  ;;  %v9498_v0 = vpop.f32.mrf.mxu0  ;;  %v2943_v62 = vadd.f32 %v9400_v47, %v6915_v58  ;;  %v9526_v57 = vpop.f32.mrf.mxu1 }
 0x219   : > { %v9495_v31 = vsel %vm1396_vm9, %v4172_v17, %v4173_v59  ;;  %7131 = vmatprep.subr.bf16.mxu0 %v7889_v14  ;;  %v3308_v24 = vor.u32 %v3306_v33, %v3305_v55  ;;  %v3310_v16 = vrot.slane %v3305_v55, 4  ;;  %v3093_v56 = vmax.f32 %v3061_v11, 0.0  ;;  %4516 = vmatprep.mubr.bf16.mxu1 %v9491_v8  ;;  %v3650_v33 = vld [vmem:[#allocation2 + $0x34] sm:$0xf] }
 0x21a   : > { %7563 = vmatprep.mubr.bf16.mxu0 %v9495_v31  ;;  %4517 = vmatmul.mubr.bf16.gmra.mxu1 %v9409_v51  ;;  %v3062_v54 = vadd.f32 %v9301_v53, %v3026_v9  ;;  %v3916_v44 = vrot.slane %v3914_v43, 1  ;;  %v3919_v14 = vshll.u32 %v9457_v20, 16  ;;  %v6918_v10 = vadd.f32 %v9434_v36, %v9417_v15  ;;  %v9517_v3 = vpop.f32.mrf.mxu0  ;;  %v9528_v20 = vld [vmem:[#allocation2 + $0x38] ss:$0 sps:$4 sm:$0x11]  }
 0x21b   : > { %v3309_v47 = vsel %vm8140_vm7, %v3301_v19, %v3308_v24  ;;  %v3569_v50 = vsel %vm8110_vm2, %v3310_v16, %v3568_v61  ;;  %v6563_v42 = vpack.c.bf16 %v3093_v56, %v3093_v56  ;;  %v3027_v45 = vadd.f32 %v2943_v62, %v9225_v23  ;;  %7596 = vmatpush3.bf16.msra.mxu1 %v9464_v32  ;;  %v3649_v19 = vld [vmem:[#allocation2 + $0x30] sm:$0xf]  ;;  %v7877_v23 = vld [vmem:[%s10601_s2 + $0x98] sm:$0xff]   ;;  %v7898_v32 = vld [vmem:[%s10601_s2 + $0x20] sm:$0xff]  }
 0x21c   : > { %3567 = vst [vmem:[#allocation2 + $0x4c] sm:$0xf] %v3309_v47  ;;  %3570 = vst [vmem:[#allocation2 + $0x50] sm:$0x1] %v3569_v50  ;;  %v3094_v15 = vmax.f32 %v3062_v54, 0.0  ;;  %v3917_v36 = vor.u32 %v3916_v44, %v3912_v39  ;;  %v3921_v7 = vrot.slane %v3919_v14, 1  ;;  %v2946_v17 = vadd.f32 %v9443_v63, %v6918_v10  ;;  %v9532_v59 = vpop.f32.mrf.mxu0  ;;  %7597 = vmatprep.subr.bf16.mxu1 %v7870_v13  ;;  %v2950_v44 = vpop.f32.mrf.mxu1 }
 0x21d   : > { %7132 = vmatpush3.bf16.msra.mxu0 %v7893_v60  ;;  %v3312_v55 = vshrl.u32 %v6563_v42, 16  ;;  %v3315_v11 = vshll.u32 %v6563_v42, 16  ;;  %v3063_v58 = vadd.f32 %v9301_v53, %v3027_v45  ;;  %v3699_v39 = vld [vmem:[#allocation2 + $0x30] sm:$0xe]  ;;  %v9541_v61 = vcombine.low %v3649_v19, %v3650_v33  ;;  %v7900_v63 = vld [vmem:[%s10601_s2 + $0x58] sm:$0xff]  }
 0x21e   : > { %7133 = vmatprep.subr.bf16.mxu0 %v7894_v35  ;;  %v6564_v9 = vpack.c.bf16 %v3094_v15, %v3094_v15  ;;  %v9547_v43 = vsel %vm1107_vm10, %v3917_v36, %v3921_v7  ;;  %v3028_v60 = vadd.f32 %v2946_v17, %v9233_v22  ;;  %v6333_v24 = vcombine.low %v3699_v39, %v3650_v33  ;;  %v9550_v16 = vpop.f32.mrf.mxu0  ;;  %v3571_v62 = vld [vmem:[#allocation2 + $0x54] sm:$0xf]  ;;  %v7904_v45 = vld [vmem:[%s10601_s2 + $0x18] sm:$0xff]  }
 0x21f   : > { %v3314_v56 = vrot.slane %v3312_v55, 7  ;;  %v3095_v54 = vmax.f32 %v3063_v58, 0.0  ;;  %4524 = vmatprep.mubr.bf16.mxu1 %v9547_v43  ;;  %v4176_v35 = vrot.slane %v9528_v20, 1  ;;  %v6921_v14 = vadd.f32 %v9476_v21, %v9459_v48  ;;  %7598 = vmatpush3.bf16.msra.mxu1 %v7870_v13  ;;  %v7888_v42 = vld [vmem:[%s10601_s2 + $0x90] sm:$0xff]   ;;  %v3575_v58 = vld [vmem:[#allocation2 + $0x5c] sm:$0x1] }
 0x220   : > { %v3320_v10 = vshrl.u32 %v6564_v9, 16  ;;  %v3323_v47 = vshll.u32 %v6564_v9, 16  ;;  %v3064_v50 = vadd.f32 %v9301_v53, %v3028_v60  ;;  %v4175_v22 = vrot.slane %v6333_v24, 1  ;;  %v9557_v33 = vpop.f32.mrf.mxu0  ;;  %7599 = vmatprep.subr.bf16.mxu1 %v7877_v23  ;;  %v7905_v36 = vld [vmem:[%s10601_s2 + $0x50] sm:$0xff]   ;;  %v9578_v9 = vpop.f32.mrf.mxu1 }
 0x221   : > { %7134 = vmatpush3.bf16.msra.mxu0 %v7898_v32  ;;  %v3317_v15 = vor.u32 %v3315_v11, %v3314_v56  ;;  %v3318_v48 = vrot.slane %v3314_v56, 4  ;;  %v6565_v21 = vpack.c.bf16 %v3095_v54, %v3095_v54  ;;  %v2951_v13 = vadd.f32 %v6921_v14, %v2950_v44  ;;  %v3578_v54 = vld [vmem:[#allocation2 + $0x60] sm:$0xf] }
 0x222   : > { %7135 = vmatprep.subr.bf16.mxu0 %v7900_v63  ;;  %v3322_v7 = vrot.slane %v3320_v10, 7  ;;  %4525 = vmatmul.mubr.bf16.gmra.mxu1 %v9474_v5  ;;  %v3096_v17 = vmax.f32 %v3064_v50, 0.0  ;;  %v9570_v19 = vsel %vm1396_vm9, %v4175_v22, %v4176_v35  ;;  %v3924_v32 = vshrl.u32 %v9541_v61, 16  ;;  %v9573_v55 = vpop.f32.mrf.mxu0  ;;  %v3652_v22 = vld [vmem:[#allocation2 + $0x40] sm:$0xf] }
 0x223   : > { %v3572_v11 = vsel %vm8149_vm8, %v3317_v15, %v3571_v62  ;;  %v3329_v39 = vshrl.u32 %v6565_v21, 16  ;;  %v3332_v63 = vshll.u32 %v6565_v21, 16  ;;  %7564 = vmatmul.mubr.bf16.gmra.mxu0 %v9570_v19  ;;  %v3029_v60 = vadd.f32 %v2951_v13, %v9240_v25  ;;  %7600 = vmatpush3.bf16.msra.mxu1 %v7877_v23  ;;  %v7899_v62 = vld [vmem:[%s10601_s2 + $0x88] sm:$0xff]   ;;  %v7909_v25 = vld [vmem:[%s10601_s2 + $0x10] sm:$0xff]   ;;  %v3700_v5 = vld [vmem:[#allocation2 + $0x3c] sm:$0xe] }
 0x224   : > { %3573 = vst [vmem:[#allocation2 + $0x54] sm:$0xf] %v3572_v11  ;;  %v3325_v24 = vor.u32 %v3323_v47, %v3322_v7  ;;  %v3327_v56 = vrot.slane %v3322_v7, 4  ;;  %v6566_v44 = vpack.c.bf16 %v3096_v17, %v3096_v17  ;;  %v3926_v35 = vshll.u32 %v9541_v61, 16  ;;  %v9582_v14 = vpop.f32.mrf.mxu0  ;;  %7601 = vmatprep.subr.bf16.mxu1 %v7888_v42  ;;  %v7911_v15 = vld [vmem:[%s10601_s2 + $0x48] sm:$0xff]   ;;  %v2953_v11 = vpop.f32.mrf.mxu1 }
 0x225   : > { %7136 = vmatpush3.bf16.msra.mxu0 %v7904_v45  ;;  %v3331_v23 = vrot.slane %v3329_v39, 7  ;;  %v3065_v10 = vadd.f32 %v9301_v53, %v3029_v60  ;;  %v3931_v47 = vshll.u32 %v9528_v20, 16  ;;  %v6924_v50 = vadd.f32 %v9498_v0, %v9483_v34  ;;  %v9601_v17 = vld [vmem:[#allocation2 + $0x44] ss:$0 sps:$4 sm:$0x11]  }
 0x226   : > { %7137 = vmatprep.subr.bf16.mxu0 %v7905_v36  ;;  %v3326_v45 = vsel %vm8140_vm7, %v3318_v48, %v3325_v24  ;;  %v3576_v21 = vsel %vm8110_vm2, %v3327_v56, %v3575_v58  ;;  %v3337_v13 = vshrl.u32 %v6566_v44, 16  ;;  %v3340_v7 = vshll.u32 %v6566_v44, 16  ;;  %v9603_v20 = vpop.f32.mrf.mxu0  ;;  %v3651_v60 = vld [vmem:[#allocation2 + $0x3c] sm:$0xf] }
 0x227   : > { %3574 = vst [vmem:[#allocation2 + $0x58] sm:$0xf] %v3326_v45  ;;  %3577 = vst [vmem:[#allocation2 + $0x5c] sm:$0x1] %v3576_v21  ;;  %v3334_v34 = vor.u32 %v3332_v63, %v3331_v23  ;;  %v3335_v0 = vrot.slane %v3331_v23, 4  ;;  %v3097_v36 = vmax.f32 %v3065_v10, 0.0  ;;  %7602 = vmatpush3.bf16.msra.mxu1 %v7888_v42  ;;  %v2954_v24 = vadd.f32 %v6924_v50, %v2953_v11 }
 0x228   : > { %v3928_v39 = vrot.slane %v3926_v35, 1  ;;  %v3339_v28 = vrot.slane %v3337_v13, 7  ;;  %v3933_v48 = vrot.slane %v3931_v47, 1  ;;  %v9605_v58 = vcombine.low %v3651_v60, %v3652_v22  ;;  %v9607_v56 = vpop.f32.mrf.mxu0  ;;  %7603 = vmatprep.subr.bf16.mxu1 %v7899_v62  ;;  %v3582_v63 = vld [vmem:[#allocation2 + $0x68] sm:$0x1]  ;;  %v7910_v42 = vld [vmem:[%s10601_s2 + $0x80] sm:$0xff]  }
 0x229   : > { %7138 = vmatpush3.bf16.msra.mxu0 %v7909_v25  ;;  %v3579_v44 = vsel %vm8149_vm8, %v3334_v34, %v3578_v54  ;;  %v6567_v23 = vpack.c.bf16 %v3097_v36, %v3097_v36  ;;  %v6334_v45 = vcombine.low %v3700_v5, %v3652_v22  ;;  %v3030_v50 = vadd.f32 %v2954_v24, %v9326_v2  ;;  %v9616_v25 = vpop.f32.mrf.mxu1  ;;  %v7915_v5 = vld [vmem:[%s10601_s2 + $0x8] sm:$0xff]   ;;  %v7917_v60 = vld [vmem:[%s10601_s2] sm:$0xff]  }
 0x22a   : > { %v3929_v10 = vor.u32 %v3928_v39, %v3924_v32  ;;  %7139 = vmatprep.subr.bf16.mxu0 %v7911_v15  ;;  %3580 = vst [vmem:[#allocation2 + $0x60] sm:$0xf] %v3579_v44  ;;  %v3342_v35 = vor.u32 %v3340_v7, %v3339_v28  ;;  %v3344_v47 = vrot.slane %v3339_v28, 4  ;;  %v4179_v21 = vrot.slane %v9601_v17, 1  ;;  %v9618_v13 = vpop.f32.mrf.mxu0  ;;  %v7916_v28 = vld [vmem:[%s10601_s2 + $0x40] sm:$0xff]  }
 0x22b   : > { %v3346_v32 = vshrl.u32 %v6567_v23, 16  ;;  %v3349_v54 = vshll.u32 %v6567_v23, 16  ;;  %v4178_v15 = vrot.slane %v6334_v45, 1  ;;  %7604 = vmatpush3.bf16.msra.mxu1 %v7899_v62  ;;  %v3585_v34 = vld [vmem:[#allocation2 + $0x6c] sm:$0xf]  ;;  %v3066_v36 = vadd.f32 %v9301_v53, %v3030_v50 }
 0x22c   : > { %v9624_v22 = vsel %vm1107_vm10, %v3929_v10, %v3933_v48  ;;  %v3343_v2 = vsel %vm8140_vm7, %v3335_v0, %v3342_v35  ;;  %v3583_v7 = vsel %vm8110_vm2, %v3344_v47, %v3582_v63  ;;  %v6927_v11 = vadd.f32 %v9532_v59, %v9517_v3  ;;  %v3654_v39 = vld [vmem:[#allocation2 + $0x4c] sm:$0xf]  ;;  %v9637_v62 = vpop.f32.mrf.mxu0  ;;  %v7921_v0 = vld [vmem:[%s10601_s2 + $0x1f8] sm:$0xff]   ;;  %v9653_v44 = vld [vmem:[#allocation2 + $0x50] ss:$0 sps:$4 sm:$0x11]   ;;  %7605 = vmatprep.subr.bf16.mxu1 %v7910_v42  ;;  %v2966_v35 = vpop.f32.mrf.mxu1 }
 0x22d   : > { %4532 = vmatprep.mubr.bf16.mxu1 %v9624_v22  ;;  %3581 = vst [vmem:[#allocation2 + $0x64] sm:$0xf] %v3343_v2  ;;  %3584 = vst [vmem:[#allocation2 + $0x68] sm:$0x1] %v3583_v7  ;;  %v9645_v48 = vrot.slane %v3346_v32, 7  ;;  %v9649_v24 = vsel %vm1396_vm9, %v4178_v15, %v4179_v21  ;;  %v3936_v3 = vshrl.u32 %v9605_v58, 16  ;;  %v6930_v45 = vadd.f32 %v9557_v33, %v9550_v16 }
 0x22e   : > { %4533 = vmatmul.mubr.bf16.gmra.mxu1 %v9541_v61  ;;  %v3938_v59 = vshll.u32 %v9605_v58, 16  ;;  %v3098_v63 = vmax.f32 %v3066_v36, 0.0  ;;  %7567 = vmatprep.mubr.bf16.mxu0 %v9649_v24  ;;  %v2959_v23 = vadd.f32 %v9526_v57, %v6927_v11  ;;  %v3943_v10 = vshll.u32 %v9601_v17, 16  ;;  %v3653_v47 = vld [vmem:[#allocation2 + $0x48] sm:$0xf]  ;;  %v9660_v50 = vpop.f32.mrf.mxu0  ;;  %v9669_v57 = vld [vmem:[%s10601_s2 + $0x238] sm:$0xff]  }
 0x22f   : > { %7140 = vmatpush3.bf16.msra.mxu0 %v7915_v5  ;;  %v3351_v21 = vor.u32 %v3349_v54, %v9645_v48  ;;  %v3352_v32 = vrot.slane %v9645_v48, 4  ;;  %v9664_v2 = vcombine.low %v3653_v47, %v3654_v39  ;;  %7606 = vmatpush3.bf16.msra.mxu1 %v7910_v42  ;;  %v2962_v5 = vadd.f32 %v9578_v9, %v6930_v45  ;;  %v3701_v7 = vld [vmem:[#allocation2 + $0x48] sm:$0xe] }
 0x230   : > { %v3940_v15 = vrot.slane %v3938_v59, 1  ;;  %7141 = vmatprep.subr.bf16.mxu0 %v7916_v28  ;;  %v6568_v16 = vpack.c.bf16 %v3098_v63, %v3098_v63  ;;  %v3031_v33 = vadd.f32 %v2959_v23, %v9238_v1  ;;  %v3945_v17 = vrot.slane %v3943_v10, 1  ;;  %v9673_v54 = vpop.f32.mrf.mxu0  ;;  %7263 = vmatprep.subr.bf16.mxu1 %v7921_v0  ;;  %v9680_v23 = vpop.f32.mrf.mxu1 }
 0x231   : > { %10669 = vst [vmem:[#allocation5_spill] sm:$0xff] %v9664_v2  ;;  %v3586_v36 = vsel %vm8149_vm8, %v3351_v21, %v3585_v34  ;;  %v6335_v28 = vcombine.low %v3701_v7, %v3654_v39  ;;  %v4182_v11 = vrot.slane %v9653_v44, 1  ;;  %v3032_v1 = vadd.f32 %v2962_v5, %v9243_v18  ;;  %v3589_v21 = vld [vmem:[#allocation2 + $0x74] sm:$0x1] }
 0x232   : > { %v3941_v42 = vor.u32 %v3940_v15, %v3936_v3  ;;  %3587 = vst [vmem:[#allocation2 + $0x6c] sm:$0xf] %v3586_v36  ;;  %v3354_v48 = vshrl.u32 %v6568_v16, 16  ;;  %v3357_v59 = vshll.u32 %v6568_v16, 16  ;;  %v3067_v63 = vadd.f32 %v9301_v53, %v3031_v33  ;;  %v9682_v9 = vpop.f32.mrf.mxu0  ;;  %v2969_v36 = vpop.f32.mrf.mxu1 }
 0x233   : > { %7142 = vmatpush3.bf16.msra.mxu0 %v7917_v60  ;;  %v4181_v34 = vrot.slane %v6335_v28, 1  ;;  %v6933_v39 = vadd.f32 %v9582_v14, %v9573_v55  ;;  %v3948_v3 = vshrl.u32 %v9664_v2, 16  ;;  %v3068_v18 = vadd.f32 %v9301_v53, %v3032_v1 }
 0x234   : > { %v9685_v0 = vsel %vm1107_vm10, %v3941_v42, %v3945_v17  ;;  %7639 = vmatprep.subr.bf16.mxu0 %v9669_v57  ;;  %v3356_v10 = vrot.slane %v3354_v48, 7  ;;  %v3099_v45 = vmax.f32 %v3067_v63, 0.0  ;;  %v3950_v47 = vshll.u32 %v9664_v2, 16  ;;  %v9694_v60 = vpop.f32.mrf.mxu0  ;;  %v9704_v42 = vld [vmem:[#allocation2 + $0x5c] ss:$0 sps:$4 sm:$0x11]  }
 0x235   : > { %4540 = vmatprep.mubr.bf16.mxu1 %v9685_v0  ;;  %v9698_v15 = vsel %vm1396_vm9, %v4181_v34, %v4182_v11  ;;  %v2967_v55 = vadd.f32 %v6933_v39, %v2966_v35  ;;  %v3955_v14 = vshll.u32 %v9653_v44, 16  ;;  %v6936_v16 = vadd.f32 %v9607_v56, %v9603_v20  ;;  %v3656_v44 = vld [vmem:[#allocation2 + $0x58] sm:$0xf] }
 0x236   : > { %4541 = vmatmul.mubr.bf16.gmra.mxu1 %v9605_v58  ;;  %v3359_v33 = vor.u32 %v3357_v59, %v3356_v10  ;;  %v3361_v17 = vrot.slane %v3356_v10, 4  ;;  %v6569_v5 = vpack.c.bf16 %v3099_v45, %v3099_v45  ;;  %v3100_v7 = vmax.f32 %v3068_v18, 0.0  ;;  %7568 = vmatmul.mubr.bf16.gmra.mxu0 %v9698_v15  ;;  %v9706_v28 = vpop.f32.mrf.mxu0  ;;  %v3655_v18 = vld [vmem:[#allocation2 + $0x54] sm:$0xf] }
 0x237   : > { %v3033_v11 = vadd.f32 %v2967_v55, %v9250_v12  ;;  %v3952_v48 = vrot.slane %v3950_v47, 1  ;;  %v3957_v35 = vrot.slane %v3955_v14, 1  ;;  %v2970_v63 = vadd.f32 %v6936_v16, %v2969_v36  ;;  %v3702_v47 = vld [vmem:[#allocation2 + $0x54] sm:$0xe] }
 0x238   : > { %v3360_v20 = vsel %vm8140_vm7, %v3352_v32, %v3359_v33  ;;  %v3590_v56 = vsel %vm8110_vm2, %v3361_v17, %v3589_v21  ;;  %v3363_v59 = vshrl.u32 %v6569_v5, 16  ;;  %v3366_v1 = vshll.u32 %v6569_v5, 16  ;;  %v9713_v34 = vpop.f32.mrf.mxu0  ;;  %v3592_v33 = vld [vmem:[#allocation2 + $0x78] sm:$0xf] }
 0x239   : > { %3588 = vst [vmem:[#allocation2 + $0x70] sm:$0xf] %v3360_v20  ;;  %3591 = vst [vmem:[#allocation2 + $0x74] sm:$0x1] %v3590_v56  ;;  %v6570_v39 = vpack.c.bf16 %v3100_v7, %v3100_v7  ;;  %v3069_v10 = vadd.f32 %v9301_v53, %v3033_v11  ;;  %v3953_v12 = vor.u32 %v3952_v48, %v3948_v3  ;;  %v4185_v21 = vrot.slane %v9704_v42, 1 }
 0x23a   : > { %v3034_v45 = vadd.f32 %v2970_v63, %v9331_v26  ;;  %v3365_v55 = vrot.slane %v3363_v59, 7  ;;  %v9717_v14 = vcombine.low %v3655_v18, %v3656_v44  ;;  %v6336_v32 = vcombine.low %v3702_v47, %v3656_v44  ;;  %v9720_v16 = vpop.f32.mrf.mxu0 }
 0x23b   : > { %v3371_v17 = vshrl.u32 %v6570_v39, 16  ;;  %v3374_v5 = vshll.u32 %v6570_v39, 16  ;;  %v3101_v36 = vmax.f32 %v3069_v10, 0.0  ;;  %v9723_v7 = vsel %vm1107_vm10, %v3953_v12, %v3957_v35 }
 0x23c   : > { %10670 = vst [vmem:[#allocation4_spill] sm:$0xff] %v9717_v14  ;;  %10671 = vst [vmem:[#allocation3_spill] sm:$0xff] %v9723_v7  ;;  %v3368_v3 = vor.u32 %v3366_v1, %v3365_v55  ;;  %v3369_v11 = vrot.slane %v3365_v55, 4  ;;  %4548 = vmatprep.mubr.bf16.mxu1 %v9723_v7  ;;  %v3070_v26 = vadd.f32 %v9301_v53, %v3034_v45  ;;  %v4184_v48 = vrot.slane %v6336_v32, 1  ;;  %v9727_v63 = vpop.f32.mrf.mxu0  ;;  %v3596_v1 = vld [vmem:[#allocation2 + $0x80] sm:$0x1] }
 0x23d   : > { %v3373_v44 = vrot.slane %v3371_v17, 7  ;;  %v6571_v20 = vpack.c.bf16 %v3101_v36, %v3101_v36  ;;  %v6939_v56 = vadd.f32 %v9637_v62, %v9618_v13  ;;  %v3960_v59 = vshrl.u32 %v9717_v14, 16  ;;  %v9740_v13 = vpop.f32.mrf.mxu1 }
 0x23e   : > { %4549 = vmatmul.mubr.bf16.gmra.mxu1 %v9664_v2  ;;  %v3593_v35 = vsel %vm8149_vm8, %v3368_v3, %v3592_v33  ;;  %v3102_v39 = vmax.f32 %v3070_v26, 0.0  ;;  %v9736_v10 = vsel %vm1396_vm9, %v4184_v48, %v4185_v21  ;;  %v3962_v12 = vshll.u32 %v9717_v14, 16  ;;  %v9744_v36 = vpop.f32.mrf.mxu0  ;;  %v3658_v48 = vld [vmem:[#allocation2 + $0x64] sm:$0xf] }
 0x23f   : > { %3594 = vst [vmem:[#allocation2 + $0x78] sm:$0xf] %v3593_v35  ;;  %v3376_v45 = vor.u32 %v3374_v5, %v3373_v44  ;;  %v3378_v18 = vrot.slane %v3373_v44, 4  ;;  %v3380_v47 = vshrl.u32 %v6571_v20, 16  ;;  %v3383_v55 = vshll.u32 %v6571_v20, 16  ;;  %7571 = vmatprep.mubr.bf16.mxu0 %v9736_v10 }
 0x240   : > { %v6572_v62 = vpack.c.bf16 %v3102_v39, %v3102_v39  ;;  %v2975_v32 = vadd.f32 %v9616_v25, %v6939_v56  ;;  %v3964_v33 = vrot.slane %v3962_v12, 1  ;;  %v3967_v17 = vshll.u32 %v9704_v42, 16  ;;  %v7872_v44 = vld [vmem:[#allocation2 + $0x68] ss:$0 sps:$4 sm:$0x11]   ;;  %v10672_v42 = vld [vmem:[#allocation6_spill] sm:$0xff] }
 0x241   : > { %v3377_v21 = vsel %vm8140_vm7, %v3369_v11, %v3376_v45  ;;  %v3597_v5 = vsel %vm8110_vm2, %v3378_v18, %v3596_v1  ;;  %v3382_v3 = vrot.slane %v3380_v47, 7  ;;  %v6942_v26 = vadd.f32 %v9673_v54, %v9660_v50  ;;  %v3599_v25 = vld [vmem:[#allocation2 + $0x84] sm:$0xf]  ;;  %v2982_v1 = vpop.f32.mrf.mxu1  ;;  %v3657_v18 = vld [vmem:[#allocation2 + $0x60] sm:$0xf] }
 0x242   : > { %3595 = vst [vmem:[#allocation2 + $0x7c] sm:$0xf] %v3377_v21  ;;  %3598 = vst [vmem:[#allocation2 + $0x80] sm:$0x1] %v3597_v5  ;;  %v3388_v20 = vshrl.u32 %v6572_v62, 16  ;;  %v3391_v56 = vshll.u32 %v6572_v62, 16  ;;  %v3035_v35 = vadd.f32 %v2975_v32, %v10672_v42  ;;  %v3965_v39 = vor.u32 %v3964_v33, %v3960_v59  ;;  %v9757_v5 = vpop.f32.mrf.mxu0 }
 0x243   : > { %v3385_v12 = vor.u32 %v3383_v55, %v3382_v3  ;;  %v3386_v2 = vrot.slane %v3382_v3, 4  ;;  %v3969_v11 = vrot.slane %v3967_v17, 1  ;;  %v2978_v45 = vadd.f32 %v9680_v23, %v6942_v26  ;;  %v3703_v47 = vld [vmem:[#allocation2 + $0x60] sm:$0xe]  ;;  %v3603_v59 = vld [vmem:[#allocation2 + $0x8c] sm:$0x1]  ;;  %v9768_v42 = vpop.f32.mrf.mxu1 }
 0x244   : > { %v3390_v7 = vrot.slane %v3388_v20, 7  ;;  %v3071_v50 = vadd.f32 %v9301_v53, %v3035_v35  ;;  %v9755_v54 = vcombine.low %v3657_v18, %v3658_v48  ;;  %v6337_v21 = vcombine.low %v3703_v47, %v3658_v48  ;;  %v10674_v32 = vld [vmem:[#allocation7_spill] sm:$0xff]  ;;  %v9781_v18 = vld [vmem:[#allocation2 + $0x74] ss:$0 sps:$4 sm:$0x11]   ;;  %v9783_v47 = vpop.f32.mrf.mxu0 }
 0x245   : > { %v3600_v62 = vsel %vm8149_vm8, %v3385_v12, %v3599_v25  ;;  %v9762_v55 = vsel %vm1107_vm10, %v3965_v39, %v3969_v11  ;;  %v3036_v23 = vadd.f32 %v2978_v45, %v10674_v32  ;;  %v4188_v33 = vrot.slane %v7872_v44, 1  ;;  %v3660_v12 = vld [vmem:[#allocation2 + $0x70] sm:$0xf] }
 0x246   : > { %10673 = vst [vmem:[#allocation6_spill] sm:$0xff] %v9762_v55  ;;  %3601 = vst [vmem:[#allocation2 + $0x84] sm:$0xf] %v3600_v62  ;;  %v3393_v17 = vor.u32 %v3391_v56, %v3390_v7  ;;  %v3395_v3 = vrot.slane %v3390_v7, 4  ;;  %v3103_v26 = vmax.f32 %v3071_v50, 0.0  ;;  %4556 = vmatprep.mubr.bf16.mxu1 %v9762_v55  ;;  %v4187_v20 = vrot.slane %v6337_v21, 1 }
 0x247   : > { %4557 = vmatmul.mubr.bf16.gmra.mxu1 %v9717_v14  ;;  %v3072_v48 = vadd.f32 %v9301_v53, %v3036_v23  ;;  %v6945_v25 = vadd.f32 %v9694_v60, %v9682_v9  ;;  %v3972_v35 = vshrl.u32 %v9755_v54, 16  ;;  %v3974_v39 = vshll.u32 %v9755_v54, 16 }
 0x248   : > { %v3394_v7 = vsel %vm8140_vm7, %v3386_v2, %v3393_v17  ;;  %v3604_v56 = vsel %vm8110_vm2, %v3395_v3, %v3603_v59  ;;  %v6573_v11 = vpack.c.bf16 %v3103_v26, %v3103_v26  ;;  %v9779_v45 = vsel %vm1396_vm9, %v4187_v20, %v4188_v33  ;;  %v3659_v2 = vld [vmem:[#allocation2 + $0x6c] sm:$0xf]  ;;  %v10675_v17 = vld [vmem:[#allocation8_spill] sm:$0xff]  ;;  %v2985_v26 = vpop.f32.mrf.mxu1 }
 0x249   : > { %3602 = vst [vmem:[#allocation2 + $0x88] sm:$0xf] %v3394_v7  ;;  %3605 = vst [vmem:[#allocation2 + $0x8c] sm:$0x1] %v3604_v56  ;;  %v3104_v9 = vmax.f32 %v3072_v48, 0.0  ;;  %7572 = vmatmul.mubr.bf16.gmra.mxu0 %v9779_v45  ;;  %v2983_v60 = vadd.f32 %v6945_v25, %v2982_v1  ;;  %v3976_v50 = vrot.slane %v3974_v39, 1  ;;  %v6948_v59 = vadd.f32 %v9713_v34, %v9706_v28  ;;  %v9792_v25 = vpop.f32.mrf.mxu0 }
 0x24a   : > { %v3979_v21 = vshll.u32 %v7872_v44, 16  ;;  %v3397_v62 = vshrl.u32 %v6573_v11, 16  ;;  %v3400_v32 = vshll.u32 %v6573_v11, 16  ;;  %v9788_v23 = vcombine.low %v3659_v2, %v3660_v12  ;;  %v3704_v48 = vld [vmem:[#allocation2 + $0x6c] sm:$0xe] }
 0x24b   : > { %v6574_v33 = vpack.c.bf16 %v3104_v9, %v3104_v9  ;;  %v3037_v3 = vadd.f32 %v2983_v60, %v10675_v17  ;;  %v3977_v20 = vor.u32 %v3976_v50, %v3972_v35  ;;  %v2986_v14 = vadd.f32 %v6948_v59, %v2985_v26  ;;  %v3606_v39 = vld [vmem:[#allocation2 + $0x90] sm:$0xf] }
 0x24c   : > { %v3981_v7 = vrot.slane %v3979_v21, 1  ;;  %v3399_v56 = vrot.slane %v3397_v62, 7  ;;  %v6338_v1 = vcombine.low %v3704_v48, %v3660_v12  ;;  %v4191_v44 = vrot.slane %v9781_v18, 1 }
 0x24d   : > { %v3405_v11 = vshrl.u32 %v6574_v33, 16  ;;  %v3408_v55 = vshll.u32 %v6574_v33, 16  ;;  %v3073_v28 = vadd.f32 %v9301_v53, %v3037_v3  ;;  %v3038_v35 = vadd.f32 %v2986_v14, %v9335_v6  ;;  %v3610_v33 = vld [vmem:[#allocation2 + $0x98] sm:$0x1]  ;;  %v9811_v14 = vpop.f32.mrf.mxu0 }
 0x24e   : > { %v9796_v34 = vsel %vm1107_vm10, %v3977_v20, %v3981_v7  ;;  %v3402_v9 = vor.u32 %v3400_v32, %v3399_v56  ;;  %v3403_v60 = vrot.slane %v3399_v56, 4  ;;  %v4190_v50 = vrot.slane %v6338_v1, 1  ;;  %v3662_v1 = vld [vmem:[#allocation2 + $0x7c] sm:$0xf] }
 0x24f   : > { %4564 = vmatprep.mubr.bf16.mxu1 %v9796_v34  ;;  %v3407_v12 = vrot.slane %v3405_v11, 7  ;;  %v3105_v21 = vmax.f32 %v3073_v28, 0.0  ;;  %v6951_v2 = vadd.f32 %v9727_v63, %v9720_v16  ;;  %v3984_v62 = vshrl.u32 %v9788_v23, 16  ;;  %v9822_v28 = vpop.f32.mrf.mxu1 }
 0x250   : > { %4565 = vmatmul.mubr.bf16.gmra.mxu1 %v9755_v54  ;;  %v3607_v59 = vsel %vm8149_vm8, %v3402_v9, %v3606_v39  ;;  %v3074_v32 = vadd.f32 %v9301_v53, %v3038_v35  ;;  %v9808_v17 = vsel %vm1396_vm9, %v4190_v50, %v4191_v44  ;;  %v3986_v6 = vshll.u32 %v9788_v23, 16  ;;  %v3661_v9 = vld [vmem:[#allocation2 + $0x78] sm:$0xf]  ;;  %v10676_v35 = vld [vmem:[#allocation9_spill] sm:$0xff] }
 0x251   : > { %3608 = vst [vmem:[#allocation2 + $0x90] sm:$0xf] %v3607_v59  ;;  %v3410_v3 = vor.u32 %v3408_v55, %v3407_v12  ;;  %v3412_v26 = vrot.slane %v3407_v12, 4  ;;  %v6575_v20 = vpack.c.bf16 %v3105_v21, %v3105_v21  ;;  %7575 = vmatprep.mubr.bf16.mxu0 %v9808_v17  ;;  %v2991_v16 = vadd.f32 %v9740_v13, %v6951_v2  ;;  %v6959_v21 = vpop.f32.mrf.mxu0 }
 0x252   : > { %v3106_v63 = vmax.f32 %v3074_v32, 0.0  ;;  %v3988_v7 = vrot.slane %v3986_v6, 1  ;;  %v3991_v48 = vshll.u32 %v9781_v18, 16  ;;  %v6954_v56 = vadd.f32 %v9757_v5, %v9744_v36  ;;  %v3705_v36 = vld [vmem:[#allocation2 + $0x78] sm:$0xe] }
 0x253   : > { %v3411_v44 = vsel %vm8140_vm7, %v3403_v60, %v3410_v3  ;;  %v3611_v55 = vsel %vm8110_vm2, %v3412_v26, %v3610_v33  ;;  %v3414_v39 = vshrl.u32 %v6575_v20, 16  ;;  %v3417_v11 = vshll.u32 %v6575_v20, 16  ;;  %v7880_v5 = vld [vmem:[#allocation2 + $0x80] ss:$0 sps:$4 sm:$0x11]  }
 0x254   : > { %3609 = vst [vmem:[#allocation2 + $0x94] sm:$0xf] %v3411_v44  ;;  %3612 = vst [vmem:[#allocation2 + $0x98] sm:$0x1] %v3611_v55  ;;  %v6576_v13 = vpack.c.bf16 %v3106_v63, %v3106_v63  ;;  %v3039_v18 = vadd.f32 %v2991_v16, %v10676_v35  ;;  %v3989_v50 = vor.u32 %v3988_v7, %v3984_v62  ;;  %v3993_v12 = vrot.slane %v3991_v48, 1  ;;  %v10677_v63 = vld [vmem:[#allocation10_spill] sm:$0xff]  ;;  %v2998_v48 = vpop.f32.mrf.mxu1 }
 0x255   : > { %v3416_v2 = vrot.slane %v3414_v39, 7  ;;  %v2994_v60 = vadd.f32 %v9768_v42, %v6954_v56  ;;  %v9826_v59 = vcombine.low %v3661_v9, %v3662_v1  ;;  %v6339_v33 = vcombine.low %v3705_v36, %v3662_v1  ;;  %v3613_v32 = vld [vmem:[#allocation2 + $0x9c] sm:$0xf]  ;;  %v6961_v39 = vpop.f32.mrf.mxu0 }
 0x256   : > { %v3422_v6 = vshrl.u32 %v6576_v13, 16  ;;  %v3425_v3 = vshll.u32 %v6576_v13, 16  ;;  %v3075_v26 = vadd.f32 %v9301_v53, %v3039_v18  ;;  %v9830_v20 = vsel %vm1107_vm10, %v3989_v50, %v3993_v12 }
 0x257   : > { %v3419_v16 = vor.u32 %v3417_v11, %v3416_v2  ;;  %v3420_v62 = vrot.slane %v3416_v2, 4  ;;  %4572 = vmatprep.mubr.bf16.mxu1 %v9830_v20  ;;  %v3040_v7 = vadd.f32 %v2994_v60, %v10677_v63  ;;  %v4193_v44 = vrot.slane %v6339_v33, 1  ;;  %v3617_v11 = vld [vmem:[#allocation2 + $0xa4] sm:$0x1] }
 0x258   : > { %v3424_v42 = vrot.slane %v3422_v6, 7  ;;  %v3107_v56 = vmax.f32 %v3075_v26, 0.0  ;;  %4573 = vmatmul.mubr.bf16.gmra.mxu1 %v9788_v23  ;;  %v4194_v1 = vrot.slane %v7880_v5, 1  ;;  %v6957_v55 = vadd.f32 %v9792_v25, %v9783_v47  ;;  %v9846_v47 = vpop.f32.mrf.mxu1  ;;  %v3664_v6 = vld [vmem:[#allocation2 + $0x88] sm:$0xf] }
 0x259   : > { %v3614_v9 = vsel %vm8149_vm8, %v3419_v16, %v3613_v32  ;;  %v3076_v13 = vadd.f32 %v9301_v53, %v3040_v7  ;;  %v3996_v35 = vshrl.u32 %v9826_v59, 16  ;;  %v3998_v18 = vshll.u32 %v9826_v59, 16  ;;  %v3663_v7 = vld [vmem:[#allocation2 + $0x84] sm:$0xf] }
 0x25a   : > { %3615 = vst [vmem:[#allocation2 + $0x9c] sm:$0xf] %v3614_v9  ;;  %v3427_v50 = vor.u32 %v3425_v3, %v3424_v42  ;;  %v3429_v12 = vrot.slane %v3424_v42, 4  ;;  %v6577_v36 = vpack.c.bf16 %v3107_v56, %v3107_v56  ;;  %v9843_v2 = vsel %vm1396_vm9, %v4193_v44, %v4194_v1  ;;  %v6962_v44 = vpop.f32.mrf.mxu0 }
 0x25b   : > { %v3108_v60 = vmax.f32 %v3076_v13, 0.0  ;;  %7576 = vmatmul.mubr.bf16.gmra.mxu0 %v9843_v2  ;;  %v2999_v25 = vadd.f32 %v6957_v55, %v2998_v48  ;;  %v4000_v33 = vrot.slane %v3998_v18, 1  ;;  %v4003_v32 = vshll.u32 %v7880_v5, 16  ;;  %v3706_v55 = vld [vmem:[#allocation2 + $0x84] sm:$0xe] }
 0x25c   : > { %v3428_v26 = vsel %vm8140_vm7, %v3420_v62, %v3427_v50  ;;  %v3618_v3 = vsel %vm8110_vm2, %v3429_v12, %v3617_v11  ;;  %v3431_v16 = vshrl.u32 %v6577_v36, 16  ;;  %v3434_v63 = vshll.u32 %v6577_v36, 16  ;;  %v7885_v5 = vld [vmem:[#allocation2 + $0x8c] ss:$0 sps:$4 sm:$0x11]  }
 0x25d   : > { %3616 = vst [vmem:[#allocation2 + $0xa0] sm:$0xf] %v3428_v26  ;;  %3619 = vst [vmem:[#allocation2 + $0xa4] sm:$0x1] %v3618_v3  ;;  %v6578_v42 = vpack.c.bf16 %v3108_v60, %v3108_v60  ;;  %v3041_v56 = vadd.f32 %v2999_v25, %v9284_v49  ;;  %v4001_v1 = vor.u32 %v4000_v33, %v3996_v35  ;;  %v4005_v48 = vrot.slane %v4003_v32, 1  ;;  %v3001_v26 = vpop.f32.mrf.mxu1  ;;  %v6964_v32 = vpop.f32.mrf.mxu0 }
 0x25e   : > { %v3433_v9 = vrot.slane %v3431_v16, 7  ;;  %v6960_v13 = vadd.f32 %v6959_v21, %v9811_v14  ;;  %v9854_v62 = vcombine.low %v3663_v7, %v3664_v6  ;;  %v6340_v18 = vcombine.low %v3706_v55, %v3664_v6  ;;  %v3620_v11 = vld [vmem:[#allocation2 + $0xa8] sm:$0xf]  ;;  %v3624_v7 = vld [vmem:[#allocation2 + $0xb0] sm:$0x1] }
 0x25f   : > { %v3439_v50 = vshrl.u32 %v6578_v42, 16  ;;  %v3442_v12 = vshll.u32 %v6578_v42, 16  ;;  %v3077_v36 = vadd.f32 %v9301_v53, %v3041_v56  ;;  %v9858_v60 = vsel %vm1107_vm10, %v4001_v1, %v4005_v48 }
 0x260   : > { %v3436_v49 = vor.u32 %v3434_v63, %v3433_v9  ;;  %v3437_v35 = vrot.slane %v3433_v9, 4  ;;  %4580 = vmatprep.mubr.bf16.mxu1 %v9858_v60  ;;  %v3002_v25 = vadd.f32 %v6960_v13, %v3001_v26  ;;  %v4196_v33 = vrot.slane %v6340_v18, 1  ;;  %v9870_v13 = vld [vmem:[#allocation2 + $0x98] ss:$0 sps:$4 sm:$0x11]  }
 0x261   : > { %v3441_v14 = vrot.slane %v3439_v50, 7  ;;  %v3109_v21 = vmax.f32 %v3077_v36, 0.0  ;;  %4581 = vmatmul.mubr.bf16.gmra.mxu1 %v9826_v59  ;;  %v4197_v6 = vrot.slane %v7885_v5, 1  ;;  %v6963_v3 = vadd.f32 %v6962_v44, %v6961_v39  ;;  %v3666_v50 = vld [vmem:[#allocation2 + $0x94] sm:$0xf] }
 0x262   : > { %v3621_v16 = vsel %vm8149_vm8, %v3436_v49, %v3620_v11  ;;  %v3042_v42 = vadd.f32 %v3002_v25, %v9367_v29  ;;  %v4008_v63 = vshrl.u32 %v9854_v62, 16  ;;  %v4010_v56 = vshll.u32 %v9854_v62, 16  ;;  %v6965_v11 = vpop.f32.mrf.mxu0 }
 0x263   : > { %3622 = vst [vmem:[#allocation2 + $0xa8] sm:$0xf] %v3621_v16  ;;  %v3444_v1 = vor.u32 %v3442_v12, %v3441_v14  ;;  %v3446_v48 = vrot.slane %v3441_v14, 4  ;;  %v6579_v55 = vpack.c.bf16 %v3109_v21, %v3109_v21  ;;  %v9868_v9 = vsel %vm1396_vm9, %v4196_v33, %v4197_v6  ;;  %v3707_v6 = vld [vmem:[#allocation2 + $0x90] sm:$0xe] }
 0x264   : > { %v3078_v39 = vadd.f32 %v9301_v53, %v3042_v42  ;;  %7579 = vmatprep.mubr.bf16.mxu0 %v9868_v9  ;;  %v3007_v44 = vadd.f32 %v9822_v28, %v6963_v3  ;;  %v4012_v29 = vrot.slane %v4010_v56, 1  ;;  %v4015_v18 = vshll.u32 %v7885_v5, 16  ;;  %v3665_v28 = vld [vmem:[#allocation2 + $0x90] sm:$0xf] }
 0x265   : > { %v3445_v12 = vsel %vm8140_vm7, %v3437_v35, %v3444_v1  ;;  %v3625_v36 = vsel %vm8110_vm2, %v3446_v48, %v3624_v7  ;;  %v3448_v26 = vshrl.u32 %v6579_v55, 16  ;;  %v3451_v49 = vshll.u32 %v6579_v55, 16  ;;  %v3627_v35 = vld [vmem:[#allocation2 + $0xb4] sm:$0xf] }
 0x266   : > { %3623 = vst [vmem:[#allocation2 + $0xac] sm:$0xf] %v3445_v12  ;;  %3626 = vst [vmem:[#allocation2 + $0xb0] sm:$0x1] %v3625_v36  ;;  %v3110_v25 = vmax.f32 %v3078_v39, 0.0  ;;  %v3043_v33 = vadd.f32 %v3007_v44, %v9292_v40  ;;  %v4013_v14 = vor.u32 %v4012_v29, %v4008_v63  ;;  %v4017_v21 = vrot.slane %v4015_v18, 1 }
 0x267   : > { %v3450_v5 = vrot.slane %v3448_v26, 7  ;;  %v6966_v3 = vadd.f32 %v6965_v11, %v6964_v32  ;;  %v9880_v16 = vcombine.low %v3665_v28, %v3666_v50  ;;  %v6341_v42 = vcombine.low %v3707_v6, %v3666_v50  ;;  %v3668_v39 = vld [vmem:[#allocation2 + $0xa0] sm:$0xf]  ;;  %v7896_v32 = vld [vmem:[#allocation2 + $0xa4] ss:$0 sps:$4 sm:$0x11]  }
 0x268   : > { %v6580_v56 = vpack.c.bf16 %v3110_v25, %v3110_v25  ;;  %v3079_v7 = vadd.f32 %v9301_v53, %v3043_v33  ;;  %v9884_v1 = vsel %vm1107_vm10, %v4013_v14, %v4017_v21  ;;  %v4200_v48 = vrot.slane %v9870_v13, 1  ;;  %v3667_v26 = vld [vmem:[#allocation2 + $0x9c] sm:$0xf] }
 0x269   : > { %v3453_v55 = vor.u32 %v3451_v49, %v3450_v5  ;;  %4588 = vmatprep.mubr.bf16.mxu1 %v9884_v1  ;;  %v3010_v40 = vadd.f32 %v9846_v47, %v6966_v3  ;;  %v4199_v63 = vrot.slane %v6341_v42, 1  ;;  %v4020_v11 = vshrl.u32 %v9880_v16, 16  ;;  %v3708_v14 = vld [vmem:[#allocation2 + $0x9c] sm:$0xe]  ;;  %v3631_v28 = vld [vmem:[#allocation2 + $0xbc] sm:$0x1] }
 0x26a   : > { %v3456_v44 = vshrl.u32 %v6580_v56, 16  ;;  %v3459_v29 = vshll.u32 %v6580_v56, 16  ;;  %v3111_v18 = vmax.f32 %v3079_v7, 0.0  ;;  %4589 = vmatmul.mubr.bf16.gmra.mxu1 %v9854_v62  ;;  %v4022_v47 = vshll.u32 %v9880_v16, 16 }
 0x26b   : > { %v3628_v50 = vsel %vm8149_vm8, %v3453_v55, %v3627_v35  ;;  %v3044_v12 = vadd.f32 %v3010_v40, %v9303_v52  ;;  %v9895_v36 = vsel %vm1396_vm9, %v4199_v63, %v4200_v48  ;;  %v4027_v33 = vshll.u32 %v9870_v13, 16 }
 0x26c   : > { %3629 = vst [vmem:[#allocation2 + $0xb4] sm:$0xf] %v3628_v50  ;;  %v3458_v49 = vrot.slane %v3456_v44, 7  ;;  %v6581_v25 = vpack.c.bf16 %v3111_v18, %v3111_v18  ;;  %7580 = vmatmul.mubr.bf16.gmra.mxu0 %v9895_v36  ;;  %v9900_v21 = vcombine.low %v3667_v26, %v3668_v39  ;;  %v4024_v52 = vrot.slane %v4022_v47, 1 }
 0x26d   : > { %v3080_v6 = vadd.f32 %v9301_v53, %v3044_v12  ;;  %v6342_v3 = vcombine.low %v3708_v14, %v3668_v39  ;;  %v4203_v42 = vrot.slane %v7896_v32, 1  ;;  %v3454_v35 = vrot.slane %v3450_v5, 4  ;;  %v3670_v18 = vld [vmem:[#allocation2 + $0xac] sm:$0xf]  ;;  %v3634_v5 = vld [vmem:[#allocation2 + $0xc0] sm:$0xf] }
 0x26e   : > { %v3461_v56 = vor.u32 %v3459_v29, %v3458_v49  ;;  %v3463_v7 = vrot.slane %v3458_v49, 4  ;;  %v3465_v48 = vshrl.u32 %v6581_v25, 16  ;;  %v4025_v40 = vor.u32 %v4024_v52, %v4020_v11  ;;  %v7902_v12 = vld [vmem:[#allocation2 + $0xb0] ss:$0 sps:$4 sm:$0x11]  }
 0x26f   : > { %v3112_v55 = vmax.f32 %v3080_v6, 0.0  ;;  %v4029_v63 = vrot.slane %v4027_v33, 1  ;;  %v4202_v44 = vrot.slane %v6342_v3, 1  ;;  %v3468_v53 = vshll.u32 %v6581_v25, 16  ;;  %v3669_v49 = vld [vmem:[#allocation2 + $0xa8] sm:$0xf] }
 0x270   : > { %v3462_v13 = vsel %vm8140_vm7, %v3454_v35, %v3461_v56  ;;  %v3632_v50 = vsel %vm8110_vm2, %v3463_v7, %v3631_v28  ;;  %v3467_v26 = vrot.slane %v3465_v48, 7  ;;  %v4034_v47 = vshll.u32 %v9900_v21, 16  ;;  %v3709_v14 = vld [vmem:[#allocation2 + $0xa8] sm:$0xe]  ;;  %v3641_v6 = vld [vmem:[#allocation2] sm:$0xf] }
 0x271   : > { %3630 = vst [vmem:[#allocation2 + $0xb8] sm:$0xf] %v3462_v13  ;;  %3633 = vst [vmem:[#allocation2 + $0xbc] sm:$0x1] %v3632_v50  ;;  %v6582_v39 = vpack.c.bf16 %v3112_v55, %v3112_v55  ;;  %v9908_v29 = vsel %vm1107_vm10, %v4025_v40, %v4029_v63  ;;  %v9911_v11 = vsel %vm1396_vm9, %v4202_v44, %v4203_v42  ;;  %v4039_v25 = vshll.u32 %v7896_v32, 16 }
 0x272   : > { %v3470_v33 = vor.u32 %v3468_v53, %v3467_v26  ;;  %4596 = vmatprep.mubr.bf16.mxu1 %v9908_v29  ;;  %7583 = vmatprep.mubr.bf16.mxu0 %v9911_v11  ;;  %v9916_v28 = vcombine.low %v3669_v49, %v3670_v18  ;;  %v4032_v3 = vshrl.u32 %v9900_v21, 16  ;;  %v4036_v42 = vrot.slane %v4034_v47, 1  ;;  %v9920_v56 = vld [vmem:[#allocation2 + $0x4] sm:$0xf]  ;;  %v3638_v63 = vld [vmem:[#allocation2 + $0xc8] sm:$0x1] }
 0x273   : > { %v3473_v52 = vshrl.u32 %v6582_v39, 16  ;;  %4597 = vmatmul.mubr.bf16.gmra.mxu1 %v9880_v16  ;;  %v6343_v35 = vcombine.low %v3709_v14, %v3670_v18  ;;  %v3476_v48 = vshll.u32 %v6582_v39, 16  ;;  %v4041_v55 = vrot.slane %v4039_v25, 1  ;;  %v9928_v18 = vld [vmem:[#allocation2 + $0x8] ss:$0 sps:$4 sm:$0x11]  }
 0x274   : > { %v3635_v7 = vsel %vm8149_vm8, %v3470_v33, %v3634_v5  ;;  %v4206_v40 = vrot.slane %v7902_v12, 1  ;;  %v4037_v44 = vor.u32 %v4036_v42, %v4032_v3  ;;  %v4046_v50 = vshll.u32 %v9916_v28, 16  ;;  %v3671_v33 = vld [vmem:[#allocation2 + $0xb4] sm:$0xf] }
 0x275   : > { %3636 = vst [vmem:[#allocation2 + $0xc0] sm:$0xf] %v3635_v7  ;;  %v3475_v32 = vrot.slane %v3473_v52, 7  ;;  %v4205_v13 = vrot.slane %v6343_v35, 1  ;;  %v3471_v53 = vrot.slane %v3467_v26, 4  ;;  %v4051_v49 = vshll.u32 %v7902_v12, 16 }
 0x276   : > { %v9926_v47 = vcombine.low %v3641_v6, %v9920_v56  ;;  %v9931_v5 = vsel %vm1107_vm10, %v4037_v44, %v4041_v55  ;;  %v3710_v25 = vld [vmem:[#allocation2 + $0xb4] sm:$0xe]  ;;  %v4044_v26 = vshrl.u32 %v9916_v28, 16  ;;  %v4048_v12 = vrot.slane %v4046_v50, 1 }
 0x277   : > { %v3478_v14 = vor.u32 %v3476_v48, %v3475_v32  ;;  %v3480_v38 = vrot.slane %v3475_v32, 4  ;;  %v9934_v39 = vsel %vm1396_vm9, %v4205_v13, %v4206_v40  ;;  %4604 = vmatprep.mubr.bf16.mxu1 %v9931_v5  ;;  %v4053_v55 = vrot.slane %v4051_v49, 1 }
 0x278   : > { %7584 = vmatmul.mubr.bf16.gmra.mxu0 %v9934_v39  ;;  %v3672_v6 = vld [vmem:[#allocation2 + $0xb8] sm:$0xf]  ;;  %v7907_v35 = vld [vmem:[#allocation2 + $0xbc] ss:$0 sps:$4 sm:$0x11]   ;;  %v4049_v48 = vor.u32 %v4048_v12, %v4044_v26  ;;  %v3878_v40 = vshll.u32 %v9926_v47, 16 }
 0x279   : > { %v3479_v52 = vsel %vm8140_vm7, %v3471_v53, %v3478_v14  ;;  %v3639_v3 = vsel %vm8110_vm2, %v3480_v38, %v3638_v63  ;;  %v9943_v42 = vcombine.low %v3671_v33, %v3672_v6  ;;  %v6344_v7 = vcombine.low %v3710_v25, %v3672_v6 }
 0x27a   : > { %3637 = vst [vmem:[#allocation2 + $0xc4] sm:$0xf] %v3479_v52  ;;  %3640 = vst [vmem:[#allocation2 + $0xc8] sm:$0x1] %v3639_v3  ;;  %v4209_v44 = vrot.slane %v7907_v35, 1  ;;  %v9949_v13 = vsel %vm1107_vm10, %v4049_v48, %v4053_v55  ;;  %v4063_v37 = vshll.u32 %v7907_v35, 16 }
 0x27b   : > { %4605 = vmatmul.mubr.bf16.gmra.mxu1 %v9900_v21  ;;  %v4208_v32 = vrot.slane %v6344_v7, 1  ;;  %v4058_v27 = vshll.u32 %v9943_v42, 16  ;;  %v3876_v63 = vshrl.u32 %v9926_v47, 16  ;;  %v3883_v50 = vshll.u32 %v9928_v18, 16 }
 0x27c   : > { %4612 = vmatprep.mubr.bf16.mxu1 %v9949_v13  ;;  %v4056_v49 = vshrl.u32 %v9943_v42, 16  ;;  %v3880_v38 = vrot.slane %v3878_v40, 1  ;;  %v4065_v25 = vrot.slane %v4063_v37, 1  ;;  %v3673_v26 = vld [vmem:[#allocation2 + $0xc0] sm:$0xf] }
 0x27d   : > { %v9955_v53 = vsel %vm1396_vm9, %v4208_v32, %v4209_v44  ;;  %v4060_v14 = vrot.slane %v4058_v27, 1  ;;  %v3885_v12 = vrot.slane %v3883_v50, 1  ;;  %v3711_v3 = vld [vmem:[#allocation2 + $0xc0] sm:$0xe] }
 0x27e   : > { %7587 = vmatprep.mubr.bf16.mxu0 %v9955_v53  ;;  %v3881_v35 = vor.u32 %v3880_v38, %v3876_v63 }
 0x27f   : > { %v4061_v33 = vor.u32 %v4060_v14, %v4056_v49  ;;  %v3695_v14 = vld [vmem:[#allocation2] sm:$0xe] }
 0x280   : > { %v3886_v37 = vsel %vm1107_vm10, %v3881_v35, %v3885_v12  ;;  %v7933_v35 = vld [vmem:[%s10601_s2 + $0x228] sm:$0xff]  }
 0x281   : > { %v9960_v6 = vsel %vm1107_vm10, %v4061_v33, %v4065_v25  ;;  %v3674_v52 = vld [vmem:[#allocation2 + $0xc4] sm:$0xf]  ;;  %v7913_v48 = vld [vmem:[#allocation2 + $0xc8] ss:$0 sps:$4 sm:$0x11]   ;;  %v6329_v25 = vcombine.low %v3695_v14, %v9920_v56  ;;  %v7934_v14 = vld [vmem:[%s10601_s2 + $0x1d0] sm:$0xff]  }
 0x282   : > { %v9962_v7 = vcombine.low %v3673_v26, %v3674_v52  ;;  %v6345_v55 = vcombine.low %v3711_v3, %v3674_v52  ;;  %v4212_v32 = vrot.slane %v7913_v48, 1  ;;  %v4075_v27 = vshll.u32 %v7913_v48, 16  ;;  %v7928_v3 = vld [vmem:[%s10601_s2 + $0x230] sm:$0xff]   ;;  %v7926_v48 = vld [vmem:[%s10601_s2 + $0x1e8] sm:$0xff]  }
 0x283   : > { %4613 = vmatmul.mubr.bf16.gmra.mxu1 %v9916_v28  ;;  %v4163_v12 = vrot.slane %v6329_v25, 1  ;;  %v4164_v52 = vrot.slane %v9928_v18, 1  ;;  %v7941_v18 = vld [vmem:[%s10601_s2 + $0x218] sm:$0xff]   ;;  %v7937_v25 = vld [vmem:[%s10601_s2 + $0x188] sm:$0xff]  }
 0x284   : > { %4620 = vmatprep.mubr.bf16.mxu1 %v9960_v6  ;;  %v4211_v40 = vrot.slane %v6345_v55, 1  ;;  %v4070_v44 = vshll.u32 %v9962_v7, 16  ;;  %v4068_v63 = vshrl.u32 %v9962_v7, 16  ;;  %v4077_v33 = vrot.slane %v4075_v27, 1  ;;  %v7942_v55 = vld [vmem:[%s10601_s2 + $0x210] sm:$0xff]   ;;  %v7931_v27 = vld [vmem:[%s10601_s2 + $0x1d8] sm:$0xff]  }
 0x285   : > { %v4165_v56 = vsel %vm1396_vm9, %v4163_v12, %v4164_v52  ;;  %v7939_v12 = vld [vmem:[%s10601_s2 + $0x1c0] sm:$0xff]  }
 0x286   : > { %v9969_v50 = vsel %vm1396_vm9, %v4211_v40, %v4212_v32  ;;  %v4072_v49 = vrot.slane %v4070_v44, 1  ;;  %v7929_v40 = vld [vmem:[%s10601_s2 + $0x1e0] sm:$0xff]   ;;  %v7943_v32 = vld [vmem:[%s10601_s2 + $0x208] sm:$0xff]  }
 0x287   : > { %7588 = vmatmul.mubr.bf16.gmra.mxu0 %v9969_v50  ;;  %v7930_v44 = vld [vmem:[%s10601_s2 + $0x1a0] sm:$0xff]  }
 0x288   : > { %v4073_v38 = vor.u32 %v4072_v49, %v4068_v63  ;;  %4974 = vmatprep.mubr.bf16.mxu0 %v3886_v37  ;;  %v7944_v37 = vld [vmem:[%s10601_s2 + $0x200] sm:$0xff]   ;;  %v7932_v49 = vld [vmem:[%s10601_s2 + $0x198] sm:$0xff]  }
 0x289   : > { %v10678_v63 = vld [vmem:[#allocation12_spill] sm:$0xff] }
 0x28a   : > { %v9975_v26 = vsel %vm1107_vm10, %v4073_v38, %v4077_v33  ;;  %v7935_v38 = vld [vmem:[%s10601_s2 + $0x190] sm:$0xff]   ;;  %v7936_v33 = vld [vmem:[%s10601_s2 + $0x1c8] sm:$0xff]   ;;  %v7940_v52 = vld [vmem:[%s10601_s2 + $0x180] sm:$0xff]  }
 0x28b   : > { %4621 = vmatmul.mubr.bf16.gmra.mxu1 %v9943_v42 }
 0x28c   : > { %4628 = vmatprep.mubr.bf16.mxu1 %v9975_v26 }
 0x28f   : > { %4975 = vmatmul.mubr.bf16.vlgmr.msra.gmra.mxu0 %v9926_v47  ;;  %v7938_v47 = vld [vmem:[%s10601_s2 + $0x220] sm:$0xff]  }
 0x290   : > { %4982 = vmatprep.mubr.bf16.mxu0 %v9422_v46  ;;  %7640 = vmatpush3.bf16.msra.mxu0 %v9669_v57  ;;  %v7922_v46 = vld [vmem:[%s10601_s2 + $0x1b8] sm:$0xff]   ;;  %v7924_v57 = vld [vmem:[%s10601_s2 + $0x1f0] sm:$0xff]  }
 0x291   : > { %7641 = vmatprep.subr.bf16.mxu0 %v7928_v3 }
 0x293   : > { %4629 = vmatmul.mubr.bf16.gmra.mxu1 %v9962_v7 }
 0x294   : > { %7607 = vmatprep.mubr.bf16.mxu1 %v4165_v56  ;;  %7642 = vmatpush3.bf16.msra.mxu0 %v7928_v3  ;;  %v10679_v3 = vld [vmem:[#allocation3_spill] sm:$0xff]  ;;  %v10680_v56 = vld [vmem:[#allocation5_spill] sm:$0xff] }
 0x295   : > { %7643 = vmatprep.subr.bf16.mxu0 %v7933_v35 }
 0x297   : > { %4983 = vmatmul.mubr.bf16.gmra.mxu0 %v9382_v4  ;;  %v7925_v4 = vld [vmem:[%s10601_s2 + $0x1b0] sm:$0xff]  }
 0x298   : > { %4990 = vmatprep.mubr.bf16.mxu0 %v9491_v8  ;;  %7644 = vmatpush3.bf16.msra.mxu0 %v7933_v35  ;;  %v10681_v35 = vld [vmem:[#allocation6_spill] sm:$0xff] }
 0x299   : > { %7645 = vmatprep.subr.bf16.mxu0 %v7938_v47 }
 0x29b   : > { %7608 = vmatmul.mubr.bf16.vlgmr.msra.gmra.mxu1 %v9403_v30  ;;  %v7927_v30 = vld [vmem:[%s10601_s2 + $0x1a8] sm:$0xff]  }
 0x29c   : > { %7611 = vmatprep.mubr.bf16.mxu1 %v9441_v41  ;;  %7264 = vmatpush3.bf16.msra.mxu1 %v7922_v46 }
 0x29d   : > { %7265 = vmatprep.subr.bf16.mxu1 %v7924_v57  ;;  %7646 = vmatpush3.bf16.msra.mxu0 %v7938_v47  ;;  %v10682_v47 = vld [vmem:[#allocation4_spill] sm:$0xff] }
 0x29e   : > { %7647 = vmatprep.subr.bf16.mxu0 %v7941_v18 }
 0x29f   : > { %4991 = vmatmul.mubr.bf16.gmra.mxu0 %v9409_v51 }
 0x2a0   : > { %7266 = vmatpush3.bf16.msra.mxu1 %v7925_v4  ;;  %4998 = vmatprep.mubr.bf16.mxu0 %v9547_v43 }
 0x2a1   : > { %7267 = vmatprep.subr.bf16.mxu1 %v7926_v48  ;;  %7648 = vmatpush3.bf16.msra.mxu0 %v7941_v18 }
 0x2a2   : > { %7649 = vmatprep.subr.bf16.mxu0 %v7942_v55 }
 0x2a3   : > { %7612 = vmatmul.mubr.bf16.gmra.mxu1 %v9495_v31 }
 0x2a4   : > { %7615 = vmatprep.mubr.bf16.mxu1 %v9570_v19  ;;  %7268 = vmatpush3.bf16.msra.mxu1 %v7927_v30 }
 0x2a5   : > { %7269 = vmatprep.subr.bf16.mxu1 %v7929_v40  ;;  %7650 = vmatpush3.bf16.msra.mxu0 %v7942_v55 }
 0x2a6   : > { %7651 = vmatprep.subr.bf16.mxu0 %v7943_v32 }
 0x2a7   : > { %4999 = vmatmul.mubr.bf16.gmra.mxu0 %v10678_v63 }
 0x2a8   : > { %5006 = vmatprep.mubr.bf16.mxu0 %v9624_v22  ;;  %7270 = vmatpush3.bf16.msra.mxu1 %v7930_v44 }
 0x2a9   : > { %7271 = vmatprep.subr.bf16.mxu1 %v7931_v27  ;;  %7652 = vmatpush3.bf16.msra.mxu0 %v7943_v32 }
 0x2aa   : > { %7653 = vmatprep.subr.bf16.mxu0 %v7944_v37 }
 0x2ab   : > { %7616 = vmatmul.mubr.bf16.gmra.mxu1 %v9649_v24 }
 0x2ac   : > { %7619 = vmatprep.mubr.bf16.mxu1 %v9698_v15  ;;  %7272 = vmatpush3.bf16.msra.mxu1 %v7932_v49 }
 0x2ad   : > { %7273 = vmatprep.subr.bf16.mxu1 %v7934_v14  ;;  %7654 = vmatpush3.bf16.msra.mxu0 %v7944_v37 }
 0x2af   : > { %5007 = vmatmul.mubr.bf16.gmra.mxu0 %v9541_v61 }
 0x2b0   : > { %5014 = vmatprep.mubr.bf16.mxu0 %v9685_v0  ;;  %7274 = vmatpush3.bf16.msra.mxu1 %v7935_v38 }
 0x2b1   : > { %7275 = vmatprep.subr.bf16.mxu1 %v7936_v33 }
 0x2b3   : > { %7620 = vmatmul.mubr.bf16.gmra.mxu1 %v9736_v10 }
 0x2b4   : > { %7623 = vmatprep.mubr.bf16.mxu1 %v9779_v45  ;;  %7276 = vmatpush3.bf16.msra.mxu1 %v7937_v25 }
 0x2b5   : > { %7277 = vmatprep.subr.bf16.mxu1 %v7939_v12 }
 0x2b7   : > { %5015 = vmatmul.mubr.bf16.gmra.mxu0 %v9605_v58 }
 0x2b8   : > { %5022 = vmatprep.mubr.bf16.mxu0 %v10679_v3  ;;  %7278 = vmatpush3.bf16.msra.mxu1 %v7940_v52 }
 0x2bb   : > { %7624 = vmatmul.mubr.bf16.gmra.mxu1 %v9808_v17 }
 0x2bc   : > { %7627 = vmatprep.mubr.bf16.mxu1 %v9843_v2 }
 0x2bf   : > { %5023 = vmatmul.mubr.bf16.gmra.mxu0 %v10680_v56 }
 0x2c0   : > { %5030 = vmatprep.mubr.bf16.mxu0 %v10681_v35 }
 0x2c3   : > { %7628 = vmatmul.mubr.bf16.gmra.mxu1 %v9868_v9 }
 0x2c4   : > { %7631 = vmatprep.mubr.bf16.mxu1 %v9895_v36 }
 0x2c7   : > { %5031 = vmatmul.mubr.bf16.gmra.mxu0 %v10682_v47 }
 0x2c8   : > { %5038 = vmatprep.mubr.bf16.mxu0 %v9796_v34 }
 0x2cb   : > { %7632 = vmatmul.mubr.bf16.gmra.mxu1 %v9911_v11 }
 0x2cc   : > { %7635 = vmatprep.mubr.bf16.mxu1 %v9934_v39 }
 0x2cf   : > { %5039 = vmatmul.mubr.bf16.gmra.mxu0 %v9755_v54 }
 0x2d0   : > { %5046 = vmatprep.mubr.bf16.mxu0 %v9830_v20 }
 0x2d2   : > { %v7007_v46 = vpop.f32.mrf.mxu1  ;;  %v7561_v57 = vpop.f32.mrf.mxu0 }
 0x2d3   : > { %7636 = vmatmul.mubr.bf16.gmra.mxu1 %v9955_v53 }
 0x2d4   : > { %v7008_v18 = vpop.f32.mrf.mxu1  ;;  %5489 = vmatprep.mubr.bf16.mxu1 %v9491_v8  ;;  %v4671_v48 = vpop.f32.mrf.mxu0 }
 0x2d5   : > { %v7009_v4 = vadd.f32 %v7008_v18, %v7007_v46 }
 0x2d6   : > { %v7010_v55 = vpop.f32.mrf.mxu1  ;;  %v7562_v37 = vpop.f32.mrf.mxu0 }
 0x2d7   : > { %v10083_v30 = vadd.f32 %v7009_v4, %v4671_v48  ;;  %5047 = vmatmul.mubr.bf16.gmra.mxu0 %v9788_v23 }
 0x2d8   : > { %v7011_v40 = vpop.f32.mrf.mxu1  ;;  %5054 = vmatprep.mubr.bf16.mxu0 %v9858_v60  ;;  %v10095_v33 = vpop.f32.mrf.mxu0 }
 0x2d9   : > { %v10087_v32 = vadd.f32 %v7011_v40, %v7010_v55 }
 0x2da   : > { %v7013_v44 = vpop.f32.mrf.mxu1 }
 0x2db   : > { %5490 = vmatmul.mubr.bf16.vlgmr.msra.gmra.mxu1 %v9409_v51 }
 0x2dc   : > { %5497 = vmatprep.mubr.bf16.mxu1 %v9547_v43  ;;  %v7014_v27 = vpop.f32.mrf.mxu1 }
 0x2dd   : > { %v7015_v8 = vadd.f32 %v7014_v27, %v7013_v44 }
 0x2de   : > { %v7016_v49 = vpop.f32.mrf.mxu1 }
 0x2df   : > { %v10091_v14 = vadd.f32 %v7561_v57, %v7015_v8  ;;  %5055 = vmatmul.mubr.bf16.gmra.mxu0 %v9826_v59 }
 0x2e0   : > { %5062 = vmatprep.mubr.bf16.mxu0 %v9884_v1  ;;  %v7017_v38 = vpop.f32.mrf.mxu1 }
 0x2e1   : > { %v7018_v25 = vadd.f32 %v7017_v38, %v7016_v49 }
 0x2e2   : > { %v7019_v12 = vpop.f32.mrf.mxu1 }
 0x2e3   : > { %5498 = vmatmul.mubr.bf16.gmra.mxu1 %v10678_v63  ;;  %v10098_v51 = vadd.f32 %v7562_v37, %v7018_v25  ;;  %v7565_v43 = vpop.f32.mrf.mxu0 }
 0x2e4   : > { %5505 = vmatprep.mubr.bf16.mxu1 %v9624_v22  ;;  %v7020_v52 = vpop.f32.mrf.mxu1 }
 0x2e5   : > { %v7021_v46 = vadd.f32 %v7020_v52, %v7019_v12  ;;  %v4687_v57 = vpop.f32.mrf.mxu0 }
 0x2e6   : > { %v7022_v18 = vpop.f32.mrf.mxu1 }
 0x2e7   : > { %5063 = vmatmul.mubr.bf16.gmra.mxu0 %v9854_v62  ;;  %v10102_v4 = vadd.f32 %v7021_v46, %v4687_v57  ;;  %v7566_v22 = vpop.f32.mrf.mxu0 }
 0x2e8   : > { %5070 = vmatprep.mubr.bf16.mxu0 %v9908_v29  ;;  %v7023_v48 = vpop.f32.mrf.mxu1 }
 0x2e9   : > { %v10105_v55 = vadd.f32 %v7023_v48, %v7022_v18  ;;  %v10114_v49 = vpop.f32.mrf.mxu0 }
 0x2eb   : > { %5506 = vmatmul.mubr.bf16.gmra.mxu1 %v9541_v61 }
 0x2ec   : > { %5513 = vmatprep.mubr.bf16.mxu1 %v9685_v0 }
 0x2ee   : > { %v7025_v63 = vpop.f32.mrf.mxu1 }
 0x2ef   : > { %5071 = vmatmul.mubr.bf16.gmra.mxu0 %v9880_v16 }
 0x2f0   : > { %v7026_v40 = vpop.f32.mrf.mxu1  ;;  %5078 = vmatprep.mubr.bf16.mxu0 %v9931_v5 }
 0x2f1   : > { %v7027_v44 = vadd.f32 %v7026_v40, %v7025_v63 }
 0x2f2   : > { %v7028_v27 = vpop.f32.mrf.mxu1 }
 0x2f3   : > { %v10111_v37 = vadd.f32 %v7565_v43, %v7027_v44  ;;  %5514 = vmatmul.mubr.bf16.gmra.mxu1 %v9605_v58 }
 0x2f4   : > { %v7029_v8 = vpop.f32.mrf.mxu1  ;;  %5521 = vmatprep.mubr.bf16.mxu1 %v10679_v3 }
 0x2f5   : > { %v7030_v61 = vadd.f32 %v7029_v8, %v7028_v27 }
 0x2f6   : > { %v7031_v0 = vpop.f32.mrf.mxu1  ;;  %v7569_v25 = vpop.f32.mrf.mxu0 }
 0x2f7   : > { %v10117_v38 = vadd.f32 %v7566_v22, %v7030_v61  ;;  %5079 = vmatmul.mubr.bf16.gmra.mxu0 %v9900_v21 }
 0x2f8   : > { %v7032_v12 = vpop.f32.mrf.mxu1  ;;  %5086 = vmatprep.mubr.bf16.mxu0 %v9949_v13  ;;  %v4703_v43 = vpop.f32.mrf.mxu0 }
 0x2f9   : > { %v7033_v52 = vadd.f32 %v7032_v12, %v7031_v0 }
 0x2fa   : > { %v7034_v46 = vpop.f32.mrf.mxu1  ;;  %v7570_v44 = vpop.f32.mrf.mxu0 }
 0x2fb   : > { %v10121_v57 = vadd.f32 %v7033_v52, %v4703_v43  ;;  %5522 = vmatmul.mubr.bf16.gmra.mxu1 %v10680_v56 }
 0x2fc   : > { %v7035_v58 = vpop.f32.mrf.mxu1  ;;  %5529 = vmatprep.mubr.bf16.mxu1 %v10681_v35  ;;  %v10135_v8 = vpop.f32.mrf.mxu0 }
 0x2fd   : > { %v10125_v3 = vadd.f32 %v7035_v58, %v7034_v46 }
 0x2fe   : > { %v7037_v18 = vpop.f32.mrf.mxu1 }
 0x2ff   : > { %5087 = vmatmul.mubr.bf16.gmra.mxu0 %v9916_v28 }
 0x300   : > { %v7038_v48 = vpop.f32.mrf.mxu1  ;;  %5094 = vmatprep.mubr.bf16.mxu0 %v9960_v6 }
 0x301   : > { %v7039_v63 = vadd.f32 %v7038_v48, %v7037_v18 }
 0x302   : > { %v7040_v40 = vpop.f32.mrf.mxu1 }
 0x303   : > { %v10129_v22 = vadd.f32 %v7569_v25, %v7039_v63  ;;  %5530 = vmatmul.mubr.bf16.gmra.mxu1 %v10682_v47 }
 0x304   : > { %v7041_v27 = vpop.f32.mrf.mxu1  ;;  %5537 = vmatprep.mubr.bf16.mxu1 %v9796_v34 }
 0x305   : > { %v7042_v56 = vadd.f32 %v7041_v27, %v7040_v40 }
 0x307   : > { %v10133_v35 = vadd.f32 %v7570_v44, %v7042_v56  ;;  %v7043_v61 = vpop.f32.mrf.mxu1  ;;  %5095 = vmatmul.mubr.bf16.gmra.mxu0 %v9943_v42 }
 0x308   : > { %7655 = vmatprep.mubr.bf16.mxu0 %v9441_v41 }
 0x309   : > { %v7044_v0 = vpop.f32.mrf.mxu1  ;;  %v7573_v12 = vpop.f32.mrf.mxu0 }
 0x30a   : > { %v7045_v25 = vadd.f32 %v7044_v0, %v7043_v61 }
 0x30b   : > { %5538 = vmatmul.mubr.bf16.gmra.mxu1 %v9755_v54  ;;  %v7046_v52 = vpop.f32.mrf.mxu1  ;;  %v4719_v47 = vpop.f32.mrf.mxu0 }
 0x30c   : > { %5545 = vmatprep.mubr.bf16.mxu1 %v9830_v20  ;;  %v10141_v34 = vadd.f32 %v7045_v25, %v4719_v47 }
 0x30d   : > { %v7047_v43 = vpop.f32.mrf.mxu1  ;;  %v7574_v46 = vpop.f32.mrf.mxu0 }
 0x30e   : > { %v7048_v58 = vadd.f32 %v7047_v43, %v7046_v52 }
 0x30f   : > { %v4722_v48 = vpop.f32.mrf.mxu0  ;;  %7656 = vmatmul.mubr.bf16.vlgmr.msra.gmra.mxu0 %v9495_v31 }
 0x310   : > { %v7049_v18 = vpop.f32.mrf.mxu1  ;;  %v10144_v63 = vadd.f32 %v7048_v58, %v4722_v48  ;;  %7659 = vmatprep.mubr.bf16.mxu0 %v9570_v19 }
 0x312   : > { %v7050_v41 = vpop.f32.mrf.mxu1 }
 0x313   : > { %v7051_v40 = vadd.f32 %v7050_v41, %v7049_v18  ;;  %5546 = vmatmul.mubr.bf16.gmra.mxu1 %v9788_v23 }
 0x314   : > { %v7052_v54 = vpop.f32.mrf.mxu1  ;;  %5553 = vmatprep.mubr.bf16.mxu1 %v9858_v60 }
 0x315   : > { %v10149_v20 = vadd.f32 %v7573_v12, %v7051_v40 }
 0x316   : > { %v7053_v44 = vpop.f32.mrf.mxu1 }
 0x317   : > { %v7054_v27 = vadd.f32 %v7053_v44, %v7052_v54  ;;  %7660 = vmatmul.mubr.bf16.gmra.mxu0 %v9649_v24 }
 0x318   : > { %v7055_v31 = vpop.f32.mrf.mxu1  ;;  %7663 = vmatprep.mubr.bf16.mxu0 %v9698_v15 }
 0x319   : > { %v10152_v56 = vadd.f32 %v7574_v46, %v7054_v27 }
 0x31a   : > { %v7056_v61 = vpop.f32.mrf.mxu1 }
 0x31b   : > { %5554 = vmatmul.mubr.bf16.gmra.mxu1 %v9826_v59  ;;  %v7057_v19 = vadd.f32 %v7056_v61, %v7055_v31  ;;  %v7577_v0 = vpop.f32.mrf.mxu0 }
 0x31c   : > { %5561 = vmatprep.mubr.bf16.mxu1 %v9884_v1  ;;  %v7058_v23 = vpop.f32.mrf.mxu1 }
 0x31d   : > { %v4735_v60 = vpop.f32.mrf.mxu0 }
 0x31e   : > { %v10157_v12 = vadd.f32 %v7057_v19, %v4735_v60  ;;  %v7059_v25 = vpop.f32.mrf.mxu1 }
 0x31f   : > { %v7060_v52 = vadd.f32 %v7059_v25, %v7058_v23  ;;  %v7578_v47 = vpop.f32.mrf.mxu0  ;;  %7664 = vmatmul.mubr.bf16.gmra.mxu0 %v9736_v10  ;;  %v3676_v23 = vld [vmem:[#allocation2 + $0xd0] sm:$0xf] }
 0x320   : > { %7667 = vmatprep.mubr.bf16.mxu0 %v9779_v45 }
 0x321   : > { %v7061_v24 = vpop.f32.mrf.mxu1  ;;  %v4738_v15 = vpop.f32.mrf.mxu0 }
 0x322   : > { %v10161_v43 = vadd.f32 %v7060_v52, %v4738_v15  ;;  %v3712_v52 = vld [vmem:[#allocation2 + $0xcc] sm:$0xe] }
 0x323   : > { %5562 = vmatmul.mubr.bf16.gmra.mxu1 %v9854_v62  ;;  %v7062_v59 = vpop.f32.mrf.mxu1 }
 0x324   : > { %5569 = vmatprep.mubr.bf16.mxu1 %v9908_v29  ;;  %v7063_v1 = vadd.f32 %v7062_v59, %v7061_v24  ;;  %v7946_v59 = vld [vmem:[#allocation2 + $0xd4] ss:$0 sps:$4 sm:$0x11]  }
 0x325   : > { %v7064_v46 = vpop.f32.mrf.mxu1 }
 0x326   : > { %v10165_v58 = vadd.f32 %v7577_v0, %v7063_v1  ;;  %v3675_v0 = vld [vmem:[#allocation2 + $0xcc] sm:$0xf]  ;;  %v6346_v1 = vcombine.low %v3712_v52, %v3676_v23 }
 0x327   : > { %v7065_v18 = vpop.f32.mrf.mxu1  ;;  %7668 = vmatmul.mubr.bf16.gmra.mxu0 %v9808_v17 }
 0x328   : > { %v7066_v48 = vadd.f32 %v7065_v18, %v7064_v46  ;;  %7671 = vmatprep.mubr.bf16.mxu0 %v9843_v2 }
 0x32a   : > { %v10169_v10 = vadd.f32 %v7578_v47, %v7066_v48  ;;  %v7067_v45 = vpop.f32.mrf.mxu1  ;;  %v6310_v47 = vcombine.low %v3675_v0, %v3676_v23 }
 0x32b   : > { %5570 = vmatmul.mubr.bf16.gmra.mxu1 %v9880_v16 }
 0x32c   : > { %5577 = vmatprep.mubr.bf16.mxu1 %v9931_v5  ;;  %v7068_v62 = vpop.f32.mrf.mxu1  ;;  %v7581_v41 = vpop.f32.mrf.mxu0  ;;  %v4082_v18 = vshll.u32 %v6310_v47, 16 }
 0x32d   : > { %v7069_v29 = vadd.f32 %v7068_v62, %v7067_v45  ;;  %v4214_v62 = vrot.slane %v6346_v1, 1 }
 0x32e   : > { %v7070_v40 = vpop.f32.mrf.mxu1  ;;  %v4751_v54 = vpop.f32.mrf.mxu0 }
 0x32f   : > { %v10173_v44 = vadd.f32 %v7069_v29, %v4751_v54  ;;  %7672 = vmatmul.mubr.bf16.gmra.mxu0 %v9868_v9  ;;  %v4084_v54 = vrot.slane %v4082_v18, 1 }
 0x330   : > { %v7071_v17 = vpop.f32.mrf.mxu1  ;;  %v7582_v27 = vpop.f32.mrf.mxu0  ;;  %7675 = vmatprep.mubr.bf16.mxu0 %v9895_v36 }
 0x331   : > { %v7072_v2 = vadd.f32 %v7071_v17, %v7070_v40  ;;  %v4080_v40 = vshrl.u32 %v6310_v47, 16 }
 0x332   : > { %v4754_v31 = vpop.f32.mrf.mxu0 }
 0x333   : > { %v7073_v61 = vpop.f32.mrf.mxu1  ;;  %5578 = vmatmul.mubr.bf16.gmra.mxu1 %v9900_v21  ;;  %v10178_v16 = vadd.f32 %v7072_v2, %v4754_v31 }
 0x334   : > { %5585 = vmatprep.mubr.bf16.mxu1 %v9949_v13 }
 0x335   : > { %v7074_v5 = vpop.f32.mrf.mxu1 }
 0x336   : > { %v7075_v19 = vadd.f32 %v7074_v5, %v7073_v61  ;;  %v4085_v61 = vor.u32 %v4084_v54, %v4080_v40 }
 0x337   : > { %v7076_v60 = vpop.f32.mrf.mxu1  ;;  %7676 = vmatmul.mubr.bf16.gmra.mxu0 %v9911_v11 }
 0x338   : > { %v10182_v9 = vadd.f32 %v7581_v41, %v7075_v19  ;;  %v7585_v25 = vpop.f32.mrf.mxu0  ;;  %7679 = vmatprep.mubr.bf16.mxu0 %v9934_v39  ;;  %v4215_v41 = vrot.slane %v7946_v59, 1 }
 0x339   : > { %v7077_v36 = vpop.f32.mrf.mxu1 }
 0x33a   : > { %v7078_v21 = vadd.f32 %v7077_v36, %v7076_v60  ;;  %v4767_v24 = vpop.f32.mrf.mxu0 }
 0x33b   : > { %v7079_v15 = vpop.f32.mrf.mxu1  ;;  %5586 = vmatmul.mubr.bf16.gmra.mxu1 %v9916_v28 }
 0x33c   : > { %v10186_v13 = vadd.f32 %v7582_v27, %v7078_v21  ;;  %5593 = vmatprep.mubr.bf16.mxu1 %v9960_v6  ;;  %v7586_v46 = vpop.f32.mrf.mxu0  ;;  %v4087_v6 = vshll.u32 %v7946_v59, 16 }
 0x33d   : > { %v7080_v11 = vpop.f32.mrf.mxu1 }
 0x33e   : > { %v7081_v48 = vadd.f32 %v7080_v11, %v7079_v15  ;;  %v4770_v29 = vpop.f32.mrf.mxu0 }
 0x33f   : > { %v7082_v45 = vpop.f32.mrf.mxu1  ;;  %7680 = vmatmul.mubr.bf16.gmra.mxu0 %v9955_v53  ;;  %v4216_v53 = vsel %vm1396_vm9, %v4214_v62, %v4215_v41 }
 0x340   : > { %v10190_v39 = vadd.f32 %v7081_v48, %v4767_v24  ;;  %7683 = vmatprep.mubr.bf16.mxu0 %v9969_v50  ;;  %v4089_v50 = vrot.slane %v4087_v6, 1  ;;  %v4675_v6 = vadd.f32 %v10087_v32, %v10095_v33 }
 0x341   : > { %v7083_v28 = vpop.f32.mrf.mxu1 }
 0x342   : > { %v7084_v17 = vadd.f32 %v7083_v28, %v7082_v45  ;;  %v4090_v52 = vsel %vm1107_vm10, %v4085_v61, %v4089_v50 }
 0x343   : > { %v7085_v27 = vpop.f32.mrf.mxu1  ;;  %5594 = vmatmul.mubr.bf16.gmra.mxu1 %v9943_v42 }
 0x344   : > { %v10194_v2 = vadd.f32 %v7084_v17, %v4770_v29  ;;  %5601 = vmatprep.mubr.bf16.mxu1 %v9975_v26 }
 0x345   : > { %v7086_v31 = vpop.f32.mrf.mxu1 }
 0x346   : > { %v7087_v5 = vadd.f32 %v7086_v31, %v7085_v27 }
 0x347   : > { %v7088_v19 = vpop.f32.mrf.mxu1  ;;  %v7589_v0 = vpop.f32.mrf.mxu0  ;;  %7684 = vmatmul.mubr.bf16.gmra.mxu0 %v4216_v53 }
 0x348   : > { %v10198_v23 = vadd.f32 %v7585_v25, %v7087_v5 }
 0x349   : > { %v7089_v60 = vpop.f32.mrf.mxu1  ;;  %v4783_v36 = vpop.f32.mrf.mxu0 }
 0x34a   : > { %v7090_v42 = vadd.f32 %v7089_v60, %v7088_v19 }
 0x34b   : > { %v7091_v21 = vpop.f32.mrf.mxu1  ;;  %5602 = vmatmul.mubr.bf16.gmra.mxu1 %v9962_v7  ;;  %v7590_v26 = vpop.f32.mrf.mxu0 }
 0x34c   : > { %v10202_v24 = vadd.f32 %v7586_v46, %v7090_v42  ;;  %5609 = vmatprep.mubr.bf16.mxu1 %v4090_v52 }
 0x34d   : > { %v7092_v15 = vpop.f32.mrf.mxu1  ;;  %v4786_v59 = vpop.f32.mrf.mxu0 }
 0x34e   : > { %v7093_v1 = vadd.f32 %v7092_v15, %v7091_v21 }
 0x34f   : > { %v7094_v11 = vpop.f32.mrf.mxu1  ;;  %v7143_v18 = vpop.f32.mrf.mxu0 }
 0x350   : > { %v10204_v48 = vadd.f32 %v7093_v1, %v4783_v36 }
 0x351   : > { %v7095_v25 = vpop.f32.mrf.mxu1  ;;  %v7144_v45 = vpop.f32.mrf.mxu0 }
 0x352   : > { %v7096_v62 = vadd.f32 %v7095_v25, %v7094_v11  ;;  %v7145_v41 = vadd.f32 %v7144_v45, %v7143_v18 }
 0x353   : > { %v7097_v28 = vpop.f32.mrf.mxu1  ;;  %5610 = vmatmul.mubr.bf16.gmra.mxu1 %v6310_v47  ;;  %v7146_v29 = vpop.f32.mrf.mxu0 }
 0x354   : > { %v10206_v40 = vadd.f32 %v7096_v62, %v4786_v59  ;;  %v4977_v7 = vadd.f32 %v7145_v41, %v10083_v30 }
 0x355   : > { %v7098_v46 = vpop.f32.mrf.mxu1  ;;  %v7147_v54 = vpop.f32.mrf.mxu0 }
 0x356   : > { %v7099_v17 = vadd.f32 %v7098_v46, %v7097_v28  ;;  %v7148_v27 = vadd.f32 %v7147_v54, %v7146_v29  ;;  %v4691_v46 = vadd.f32 %v10105_v55, %v10114_v49 }
 0x357   : > { %v7100_v53 = vpop.f32.mrf.mxu1  ;;  %v7149_v31 = vpop.f32.mrf.mxu0 }
 0x358   : > { %v10211_v61 = vadd.f32 %v7589_v0, %v7099_v17  ;;  %v4980_v50 = vadd.f32 %v7148_v27, %v4675_v6 }
 0x359   : > { %v7101_v5 = vpop.f32.mrf.mxu1  ;;  %v7150_v19 = vpop.f32.mrf.mxu0 }
 0x35a   : > { %v7102_v47 = vadd.f32 %v7101_v5, %v7100_v53  ;;  %v7151_v60 = vadd.f32 %v7150_v19, %v7149_v31 }
 0x35b   : > { %v7609_v36 = vpop.f32.mrf.mxu1  ;;  %v7152_v52 = vpop.f32.mrf.mxu0 }
 0x35c   : > { %v10213_v42 = vadd.f32 %v7590_v26, %v7102_v47  ;;  %v4985_v30 = vadd.f32 %v7151_v60, %v10091_v14 }
 0x35d   : > { %v5137_v21 = vpop.f32.mrf.mxu1  ;;  %v7153_v15 = vpop.f32.mrf.mxu0 }
 0x35e   : > { %v10216_v32 = vadd.f32 %v5137_v21, %v4977_v7  ;;  %v7154_v33 = vadd.f32 %v7153_v15, %v7152_v52  ;;  %v10218_v59 = vadd.f32 %v7609_v36, %v4985_v30 }
 0x35f   : > { %v7610_v0 = vpop.f32.mrf.mxu1  ;;  %v7155_v1 = vpop.f32.mrf.mxu0 }
 0x360   : > { %v4988_v11 = vadd.f32 %v7154_v33, %v10098_v51 }
 0x361   : > { %v5140_v18 = vpop.f32.mrf.mxu1  ;;  %v7156_v25 = vpop.f32.mrf.mxu0 }
 0x362   : > { %v10221_v45 = vadd.f32 %v5140_v18, %v4980_v50  ;;  %v7157_v62 = vadd.f32 %v7156_v25, %v7155_v1  ;;  %v10223_v26 = vadd.f32 %v7610_v0, %v4988_v11 }
 0x363   : > { %v7613_v41 = vpop.f32.mrf.mxu1  ;;  %v7158_v14 = vpop.f32.mrf.mxu0 }
 0x364   : > { %v4993_v28 = vadd.f32 %v7157_v62, %v10102_v4 }
 0x365   : > { %v5153_v29 = vpop.f32.mrf.mxu1  ;;  %v7159_v7 = vpop.f32.mrf.mxu0 }
 0x366   : > { %v7160_v54 = vadd.f32 %v7159_v7, %v7158_v14  ;;  %v10228_v6 = vadd.f32 %v5153_v29, %v4993_v28  ;;  %v4707_v14 = vadd.f32 %v10125_v3, %v10135_v8 }
 0x367   : > { %v7614_v51 = vpop.f32.mrf.mxu1  ;;  %v7161_v17 = vpop.f32.mrf.mxu0 }
 0x368   : > { %v4996_v27 = vadd.f32 %v7160_v54, %v4691_v46 }
 0x369   : > { %v5156_v53 = vpop.f32.mrf.mxu1  ;;  %v7162_v31 = vpop.f32.mrf.mxu0 }
 0x36a   : > { %v7163_v50 = vadd.f32 %v7162_v31, %v7161_v17  ;;  %v10230_v5 = vadd.f32 %v5156_v53, %v4996_v27 }
 0x36b   : > { %v7617_v19 = vpop.f32.mrf.mxu1  ;;  %v7164_v47 = vpop.f32.mrf.mxu0 }
 0x36c   : > { %v5001_v4 = vadd.f32 %v7163_v50, %v10111_v37 }
 0x36d   : > { %v5169_v60 = vpop.f32.mrf.mxu1  ;;  %v7165_v36 = vpop.f32.mrf.mxu0 }
 0x36e   : > { %v7166_v52 = vadd.f32 %v7165_v36, %v7164_v47  ;;  %v10233_v30 = vadd.f32 %v7613_v41, %v5001_v4 }
 0x36f   : > { %v7618_v55 = vpop.f32.mrf.mxu1  ;;  %v7167_v49 = vpop.f32.mrf.mxu0 }
 0x370   : > { %v5004_v21 = vadd.f32 %v7166_v52, %v10117_v38 }
 0x371   : > { %v5172_v15 = vpop.f32.mrf.mxu1  ;;  %v7168_v33 = vpop.f32.mrf.mxu0 }
 0x372   : > { %v7169_v0 = vadd.f32 %v7168_v33, %v7167_v49  ;;  %v10236_v1 = vadd.f32 %v7614_v51, %v5004_v21 }
 0x373   : > { %v7621_v11 = vpop.f32.mrf.mxu1  ;;  %v7170_v18 = vpop.f32.mrf.mxu0 }
 0x374   : > { %v5009_v25 = vadd.f32 %v7169_v0, %v10121_v57 }
 0x375   : > { %v5185_v62 = vpop.f32.mrf.mxu1  ;;  %v7171_v37 = vpop.f32.mrf.mxu0 }
 0x376   : > { %v7172_v41 = vadd.f32 %v7171_v37, %v7170_v18  ;;  %v10241_v28 = vadd.f32 %v5169_v60, %v5009_v25 }
 0x377   : > { %v7622_v29 = vpop.f32.mrf.mxu1  ;;  %v7173_v7 = vpop.f32.mrf.mxu0 }
 0x378   : > { %v5012_v38 = vadd.f32 %v7172_v41, %v4707_v14 }
 0x379   : > { %v5188_v46 = vpop.f32.mrf.mxu1  ;;  %v7174_v54 = vpop.f32.mrf.mxu0 }
 0x37a   : > { %v7175_v17 = vadd.f32 %v7174_v54, %v7173_v7  ;;  %v10243_v51 = vadd.f32 %v5172_v15, %v5012_v38 }
 0x37b   : > { %v7625_v27 = vpop.f32.mrf.mxu1  ;;  %v7176_v53 = vpop.f32.mrf.mxu0 }
 0x37c   : > { %v5017_v57 = vadd.f32 %v7175_v17, %v10129_v22 }
 0x37d   : > { %v5201_v31 = vpop.f32.mrf.mxu1  ;;  %v7177_v50 = vpop.f32.mrf.mxu0 }
 0x37e   : > { %v7178_v47 = vadd.f32 %v7177_v50, %v7176_v53  ;;  %v10246_v4 = vadd.f32 %v7617_v19, %v5017_v57 }
 0x37f   : > { %v7626_v3 = vpop.f32.mrf.mxu1  ;;  %v7179_v8 = vpop.f32.mrf.mxu0 }
 0x380   : > { %v5020_v60 = vadd.f32 %v7178_v47, %v10133_v35 }
 0x381   : > { %v5204_v36 = vpop.f32.mrf.mxu1  ;;  %v7180_v52 = vpop.f32.mrf.mxu0 }
 0x382   : > { %v7181_v49 = vadd.f32 %v7180_v52, %v7179_v8  ;;  %v10249_v21 = vadd.f32 %v7618_v55, %v5020_v60 }
 0x383   : > { %v10251_v15 = vpop.f32.mrf.mxu1  ;;  %v7182_v33 = vpop.f32.mrf.mxu0 }
 0x384   : > { %v5025_v0 = vadd.f32 %v7181_v49, %v10141_v34 }
 0x385   : > { %v5217_v22 = vpop.f32.mrf.mxu1  ;;  %v7183_v18 = vpop.f32.mrf.mxu0 }
 0x386   : > { %v7184_v25 = vadd.f32 %v7183_v18, %v7182_v33  ;;  %v10254_v37 = vadd.f32 %v5185_v62, %v5025_v0 }
 0x387   : > { %v10256_v19 = vpop.f32.mrf.mxu1  ;;  %v7185_v14 = vpop.f32.mrf.mxu0 }
 0x388   : > { %v5028_v35 = vadd.f32 %v7184_v25, %v10144_v63 }
 0x389   : > { %v5220_v41 = vpop.f32.mrf.mxu1  ;;  %v7186_v7 = vpop.f32.mrf.mxu0 }
 0x38a   : > { %v7187_v38 = vadd.f32 %v7186_v7, %v7185_v14  ;;  %v10259_v55 = vadd.f32 %v5188_v46, %v5028_v35 }
 0x38b   : > { %v10261_v54 = vpop.f32.mrf.mxu1  ;;  %v7188_v17 = vpop.f32.mrf.mxu0 }
 0x38c   : > { %v5033_v34 = vadd.f32 %v7187_v38, %v10149_v20 }
 0x38d   : > { %v10264_v53 = vpop.f32.mrf.mxu1  ;;  %v7189_v57 = vpop.f32.mrf.mxu0 }
 0x38e   : > { %v7190_v62 = vadd.f32 %v7189_v57, %v7188_v17  ;;  %v10266_v50 = vadd.f32 %v7621_v11, %v5033_v34 }
 0x38f   : > { %v10268_v47 = vpop.f32.mrf.mxu1  ;;  %v7191_v8 = vpop.f32.mrf.mxu0 }
 0x390   : > { %v5036_v63 = vadd.f32 %v7190_v62, %v10152_v56 }
 0x391   : > { %v10271_v60 = vpop.f32.mrf.mxu1  ;;  %v7192_v46 = vpop.f32.mrf.mxu0 }
 0x392   : > { %v7193_v52 = vadd.f32 %v7192_v46, %v7191_v8  ;;  %v10273_v49 = vadd.f32 %v7622_v29, %v5036_v63 }
 0x393   : > { %v10275_v33 = vpop.f32.mrf.mxu1  ;;  %v7194_v20 = vpop.f32.mrf.mxu0 }
 0x394   : > { %v5041_v0 = vadd.f32 %v7193_v52, %v10157_v12 }
 0x395   : > { %v10278_v18 = vpop.f32.mrf.mxu1  ;;  %v7195_v11 = vpop.f32.mrf.mxu0 }
 0x396   : > { %v7196_v25 = vadd.f32 %v7195_v11, %v7194_v20  ;;  %v10280_v14 = vadd.f32 %v5201_v31, %v5041_v0 }
 0x397   : > { %v10282_v35 = vpop.f32.mrf.mxu1  ;;  %v7197_v56 = vpop.f32.mrf.mxu0 }
 0x398   : > { %v5044_v7 = vadd.f32 %v7196_v25, %v10161_v43 }
 0x399   : > { %v10285_v38 = vpop.f32.mrf.mxu1  ;;  %v7198_v29 = vpop.f32.mrf.mxu0 }
 0x39a   : > { %v7199_v17 = vadd.f32 %v7198_v29, %v7197_v56  ;;  %v10287_v34 = vadd.f32 %v5204_v36, %v5044_v7 }
 0x39b   : > { %v10289_v57 = vpop.f32.mrf.mxu1  ;;  %v7200_v12 = vpop.f32.mrf.mxu0 }
 0x39c   : > { %10683 = vst [vmem:[#allocation7_spill] sm:$0xff] %v10287_v34  ;;  %v5049_v62 = vadd.f32 %v7199_v17, %v10165_v58 }
 0x39d   : > { %v10292_v8 = vpop.f32.mrf.mxu1  ;;  %v7201_v31 = vpop.f32.mrf.mxu0 }
 0x39e   : > { %v7202_v63 = vadd.f32 %v7201_v31, %v7200_v12  ;;  %v10294_v46 = vadd.f32 %v7625_v27, %v5049_v62 }
 0x39f   : > { %v10296_v52 = vpop.f32.mrf.mxu1  ;;  %v7203_v43 = vpop.f32.mrf.mxu0 }
 0x3a0   : > { %v5052_v20 = vadd.f32 %v7202_v63, %v10169_v10 }
 0x3a1   : > { %v10299_v0 = vpop.f32.mrf.mxu1  ;;  %v7204_v36 = vpop.f32.mrf.mxu0 }
 0x3a2   : > { %v7205_v11 = vadd.f32 %v7204_v36, %v7203_v43  ;;  %v10301_v25 = vadd.f32 %v7626_v3, %v5052_v20 }
 0x3a3   : > { %v10303_v56 = vpop.f32.mrf.mxu1  ;;  %v7206_v58 = vpop.f32.mrf.mxu0 }
 0x3a4   : > { %v5057_v7 = vadd.f32 %v7205_v11, %v10173_v44 }
 0x3a5   : > { %v10306_v29 = vpop.f32.mrf.mxu1  ;;  %v7207_v27 = vpop.f32.mrf.mxu0 }
 0x3a6   : > { %v7208_v17 = vadd.f32 %v7207_v27, %v7206_v58  ;;  %v10308_v12 = vadd.f32 %v5217_v22, %v5057_v7 }
 0x3a7   : > { %v10310_v62 = vpop.f32.mrf.mxu1  ;;  %v7209_v10 = vpop.f32.mrf.mxu0 }
 0x3a8   : > { %v5060_v31 = vadd.f32 %v7208_v17, %v10178_v16 }
 0x3a9   : > { %v10313_v63 = vpop.f32.mrf.mxu1  ;;  %v7210_v3 = vpop.f32.mrf.mxu0 }
 0x3aa   : > { %v7211_v43 = vadd.f32 %v7210_v3, %v7209_v10  ;;  %v10315_v20 = vadd.f32 %v5220_v41, %v5060_v31 }
 0x3ab   : > { %v10317_v36 = vpop.f32.mrf.mxu1  ;;  %v7212_v44 = vpop.f32.mrf.mxu0 }
 0x3ac   : > { %10684 = vst [vmem:[#allocation8_spill] sm:$0xff] %v10315_v20  ;;  %v5065_v11 = vadd.f32 %v7211_v43, %v10182_v9 }
 0x3ad   : > { %v10320_v34 = vpop.f32.mrf.mxu1  ;;  %v7213_v22 = vpop.f32.mrf.mxu0 }
 0x3ae   : > { %v7214_v58 = vadd.f32 %v7213_v22, %v7212_v44  ;;  %v10323_v7 = vadd.f32 %v10251_v15, %v5065_v11 }
 0x3af   : > { %v10325_v27 = vpop.f32.mrf.mxu1  ;;  %v7215_v16 = vpop.f32.mrf.mxu0 }
 0x3b0   : > { %v5068_v17 = vadd.f32 %v7214_v58, %v10186_v13 }
 0x3b1   : > { %v10328_v10 = vpop.f32.mrf.mxu1  ;;  %v7216_v41 = vpop.f32.mrf.mxu0 }
 0x3b2   : > { %v7217_v31 = vadd.f32 %v7216_v41, %v7215_v16  ;;  %v10331_v3 = vadd.f32 %v10256_v19, %v5068_v17 }
 0x3b3   : > { %v10333_v9 = vpop.f32.mrf.mxu1  ;;  %v7218_v43 = vpop.f32.mrf.mxu0 }
 0x3b4   : > { %10685 = vst [vmem:[#allocation9_spill] sm:$0xff] %v10331_v3  ;;  %v5073_v44 = vadd.f32 %v7217_v31, %v10190_v39 }
 0x3b5   : > { %v10336_v22 = vpop.f32.mrf.mxu1  ;;  %v7219_v15 = vpop.f32.mrf.mxu0 }
 0x3b6   : > { %v7220_v11 = vadd.f32 %v7219_v15, %v7218_v43  ;;  %v10339_v20 = vadd.f32 %v10264_v53, %v5073_v44 }
 0x3b7   : > { %v10341_v13 = vpop.f32.mrf.mxu1  ;;  %v7221_v58 = vpop.f32.mrf.mxu0 }
 0x3b8   : > { %10686 = vst [vmem:[#allocation10_spill] sm:$0xff] %v10339_v20  ;;  %v5076_v16 = vadd.f32 %v7220_v11, %v10194_v2 }
 0x3b9   : > { %v10344_v41 = vpop.f32.mrf.mxu1  ;;  %v7222_v19 = vpop.f32.mrf.mxu0 }
 0x3ba   : > { %v7223_v17 = vadd.f32 %v7222_v19, %v7221_v58  ;;  %v10347_v3 = vadd.f32 %v10271_v60, %v5076_v16 }
 0x3bb   : > { %v10349_v39 = vpop.f32.mrf.mxu1  ;;  %v7224_v31 = vpop.f32.mrf.mxu0 }
 0x3bc   : > { %10687 = vst [vmem:[#allocation12_spill] sm:$0xff] %v10347_v3  ;;  %v5081_v43 = vadd.f32 %v7223_v17, %v10198_v23 }
 0x3bd   : > { %v10352_v15 = vpop.f32.mrf.mxu1  ;;  %v7225_v53 = vpop.f32.mrf.mxu0 }
 0x3be   : > { %v7226_v44 = vadd.f32 %v7225_v53, %v7224_v31  ;;  %v10355_v20 = vadd.f32 %v10261_v54, %v5081_v43 }
 0x3bf   : > { %v10357_v2 = vpop.f32.mrf.mxu1  ;;  %v7227_v11 = vpop.f32.mrf.mxu0 }
 0x3c0   : > { %10688 = vst [vmem:[#allocation3_spill] sm:$0xff] %v10355_v20  ;;  %v5084_v58 = vadd.f32 %v7226_v44, %v10202_v24 }
 0x3c1   : > { %v10360_v19 = vpop.f32.mrf.mxu1  ;;  %v7228_v60 = vpop.f32.mrf.mxu0 }
 0x3c2   : > { %v7229_v16 = vadd.f32 %v7228_v60, %v7227_v11  ;;  %v10363_v3 = vadd.f32 %v10268_v47, %v5084_v58 }
 0x3c3   : > { %v10365_v23 = vpop.f32.mrf.mxu1  ;;  %v7230_v17 = vpop.f32.mrf.mxu0 }
 0x3c4   : > { %10689 = vst [vmem:[#allocation5_spill] sm:$0xff] %v10363_v3  ;;  %v5089_v31 = vadd.f32 %v7229_v16, %v10204_v48 }
 0x3c5   : > { %v10368_v53 = vpop.f32.mrf.mxu1  ;;  %v7231_v54 = vpop.f32.mrf.mxu0 }
 0x3c6   : > { %v7232_v43 = vadd.f32 %v7231_v54, %v7230_v17  ;;  %v10371_v20 = vadd.f32 %v10278_v18, %v5089_v31  ;;  %v10692_v54 = vld [vmem:[#allocation11_spill] sm:$0xff] }
 0x3c7   : > { %v10373_v24 = vpop.f32.mrf.mxu1  ;;  %v7233_v44 = vpop.f32.mrf.mxu0  ;;  %v5813_v18 = vsub.s32 1, %v10692_v54  ;;  %v7948_v54 = vld [vmem:[%s10602_s3] sm:$0x3] }
 0x3c8   : > { %10690 = vst [vmem:[#allocation6_spill] sm:$0xff] %v10371_v20  ;;  %v5092_v11 = vadd.f32 %v7232_v43, %v10206_v40  ;;  %v7287_v40 = vadd.f32 %v10306_v29, %v10303_v56  ;;  %v7290_v29 = vadd.f32 %v10313_v63, %v10310_v62  ;;  %v7299_v63 = vadd.f32 %v10336_v22, %v10333_v9  ;;  %v7950_v9 = vld [vmem:[%s8095_s10] sm:$0xff] }
 0x3c9   : > { %v10376_v60 = vpop.f32.mrf.mxu1  ;;  %v7234_v47 = vpop.f32.mrf.mxu0 }
 0x3ca   : > { %v7235_v58 = vadd.f32 %v7234_v47, %v7233_v44  ;;  %v10379_v3 = vadd.f32 %v10285_v38, %v5092_v11  ;;  %v7281_v11 = vadd.f32 %v10292_v8, %v10289_v57 }
 0x3cb   : > { %v10381_v48 = vpop.f32.mrf.mxu1  ;;  %v7236_v16 = vpop.f32.mrf.mxu0 }
 0x3cc   : > { %10691 = vst [vmem:[#allocation4_spill] sm:$0xff] %v10379_v3  ;;  %v5097_v17 = vadd.f32 %v7235_v58, %v10211_v61  ;;  %v10400_v3 = vrot.slane %v7948_v54, %v5813_v18 }
 0x3cd   : > { %v10385_v31 = vpop.f32.mrf.mxu1  ;;  %v7237_v20 = vpop.f32.mrf.mxu0 }
 0x3ce   : > { %v10390_v43 = vadd.f32 %v10275_v33, %v5097_v17  ;;  %v7238_v44 = vadd.f32 %v7237_v20, %v7236_v16 }
 0x3cf   : > { %v10392_v47 = vpop.f32.mrf.mxu1  ;;  %v7657_v38 = vpop.f32.mrf.mxu0 }
 0x3d0   : > { %v5100_v61 = vadd.f32 %v7238_v44, %v10213_v42  ;;  %v5661_v58 = vadd.f32 %v7657_v38, %v7287_v40  ;;  %v7284_v44 = vadd.f32 %v10299_v0, %v10296_v52 }
 0x3d1   : > { %v10402_v56 = vpop.f32.mrf.mxu1  ;;  %v5652_v33 = vpop.f32.mrf.mxu0 }
 0x3d2   : > { %v10407_v20 = vadd.f32 %v10282_v35, %v5100_v61  ;;  %v5781_v42 = vadd.f32 %v5661_v58, %v10218_v59  ;;  %v5653_v57 = vadd.f32 %v7281_v11, %v5652_v33  ;;  %v7949_v59 = vld [vmem:[%s8095_s10 + $0x10] sm:$0xff] }
 0x3d3   : > { %v10410_v8 = vpop.f32.mrf.mxu1  ;;  %v7658_v16 = vpop.f32.mrf.mxu0 }
 0x3d4   : > { %v5817_v17 = vadd.f32 %v10400_v3, %v5781_v42  ;;  %v5779_v18 = vadd.f32 %v5653_v57, %v10216_v32  ;;  %v5664_v40 = vadd.f32 %v7658_v16, %v7290_v29  ;;  %v7302_v16 = vadd.f32 %v10344_v41, %v10341_v13 }
 0x3d5   : > { %v10416_v62 = vpop.f32.mrf.mxu1  ;;  %v5655_v35 = vpop.f32.mrf.mxu0 }
 0x3d6   : > { %v5849_v38 = vadd.f32 %v7949_v59, %v5817_v17  ;;  %v5815_v11 = vadd.f32 %v10400_v3, %v5779_v18  ;;  %v5782_v61 = vadd.f32 %v5664_v40, %v10223_v26  ;;  %v5656_v52 = vadd.f32 %v7284_v44, %v5655_v35  ;;  %v7951_v18 = vld [vmem:[%s8095_s10 + $0x18] sm:$0xff] }
 0x3d7   : > { %v10430_v32 = vpop.f32.mrf.mxu1  ;;  %v7661_v0 = vpop.f32.mrf.mxu0  ;;  %v7293_v26 = vadd.f32 %v10320_v34, %v10317_v36 }
 0x3d8   : > { %v5881_v58 = vmax.f32 %v5849_v38, 0.0  ;;  %v5847_v22 = vadd.f32 %v7950_v9, %v5815_v11  ;;  %v5818_v54 = vadd.f32 %v10400_v3, %v5782_v61  ;;  %v5677_v33 = vadd.f32 %v7661_v0, %v7299_v63  ;;  %v7952_v38 = vld [vmem:[%s8095_s10 + $0x8] sm:$0xff] }
 0x3d9   : > { %v10436_v29 = vpop.f32.mrf.mxu1  ;;  %v5780_v42 = vadd.f32 %v5656_v52, %v10221_v45  ;;  %v5668_v57 = vpop.f32.mrf.mxu0  ;;  %v7296_v45 = vadd.f32 %v10328_v10, %v10325_v27  ;;  %v7311_v0 = vadd.f32 %v10368_v53, %v10365_v23 }
 0x3da   : > { %5913 = vst [vmem:[%s10428_s25 + $0x10] sm:$0xff] %v5881_v58  ;;  %v5879_v17 = vmax.f32 %v5847_v22, 0.0  ;;  %v5850_v40 = vadd.f32 %v7951_v18, %v5818_v54  ;;  %v5785_v44 = vadd.f32 %v5677_v33, %v10233_v30  ;;  %v5669_v36 = vadd.f32 %v7293_v26, %v5668_v57  ;;  %v7953_v58 = vld [vmem:[%s8095_s10 + $0x30] sm:$0xff] }
 0x3db   : > { %v10444_v35 = vpop.f32.mrf.mxu1  ;;  %v5816_v34 = vadd.f32 %v10400_v3, %v5780_v42  ;;  %v7662_v63 = vpop.f32.mrf.mxu0  ;;  %v7305_v57 = vadd.f32 %v10352_v15, %v10349_v39 }
 0x3dc   : > { %5911 = vst [vmem:[%s10428_s25] sm:$0xff] %v5879_v17  ;;  %v5882_v59 = vmax.f32 %v5850_v40, 0.0  ;;  %v5821_v13 = vadd.f32 %v10400_v3, %v5785_v44  ;;  %v5680_v41 = vadd.f32 %v7662_v63, %v7302_v16  ;;  %v5783_v30 = vadd.f32 %v5669_v36, %v10228_v6  ;;  %v7955_v44 = vld [vmem:[%s8095_s10 + $0x38] sm:$0xff] }
 0x3dd   : > { %v5848_v11 = vadd.f32 %v7952_v38, %v5816_v34  ;;  %v10452_v61 = vpop.f32.mrf.mxu1  ;;  %v5671_v52 = vpop.f32.mrf.mxu0  ;;  %v7314_v40 = vadd.f32 %v10376_v60, %v10373_v24  ;;  %v7308_v60 = vadd.f32 %v10360_v19, %v10357_v2 }
 0x3de   : > { %5914 = vst [vmem:[%s10428_s25 + $0x18] sm:$0xff] %v5882_v59  ;;  %v5853_v27 = vadd.f32 %v7953_v58, %v5821_v13  ;;  %v5786_v10 = vadd.f32 %v5680_v41, %v10236_v1  ;;  %v5672_v9 = vadd.f32 %v7296_v45, %v5671_v52  ;;  %v5819_v33 = vadd.f32 %v10400_v3, %v5783_v30  ;;  %v7954_v1 = vld [vmem:[%s8095_s10 + $0x20] sm:$0xff]  ;;  %v7956_v13 = vld [vmem:[%s8095_s10 + $0x28] sm:$0xff]  ;;  %v7957_v58 = vld [vmem:[%s8095_s10 + $0x50] sm:$0xff] }
 0x3df   : > { %v5880_v22 = vmax.f32 %v5848_v11, 0.0  ;;  %v10460_v54 = vpop.f32.mrf.mxu1  ;;  %v7665_v6 = vpop.f32.mrf.mxu0  ;;  %v7323_v52 = vadd.f32 %v10416_v62, %v10410_v8 }
 0x3e0   : > { %v5885_v26 = vmax.f32 %v5853_v27, 0.0  ;;  %v5822_v42 = vadd.f32 %v10400_v3, %v5786_v10  ;;  %v5784_v23 = vadd.f32 %v5672_v9, %v10230_v5  ;;  %v5693_v53 = vadd.f32 %v7665_v6, %v7311_v0  ;;  %v7958_v6 = vld [vmem:[%s8095_s10 + $0x40] sm:$0xff] }
 0x3e1   : > { %5912 = vst [vmem:[%s10428_s25 + $0x8] sm:$0xff] %v5880_v22  ;;  %v5851_v16 = vadd.f32 %v7954_v1, %v5819_v33  ;;  %v10469_v17 = vpop.f32.mrf.mxu1  ;;  %v5684_v18 = vpop.f32.mrf.mxu0 }
 0x3e2   : > { %5917 = vst [vmem:[%s10428_s25 + $0x30] sm:$0xff] %v5885_v26  ;;  %v5854_v34 = vadd.f32 %v7955_v44, %v5822_v42  ;;  %v5820_v5 = vadd.f32 %v10400_v3, %v5784_v23  ;;  %v5789_v36 = vadd.f32 %v5693_v53, %v10246_v4  ;;  %v5685_v63 = vadd.f32 %v7305_v57, %v5684_v18  ;;  %v7959_v57 = vld [vmem:[%s8095_s10 + $0x58] sm:$0xff] }
 0x3e3   : > { %v5883_v39 = vmax.f32 %v5851_v16, 0.0  ;;  %v7333_v15 = vpop.f32.mrf.mxu1  ;;  %v7666_v45 = vpop.f32.mrf.mxu0  ;;  %v7326_v53 = vadd.f32 %v10436_v29, %v10430_v32 }
 0x3e4   : > { %v5886_v59 = vmax.f32 %v5854_v34, 0.0  ;;  %v5852_v41 = vadd.f32 %v7956_v13, %v5820_v5  ;;  %v5825_v38 = vadd.f32 %v10400_v3, %v5789_v36  ;;  %v5696_v24 = vadd.f32 %v7666_v45, %v7314_v40 }
 0x3e5   : > { %5915 = vst [vmem:[%s10428_s25 + $0x20] sm:$0xff] %v5883_v39  ;;  %v7334_v11 = vpop.f32.mrf.mxu1  ;;  %v5787_v4 = vadd.f32 %v5685_v63, %v10241_v28  ;;  %v5687_v30 = vpop.f32.mrf.mxu0  ;;  %v7317_v28 = vadd.f32 %v10385_v31, %v10381_v48  ;;  %v7320_v5 = vadd.f32 %v10402_v56, %v10392_v47 }
 0x3e6   : > { %5918 = vst [vmem:[%s10428_s25 + $0x38] sm:$0xff] %v5886_v59  ;;  %v5884_v0 = vmax.f32 %v5852_v41, 0.0  ;;  %v5857_v27 = vadd.f32 %v7957_v58, %v5825_v38  ;;  %v5790_v10 = vadd.f32 %v5696_v24, %v10249_v21  ;;  %v5688_v19 = vadd.f32 %v7308_v60, %v5687_v30  ;;  %v7961_v59 = vld [vmem:[%s8095_s10 + $0x70] sm:$0xff] }
 0x3e7   : > { %v7336_v9 = vpop.f32.mrf.mxu1  ;;  %v5823_v2 = vadd.f32 %v10400_v3, %v5787_v4  ;;  %v7669_v22 = vpop.f32.mrf.mxu0  ;;  %v7335_v45 = vadd.f32 %v7334_v11, %v7333_v15  ;;  %v7962_v4 = vld [vmem:[%s8095_s10 + $0x60] sm:$0xff] }
 0x3e8   : > { %5916 = vst [vmem:[%s10428_s25 + $0x28] sm:$0xff] %v5884_v0  ;;  %v5889_v33 = vmax.f32 %v5857_v27, 0.0  ;;  %v5826_v8 = vadd.f32 %v10400_v3, %v5790_v10  ;;  %v5709_v62 = vadd.f32 %v7669_v22, %v7323_v52  ;;  %v5788_v21 = vadd.f32 %v5688_v19, %v10243_v51 }
 0x3e9   : > { %v5855_v26 = vadd.f32 %v7958_v6, %v5823_v2  ;;  %v7337_v42 = vpop.f32.mrf.mxu1  ;;  %v5700_v23 = vpop.f32.mrf.mxu0  ;;  %v7329_v52 = vadd.f32 %v10452_v61, %v10444_v35  ;;  %v7963_v2 = vld [vmem:[%s8095_s10 + $0x78] sm:$0xff]  ;;  %v7964_v6 = vld [vmem:[%s8095_s10 + $0x68] sm:$0xff] }
 0x3ea   : > { %5921 = vst [vmem:[%s10428_s25 + $0x50] sm:$0xff] %v5889_v33  ;;  %v5858_v1 = vadd.f32 %v7959_v57, %v5826_v8  ;;  %v5793_v48 = vadd.f32 %v5709_v62, %v10266_v50  ;;  %v5701_v31 = vadd.f32 %v7317_v28, %v5700_v23  ;;  %v5824_v40 = vadd.f32 %v10400_v3, %v5788_v21  ;;  %v7960_v50 = vld [vmem:[%s8095_s10 + $0x48] sm:$0xff] }
 0x3eb   : > { %v5887_v16 = vmax.f32 %v5855_v26, 0.0  ;;  %v10500_v18 = vpop.f32.mrf.mxu1  ;;  %v7670_v51 = vpop.f32.mrf.mxu0  ;;  %v7338_v27 = vadd.f32 %v7337_v42, %v7336_v9  ;;  %v7332_v8 = vadd.f32 %v10469_v17, %v10460_v54 }
 0x3ec   : > { %v5890_v44 = vmax.f32 %v5858_v1, 0.0  ;;  %v5829_v34 = vadd.f32 %v10400_v3, %v5793_v48  ;;  %v5791_v32 = vadd.f32 %v5701_v31, %v10254_v37  ;;  %v5712_v29 = vadd.f32 %v7670_v51, %v7326_v53  ;;  %v7965_v53 = vld [vmem:[%s8095_s10 + $0x90] sm:$0xff]  ;;  %v10693_v51 = vld [vmem:[#allocation7_spill] sm:$0xff] }
 0x3ed   : > { %5919 = vst [vmem:[%s10428_s25 + $0x40] sm:$0xff] %v5887_v16  ;;  %v5856_v36 = vadd.f32 %v7960_v50, %v5824_v40  ;;  %v7340_v39 = vpop.f32.mrf.mxu1  ;;  %v5703_v63 = vpop.f32.mrf.mxu0 }
 0x3ee   : > { %5922 = vst [vmem:[%s10428_s25 + $0x58] sm:$0xff] %v5890_v44  ;;  %v5861_v13 = vadd.f32 %v7961_v59, %v5829_v34  ;;  %v5827_v41 = vadd.f32 %v10400_v3, %v5791_v32  ;;  %v5794_v38 = vadd.f32 %v5712_v29, %v10273_v49  ;;  %v5704_v47 = vadd.f32 %v7320_v5, %v5703_v63  ;;  %v7966_v29 = vld [vmem:[%s8095_s10 + $0x80] sm:$0xff]  ;;  %v7967_v63 = vld [vmem:[%s8095_s10 + $0x98] sm:$0xff] }
 0x3ef   : > { %v5888_v37 = vmax.f32 %v5856_v36, 0.0  ;;  %v10513_v24 = vpop.f32.mrf.mxu1  ;;  %v7673_v56 = vpop.f32.mrf.mxu0  ;;  %v7341_v32 = vadd.f32 %v7340_v39, %v10500_v18 }
 0x3f0   : > { %v5893_v60 = vmax.f32 %v5861_v13, 0.0  ;;  %v5859_v30 = vadd.f32 %v7962_v4, %v5827_v41  ;;  %v5830_v15 = vadd.f32 %v10400_v3, %v5794_v38  ;;  %v5725_v11 = vadd.f32 %v7673_v56, %v7335_v45 }
 0x3f1   : > { %5920 = vst [vmem:[%s10428_s25 + $0x48] sm:$0xff] %v5888_v37  ;;  %v7343_v0 = vpop.f32.mrf.mxu1  ;;  %v5792_v49 = vadd.f32 %v5704_v47, %v10259_v55  ;;  %v5716_v58 = vpop.f32.mrf.mxu0  ;;  %v7968_v47 = vld [vmem:[%s8095_s10 + $0x88] sm:$0xff] }
 0x3f2   : > { %5925 = vst [vmem:[%s10428_s25 + $0x70] sm:$0xff] %v5893_v60  ;;  %v5891_v10 = vmax.f32 %v5859_v30, 0.0  ;;  %v5862_v19 = vadd.f32 %v7963_v2, %v5830_v15  ;;  %v5797_v22 = vadd.f32 %v5725_v11, %v10294_v46  ;;  %v5717_v35 = vadd.f32 %v7329_v52, %v5716_v58 }
 0x3f3   : > { %v7345_v28 = vpop.f32.mrf.mxu1  ;;  %v5828_v33 = vadd.f32 %v10400_v3, %v5792_v49  ;;  %v7674_v61 = vpop.f32.mrf.mxu0  ;;  %v7344_v30 = vadd.f32 %v7343_v0, %v10513_v24  ;;  %v7969_v49 = vld [vmem:[%s8095_s10 + $0xb0] sm:$0xff] }
 0x3f4   : > { %5923 = vst [vmem:[%s10428_s25 + $0x60] sm:$0xff] %v5891_v10  ;;  %v5894_v55 = vmax.f32 %v5862_v19, 0.0  ;;  %v5833_v9 = vadd.f32 %v10400_v3, %v5797_v22  ;;  %v5728_v62 = vadd.f32 %v7674_v61, %v7338_v27  ;;  %v5795_v21 = vadd.f32 %v5717_v35, %v10280_v14  ;;  %v10694_v27 = vld [vmem:[#allocation9_spill] sm:$0xff] }
 0x3f5   : > { %v5860_v26 = vadd.f32 %v7964_v6, %v5828_v33  ;;  %v7346_v42 = vpop.f32.mrf.mxu1  ;;  %v5719_v46 = vpop.f32.mrf.mxu0 }
 0x3f6   : > { %5926 = vst [vmem:[%s10428_s25 + $0x78] sm:$0xff] %v5894_v55  ;;  %v7347_v23 = vadd.f32 %v7346_v42, %v7345_v28  ;;  %v5865_v57 = vadd.f32 %v7965_v53, %v5833_v9  ;;  %v5798_v1 = vadd.f32 %v5728_v62, %v10301_v25  ;;  %v5720_v54 = vadd.f32 %v7332_v8, %v5719_v46  ;;  %v10695_v8 = vld [vmem:[#allocation8_spill] sm:$0xff]  ;;  %v7971_v62 = vld [vmem:[%s8095_s10 + $0xb8] sm:$0xff] }
 0x3f7   : > { %v5892_v17 = vmax.f32 %v5860_v26, 0.0  ;;  %v7348_v48 = vpop.f32.mrf.mxu1  ;;  %v5831_v31 = vadd.f32 %v10400_v3, %v5795_v21  ;;  %v7677_v16 = vpop.f32.mrf.mxu0 }
 0x3f8   : > { %v5897_v40 = vmax.f32 %v5865_v57, 0.0  ;;  %v5834_v14 = vadd.f32 %v10400_v3, %v5798_v1  ;;  %v5796_v44 = vadd.f32 %v5720_v54, %v10693_v51  ;;  %v5741_v34 = vadd.f32 %v7677_v16, %v7347_v23  ;;  %v10696_v1 = vld [vmem:[#allocation10_spill] sm:$0xff] }
 0x3f9   : > { %5924 = vst [vmem:[%s10428_s25 + $0x68] sm:$0xff] %v5892_v17  ;;  %v5863_v25 = vadd.f32 %v7966_v29, %v5831_v31  ;;  %v7349_v5 = vpop.f32.mrf.mxu1  ;;  %v5732_v50 = vpop.f32.mrf.mxu0  ;;  %v7972_v17 = vld [vmem:[%s8095_s10 + $0xa8] sm:$0xff] }
 0x3fa   : > { %5929 = vst [vmem:[%s10428_s25 + $0x90] sm:$0xff] %v5897_v40  ;;  %v7350_v36 = vadd.f32 %v7349_v5, %v7348_v48  ;;  %v5866_v45 = vadd.f32 %v7967_v63, %v5834_v14  ;;  %v5832_v59 = vadd.f32 %v10400_v3, %v5796_v44  ;;  %v5801_v13 = vadd.f32 %v5741_v34, %v10323_v7 }
 0x3fb   : > { %v5895_v41 = vmax.f32 %v5863_v25, 0.0  ;;  %v7351_v38 = vpop.f32.mrf.mxu1  ;;  %v5733_v18 = vadd.f32 %v7341_v32, %v5732_v50  ;;  %v7678_v39 = vpop.f32.mrf.mxu0  ;;  %v7973_v25 = vld [vmem:[%s8095_s10 + $0xc0] sm:$0xff] }
 0x3fc   : > { %v5898_v37 = vmax.f32 %v5866_v45, 0.0  ;;  %v5864_v56 = vadd.f32 %v7968_v47, %v5832_v59  ;;  %v5837_v60 = vadd.f32 %v10400_v3, %v5801_v13  ;;  %v5744_v4 = vadd.f32 %v7678_v39, %v7350_v36  ;;  %v10697_v50 = vld [vmem:[#allocation12_spill] sm:$0xff]  ;;  %v10698_v59 = vld [vmem:[#allocation3_spill] sm:$0xff] }
 0x3fd   : > { %5927 = vst [vmem:[%s10428_s25 + $0x80] sm:$0xff] %v5895_v41  ;;  %v7352_v15 = vpop.f32.mrf.mxu1  ;;  %v5799_v11 = vadd.f32 %v5733_v18, %v10308_v12  ;;  %v5735_v7 = vpop.f32.mrf.mxu0  ;;  %v7970_v12 = vld [vmem:[%s8095_s10 + $0xa0] sm:$0xff] }
 0x3fe   : > { %5930 = vst [vmem:[%s10428_s25 + $0x98] sm:$0xff] %v5898_v37  ;;  %v5896_v52 = vmax.f32 %v5864_v56, 0.0  ;;  %v5869_v58 = vadd.f32 %v7969_v49, %v5837_v60  ;;  %v5802_v10 = vadd.f32 %v5744_v4, %v10694_v27  ;;  %v5736_v22 = vadd.f32 %v7344_v30, %v5735_v7  ;;  %v7974_v56 = vld [vmem:[%s8095_s10 + $0xc8] sm:$0xff] }
 0x3ff   : > { %v7354_v2 = vpop.f32.mrf.mxu1  ;;  %v5835_v19 = vadd.f32 %v10400_v3, %v5799_v11  ;;  %v7681_v28 = vpop.f32.mrf.mxu0  ;;  %v7353_v24 = vadd.f32 %v7352_v15, %v7351_v38  ;;  %v7975_v15 = vld [vmem:[%s8095_s10 + $0xd0] sm:$0xff]  ;;  %v10699_v7 = vld [vmem:[#allocation5_spill] sm:$0xff] }
 0x400   : > { %5928 = vst [vmem:[%s10428_s25 + $0x88] sm:$0xff] %v5896_v52  ;;  %v5901_v0 = vmax.f32 %v5869_v58, 0.0  ;;  %v5838_v33 = vadd.f32 %v10400_v3, %v5802_v10  ;;  %v5800_v55 = vadd.f32 %v5736_v22, %v10695_v8 }
 0x401   : > { %v5867_v35 = vadd.f32 %v7970_v12, %v5835_v19  ;;  %v7355_v61 = vpop.f32.mrf.mxu1  ;;  %v5748_v9 = vpop.f32.mrf.mxu0 }
 0x402   : > { %5933 = vst [vmem:[%s10428_s25 + $0xb0] sm:$0xff] %v5901_v0  ;;  %v5870_v6 = vadd.f32 %v7971_v62, %v5838_v33  ;;  %v5749_v26 = vadd.f32 %v7353_v24, %v5748_v9  ;;  %v5836_v46 = vadd.f32 %v10400_v3, %v5800_v55  ;;  %v7356_v53 = vadd.f32 %v7355_v61, %v7354_v2  ;;  %v7976_v24 = vld [vmem:[%s8095_s10 + $0xd8] sm:$0xff]  ;;  %v10700_v33 = vld [vmem:[#allocation6_spill] sm:$0xff] }
 0x403   : > { %v5899_v42 = vmax.f32 %v5867_v35, 0.0  ;;  %v7357_v21 = vpop.f32.mrf.mxu1  ;;  %v7682_v23 = vpop.f32.mrf.mxu0 }
 0x404   : > { %v5902_v57 = vmax.f32 %v5870_v6, 0.0  ;;  %v5803_v54 = vadd.f32 %v5749_v26, %v10696_v1  ;;  %v5868_v48 = vadd.f32 %v7972_v17, %v5836_v46  ;;  %v7977_v6 = vld [vmem:[%s8095_s10 + $0xe0] sm:$0xff]  ;;  %v7978_v17 = vld [vmem:[%s8095_s10 + $0xe8] sm:$0xff] }
 0x405   : > { %5931 = vst [vmem:[%s10428_s25 + $0xa0] sm:$0xff] %v5899_v42  ;;  %v7358_v31 = vpop.f32.mrf.mxu1  ;;  %v5751_v16 = vpop.f32.mrf.mxu0  ;;  %v10701_v42 = vld [vmem:[#allocation4_spill] sm:$0xff] }
 0x406   : > { %5934 = vst [vmem:[%s10428_s25 + $0xb8] sm:$0xff] %v5902_v57  ;;  %v7359_v40 = vadd.f32 %v7358_v31, %v7357_v21  ;;  %v5839_v14 = vadd.f32 %v10400_v3, %v5803_v54  ;;  %v5752_v51 = vadd.f32 %v7356_v53, %v5751_v16  ;;  %v5900_v44 = vmax.f32 %v5868_v48, 0.0 }
 0x407   : > { %v7360_v34 = vpop.f32.mrf.mxu1  ;;  %v7685_v32 = vpop.f32.mrf.mxu0 }
 0x408   : > { %v5757_v29 = vadd.f32 %v7681_v28, %v7359_v40  ;;  %v5871_v5 = vadd.f32 %v7973_v25, %v5839_v14  ;;  %v5804_v36 = vadd.f32 %v5752_v51, %v10697_v50  ;;  %5932 = vst [vmem:[%s10428_s25 + $0xa8] sm:$0xff] %v5900_v44  ;;  %v7979_v44 = vld [vmem:[%s8095_s10 + $0xf0] sm:$0xff] }
 0x409   : > { %v7361_v63 = vpop.f32.mrf.mxu1  ;;  %v5764_v45 = vpop.f32.mrf.mxu0 }
 0x40a   : > { %v5805_v13 = vadd.f32 %v5757_v29, %v10698_v59  ;;  %v5903_v41 = vmax.f32 %v5871_v5, 0.0  ;;  %v7362_v38 = vadd.f32 %v7361_v63, %v7360_v34  ;;  %v5840_v18 = vadd.f32 %v10400_v3, %v5804_v36  ;;  %v7980_v5 = vld [vmem:[%s8095_s10 + $0xf8] sm:$0xff] }
 0x40b   : > { %v7363_v39 = vpop.f32.mrf.mxu1  ;;  %v7686_v30 = vpop.f32.mrf.mxu0 }
 0x40c   : > { %v5841_v37 = vadd.f32 %v10400_v3, %v5805_v13  ;;  %5935 = vst [vmem:[%s10428_s25 + $0xc0] sm:$0xff] %v5903_v41  ;;  %v5760_v47 = vadd.f32 %v7682_v23, %v7362_v38  ;;  %v5872_v60 = vadd.f32 %v7974_v56, %v5840_v18 }
 0x40d   : > { %v7364_v4 = vpop.f32.mrf.mxu1  ;;  %v5767_v28 = vpop.f32.mrf.mxu0 }
 0x40e   : > { %v5873_v11 = vadd.f32 %v7975_v15, %v5841_v37  ;;  %v5806_v52 = vadd.f32 %v5760_v47, %v10699_v7  ;;  %v5904_v49 = vmax.f32 %v5872_v60, 0.0  ;;  %v7365_v58 = vadd.f32 %v7364_v4, %v7363_v39 }
 0x40f   : > { %v7366_v27 = vpop.f32.mrf.mxu1 }
 0x410   : > { %v5905_v10 = vmax.f32 %v5873_v11, 0.0  ;;  %v5842_v2 = vadd.f32 %v10400_v3, %v5806_v52  ;;  %5936 = vst [vmem:[%s10428_s25 + $0xc8] sm:$0xff] %v5904_v49  ;;  %v5765_v19 = vadd.f32 %v7365_v58, %v5764_v45 }
 0x411   : > { %v7367_v22 = vpop.f32.mrf.mxu1 }
 0x412   : > { %5937 = vst [vmem:[%s10428_s25 + $0xd0] sm:$0xff] %v5905_v10  ;;  %v5874_v0 = vadd.f32 %v7976_v24, %v5842_v2  ;;  %v5807_v12 = vadd.f32 %v5765_v19, %v10700_v33  ;;  %v7368_v35 = vadd.f32 %v7367_v22, %v7366_v27 }
 0x413   : > { %v7369_v61 = vpop.f32.mrf.mxu1 }
 0x414   : > { %v5906_v8 = vmax.f32 %v5874_v0, 0.0  ;;  %v5843_v55 = vadd.f32 %v10400_v3, %v5807_v12  ;;  %v5768_v9 = vadd.f32 %v7368_v35, %v5767_v28 }
 0x415   : > { %v7370_v62 = vpop.f32.mrf.mxu1 }
 0x416   : > { %5938 = vst [vmem:[%s10428_s25 + $0xd8] sm:$0xff] %v5906_v8  ;;  %v5875_v26 = vadd.f32 %v7977_v6, %v5843_v55  ;;  %v5808_v21 = vadd.f32 %v5768_v9, %v10701_v42  ;;  %v7371_v46 = vadd.f32 %v7370_v62, %v7369_v61 }
 0x417   : > { %v7372_v23 = vpop.f32.mrf.mxu1 }
 0x418   : > { %v5907_v53 = vmax.f32 %v5875_v26, 0.0  ;;  %v5844_v57 = vadd.f32 %v10400_v3, %v5808_v21  ;;  %v5773_v1 = vadd.f32 %v7685_v32, %v7371_v46 }
 0x419   : > { %v7373_v54 = vpop.f32.mrf.mxu1 }
 0x41a   : > { %5939 = vst [vmem:[%s10428_s25 + $0xe0] sm:$0xff] %v5907_v53  ;;  %v5876_v48 = vadd.f32 %v7978_v17, %v5844_v57  ;;  %v5809_v31 = vadd.f32 %v5773_v1, %v10390_v43  ;;  %v7374_v16 = vadd.f32 %v7373_v54, %v7372_v23 }
 0x41c   : > { %v5908_v40 = vmax.f32 %v5876_v48, 0.0  ;;  %v5845_v14 = vadd.f32 %v10400_v3, %v5809_v31  ;;  %v5776_v51 = vadd.f32 %v7686_v30, %v7374_v16 }
 0x41e   : > { %5940 = vst [vmem:[%s10428_s25 + $0xe8] sm:$0xff] %v5908_v40  ;;  %v5877_v34 = vadd.f32 %v7979_v44, %v5845_v14  ;;  %v5810_v29 = vadd.f32 %v5776_v51, %v10407_v20 }
 0x420   : > { %v5909_v32 = vmax.f32 %v5877_v34, 0.0  ;;  %v5846_v25 = vadd.f32 %v10400_v3, %v5810_v29 }
 0x422   : > { %5941 = vst [vmem:[%s10428_s25 + $0xf0] sm:$0xff] %v5909_v32  ;;  %v5878_v50 = vadd.f32 %v7980_v5, %v5846_v25 }
 0x424   : > { %v5910_v36 = vmax.f32 %v5878_v50, 0.0 }
 0x426   : > { %5942 = vst [vmem:[%s10428_s25 + $0xf8] sm:$0xff] %v5910_v36 }
 0x427 PF: > { %s14_s15 = sadd.s32 1, %s7987_s15  }
 0x428   : > { %p11_p4 = scmp.ge.s32.totalorder %s14_s15, 4  }
 0x42a   :  { %13 = sbr.rel (!%p11_p4) target bundleno = 1 (0x1), region = 72 }

</bundles_post_ra>
